<compile_context>
chip_gen: v7x
topology: tpu7x:2x2x1
jax: 0.10.0
libtpu: 0.0.40
codegen_flags: <defaults>
</compile_context>

<pallas_src>
import functools
import math

import jax
import jax.numpy as jnp
import numpy as np
from jax.experimental import pallas as pl
from jax.experimental.pallas import tpu as pltpu

NUM_TOKENS = 6
LN_EPS = 1e-5

# Row layout of the packed [n_rows, VW] f32 vector table.
ROW_PRE0 = 0                              # rows 0..5 : pre bias + PE per token
ROW_BOUT = NUM_TOKENS                     # row 6     : output bias (LN beta folded in)
ROW_LAYER0 = NUM_TOKENS + 1               # rows 7... : per-encoder-layer vectors
VEC_ROWS_PER_LAYER = 8                    # b_qkv, bo, ln1_g, ln1_b, ffn_b1, ffn_b2, ln2_g, ln2_b


def _round_up(n, m):
    return ((n + m - 1) // m) * m


# --------------------------------------------------------------------------- #
#  Host-side packing of the split/flip/pad preprocessing into the pre weight.  #
# --------------------------------------------------------------------------- #
def _token_index(input_size):
    """idx[t, j] = source column of x for token t, position j (-1 => zero pad)."""
    if input_size % 6 == 1:
        n = (input_size - 1) // 6
        gauge = False
        sizes = [n + 1, n, n, n, n, n]
    else:
        n = (input_size + 1) // 6
        gauge = True
        sizes = [n + 1, n, n, n, n - 1, n - 1]
    offs = np.cumsum([0] + sizes)
    L = n + 1
    idx = -np.ones((NUM_TOKENS, L), dtype=np.int64)
    idx[0, :] = np.arange(offs[0], offs[1])                         # x0
    idx[1, 1:1 + sizes[1]] = np.arange(offs[1], offs[2])            # pad, x1
    idx[2, 1:1 + sizes[2]] = np.arange(offs[2], offs[3])[::-1]      # pad, flip(x2)
    idx[3, 1:1 + sizes[3]] = np.arange(offs[3], offs[4])            # pad, x3
    if gauge:
        idx[4, 2:2 + sizes[4]] = np.arange(offs[4], offs[5])[::-1]  # pad,pad,flip(x4)
        idx[5, 2:2 + sizes[5]] = np.arange(offs[5], offs[6])        # pad,pad,x5
    else:
        idx[4, 1:1 + sizes[4]] = np.arange(offs[4], offs[5])[::-1]  # pad, flip(x4)
        idx[5, 1:1 + sizes[5]] = np.arange(offs[5], offs[6])        # pad, x5
    return idx, n, gauge, sizes


# --------------------------------------------------------------------------- #
#  Parameter initialization (mirrors the PyTorch module's defaults).           #
# --------------------------------------------------------------------------- #
def init_raw_params(key, input_size, output_size=1, nhead=8, embedding_size=8,
                    hidden_size=256, block_numbers=1, pe_var=True):
    d_model = nhead * embedding_size
    idx, n, gauge, _ = _token_index(input_size)
    L = n + 1
    keys = iter(jax.random.split(key, 3 + 6 * block_numbers))

    def kaiming(k, fin, fout):
        return math.sqrt(2.0 / fin) * jax.random.normal(k, (fin, fout), jnp.float32)

    def zeros(sz):
        return jnp.zeros((sz,), jnp.float32)

    def ones(sz):
        return jnp.ones((sz,), jnp.float32)

    # TODO(synk): the original registers pe with shape (input_size, 1, d_model),
    # which cannot broadcast against the (6, B, d_model) token stack for any
    # valid input_size; we use the evidently intended per-token (6, d_model) PE.
    pe = (jax.random.normal(next(keys), (NUM_TOKENS, d_model), jnp.float32)
          if pe_var else jnp.zeros((NUM_TOKENS, d_model), jnp.float32))

    raw = {
        "N": n, "gauge": gauge, "input_size": input_size, "d_model": d_model,
        "nhead": nhead, "head_dim": embedding_size, "dff": hidden_size,
        "out": output_size, "n_layers": block_numbers,
        "w_pre": kaiming(next(keys), L, d_model), "b_pre": zeros(d_model),
        "pe": pe,
        "lnf_g": ones(NUM_TOKENS * d_model), "lnf_b": zeros(NUM_TOKENS * d_model),
        "w_out": kaiming(next(keys), NUM_TOKENS * d_model, output_size),
        "b_out": zeros(output_size),
        "layers": [],
    }
    for _ in range(block_numbers):
        raw["layers"].append({
            "wq": kaiming(next(keys), d_model, d_model), "bq": zeros(d_model),
            "wk": kaiming(next(keys), d_model, d_model), "bk": zeros(d_model),
            "wv": kaiming(next(keys), d_model, d_model), "bv": zeros(d_model),
            "wo": kaiming(next(keys), d_model, d_model), "bo": zeros(d_model),
            "ln1_g": ones(d_model), "ln1_b": zeros(d_model),
            "w1": kaiming(next(keys), d_model, hidden_size), "b1": zeros(hidden_size),
            "w2": kaiming(next(keys), hidden_size, d_model), "b2": zeros(d_model),
            "ln2_g": ones(d_model), "ln2_b": zeros(d_model),
        })
    return raw


def pack_params(raw, compute_dtype=jnp.bfloat16):
    """Pack raw params into a small set of kernel operands.

    Matmul weights are stored in `compute_dtype` (bf16 default: native MXU dtype,
    f32 accumulation in-kernel); biases / LN parameters stay f32.  The input
    split/flip/zero-pad is folded into w_pre; the final LayerNorm gamma/beta are
    folded into w_out / the output bias; wq|wk|wv are fused; wo is 6x-stacked.
    """
    D, DFF, OUT, NL = raw["d_model"], raw["dff"], raw["out"], raw["n_layers"]
    F_in = raw["input_size"]
    S, H, hd = NUM_TOKENS, raw["nhead"], raw["head_dim"]
    idx, n, _, _ = _token_index(F_in)
    L = n + 1
    out_pad = _round_up(max(OUT, 128), 128)

    # 1) pre-linear with the token selection / flip / zero-pad folded in.
    w_pre_raw = np.asarray(raw["w_pre"], np.float32)             # [L, D]
    w_pre = np.zeros((S, F_in, D), np.float32)
    for t in range(S):
        for j in range(L):
            src = int(idx[t, j])
            if src >= 0:
                w_pre[t, src, :] = w_pre_raw[j, :]

    # 2) bias / LN / PE vectors in one lane-dense f32 table.
    VW = _round_up(max(3 * D, DFF, out_pad, 128), 128)
    n_rows = _round_up(ROW_LAYER0 + VEC_ROWS_PER_LAYER * NL, 8)
    vecs = np.zeros((n_rows, VW), np.float32)
    b_pre = np.asarray(raw["b_pre"], np.float32)
    pe = np.asarray(raw["pe"], np.float32)
    for t in range(S):
        vecs[ROW_PRE0 + t, :D] = b_pre + pe[t]

    # 3) per-layer weights: fused QKV, 6x-stacked wo, FFN.
    w_qkv = np.zeros((NL, D, 3 * D), np.float32)
    wo_stack = np.zeros((NL, S * D, D), np.float32)
    w_ffn1 = np.zeros((NL, D, DFF), np.float32)
    w_ffn2 = np.zeros((NL, DFF, D), np.float32)
    for l, lyr in enumerate(raw["layers"]):
        w_qkv[l, :, 0:D] = np.asarray(lyr["wq"], np.float32)
        w_qkv[l, :, D:2 * D] = np.asarray(lyr["wk"], np.float32)
        w_qkv[l, :, 2 * D:3 * D] = np.asarray(lyr["wv"], np.float32)
        wo_stack[l] = np.tile(np.asarray(lyr["wo"], np.float32), (S, 1))
        w_ffn1[l] = np.asarray(lyr["w1"], np.float32)
        w_ffn2[l] = np.asarray(lyr["w2"], np.float32)
        base = ROW_LAYER0 + VEC_ROWS_PER_LAYER * l
        vecs[base + 0, 0:D] = np.asarray(lyr["bq"], np.float32)
        vecs[base + 0, D:2 * D] = np.asarray(lyr["bk"], np.float32)
        vecs[base + 0, 2 * D:3 * D] = np.asarray(lyr["bv"], np.float32)
        vecs[base + 1, :D] = np.asarray(lyr["bo"], np.float32)
        vecs[base + 2, :D] = np.asarray(lyr["ln1_g"], np.float32)
        vecs[base + 3, :D] = np.asarray(lyr["ln1_b"], np.float32)
        vecs[base + 4, :DFF] = np.asarray(lyr["b1"], np.float32)
        vecs[base + 5, :D] = np.asarray(lyr["b2"], np.float32)
        vecs[base + 6, :D] = np.asarray(lyr["ln2_g"], np.float32)
        vecs[base + 7, :D] = np.asarray(lyr["ln2_b"], np.float32)

    # 4) final LayerNorm gamma folded into w_out (per token), beta folded into
    #    the output bias; output lanes padded to 128 for lane-dense stores.
    lnf_g = np.asarray(raw["lnf_g"], np.float32)                  # [S*D]
    lnf_b = np.asarray(raw["lnf_b"], np.float32)
    w_out_full = np.asarray(raw["w_out"], np.float32)             # [S*D, OUT]
    w_out = np.zeros((S, D, out_pad), np.float32)
    w_out[:, :, :OUT] = (lnf_g[:, None] * w_out_full).reshape(S, D, OUT)
    vecs[ROW_BOUT, :OUT] = np.asarray(raw["b_out"], np.float32) + lnf_b @ w_out_full

    # 5) block-diagonal head-sum [S*D, S*H] and head-expand [S*H, S*D] masks.
    bd_sum = np.zeros((S * D, S * H), np.float32)
    for u in range(S):
        for d in range(D):
            bd_sum[u * D + d, u * H + d // hd] = 1.0
    bd_exp = np.ascontiguousarray(bd_sum.T)

    cdt = compute_dtype
    return {
        "w_pre": jnp.asarray(w_pre, cdt),
        "vecs": jnp.asarray(vecs, jnp.float32),
        "w_qkv": jnp.asarray(w_qkv, cdt),
        "wo_stack": jnp.asarray(wo_stack, cdt),
        "w_ffn1": jnp.asarray(w_ffn1, cdt),
        "w_ffn2": jnp.asarray(w_ffn2, cdt),
        "w_out": jnp.asarray(w_out, cdt),
        "bd_sum": jnp.asarray(bd_sum, cdt),
        "bd_exp": jnp.asarray(bd_exp, cdt),
        "config": {"nhead": H, "head_dim": hd, "dff": DFF, "out": OUT,
                   "out_pad": out_pad, "n_layers": NL, "input_size": F_in},
    }


# --------------------------------------------------------------------------- #
#  Pallas kernel.                                                              #
# --------------------------------------------------------------------------- #
def _layer_norm(h, gamma, beta):
    mu = jnp.mean(h, axis=1, keepdims=True)
    c = h - mu
    var = jnp.mean(c * c, axis=1, keepdims=True)
    return c * jax.lax.rsqrt(var + LN_EPS) * gamma + beta


def _tran_kernel(x_ref, w_pre_ref, vecs_ref, w_qkv_ref, wo_ref, w1_ref, w2_ref,
                 w_out_ref, bd_sum_ref, bd_exp_ref, o_ref, *,
                 nhead, head_dim, n_layers, dff, out_pad):
    f32 = jnp.float32
    D = nhead * head_dim
    H = nhead
    S = NUM_TOKENS
    TB = x_ref.shape[0]
    cdt = w_qkv_ref.dtype
    exact_f32 = jnp.dtype(cdt) == jnp.dtype(jnp.float32)

    def mm(a, b):
        # MXU matmul: operands in the packed compute dtype, f32 accumulation.
        return jnp.dot(a.astype(cdt), b, preferred_element_type=f32)

    def vrow(row, width):
        return vecs_ref[row:row + 1, :width]              # [1, width] f32

    bd_sum = bd_sum_ref[...]
    bd_exp = bd_exp_ref[...]
    x = x_ref[...]

    # Pre-linear (split/flip/zero-pad folded into w_pre) + bias + positional
    # encoding; the 6 tokens are stacked along sublanes -> [6*TB, D] so every
    # later projection is a single large-M matmul.
    h = jnp.concatenate(
        [mm(x, w_pre_ref[t]) + vrow(ROW_PRE0 + t, D) for t in range(S)], axis=0)

    scale = 1.0 / math.sqrt(head_dim)
    for l in range(n_layers):
        base = ROW_LAYER0 + VEC_ROWS_PER_LAYER * l

        # Fused QKV projection: one [6TB, D] x [D, 3D] matmul.
        qkv = mm(h, w_qkv_ref[l]) + vrow(base + 0, 3 * D)
        q = qkv[:, 0:D]
        k = qkv[:, D:2 * D]
        v = qkv[:, 2 * D:3 * D]

        # Source-token-concatenated K / V: lane block u holds token u's rows,
        # replicated across all 6 query-token row blocks.
        k_row = jnp.concatenate([k[u * TB:(u + 1) * TB, :] for u in range(S)], axis=1)
        v_row = jnp.concatenate([v[u * TB:(u + 1) * TB, :] for u in range(S)], axis=1)
        k_cat = jnp.concatenate([k_row] * S, axis=0)       # [6TB, 6D]
        v_cat = jnp.concatenate([v_row] * S, axis=0)       # [6TB, 6D]

        # All 6x8 attention scores per row with ONE block-diagonal head-sum
        # matmul (lane index = u*H + h); the batch stays on sublanes throughout.
        q_rep = jnp.concatenate([q] * S, axis=1)           # [6TB, 6D]
        scores = mm(q_rep * k_cat, bd_sum) * scale         # [6TB, 6H]

        # Softmax over the source axis u (groups of H lanes).
        m = scores[:, 0:H]
        for u in range(1, S):
            m = jnp.maximum(m, scores[:, u * H:(u + 1) * H])
        e = jnp.exp(scores - jnp.concatenate([m] * S, axis=1))
        z = e[:, 0:H]
        for u in range(1, S):
            z = z + e[:, u * H:(u + 1) * H]
        inv_z = pl.reciprocal(z, approx=not exact_f32)
        p = e * jnp.concatenate([inv_z] * S, axis=1)       # [6TB, 6H]

        # Probability head-expansion, weighted-V and wo projection fused:
        # (p expanded to 64 lanes per source) * v_cat, then one K=6D matmul
        # against the 6x-stacked wo which also performs the sum over sources.
        ctx_cat = mm(p, bd_exp) * v_cat                    # [6TB, 6D]
        attn = mm(ctx_cat, wo_ref[l]) + vrow(base + 1, D)  # [6TB, D]

        h1 = _layer_norm(h + attn, vrow(base + 2, D), vrow(base + 3, D))
        ff = jnp.maximum(mm(h1, w1_ref[l]) + vrow(base + 4, dff), 0.0)
        ff = mm(ff, w2_ref[l]) + vrow(base + 5, D)
        h = _layer_norm(h1 + ff, vrow(base + 6, D), vrow(base + 7, D))

    # Output head: transpose -> avg_pool1d(k=1) (identity) -> token-major
    # flatten -> LayerNorm(6*D) -> Linear.  LN statistics are accumulated
    # across the 6 token row blocks (two-pass centered variance); gamma/beta
    # were folded into w_out / the output bias host-side.
    total = float(S * D)
    rsum = jnp.sum(h, axis=1, keepdims=True)               # [6TB, 1]
    ssum = rsum[0:TB]
    for t in range(1, S):
        ssum = ssum + rsum[t * TB:(t + 1) * TB]
    mean = ssum * (1.0 / total)                            # [TB, 1]
    c = h - jnp.concatenate([mean] * S, axis=0)
    rcsq = jnp.sum(c * c, axis=1, keepdims=True)
    ssq = rcsq[0:TB]
    for t in range(1, S):
        ssq = ssq + rcsq[t * TB:(t + 1) * TB]
    inv = jax.lax.rsqrt(ssq * (1.0 / total) + LN_EPS)      # [TB, 1]
    cn = c * jnp.concatenate([inv] * S, axis=0)            # [6TB, D]

    out = mm(cn[0:TB], w_out_ref[0])
    for t in range(1, S):
        out = out + mm(cn[t * TB:(t + 1) * TB], w_out_ref[t])
    o_ref[...] = (out + vrow(ROW_BOUT, out_pad)).astype(o_ref.dtype)


# --------------------------------------------------------------------------- #
#  Wrapper: batch-tiled pallas_call.                                           #
# --------------------------------------------------------------------------- #
def tran_model_forward(x, packed, *, block_b=256, vmem_limit_bytes=32 * 1024 * 1024):
    """Run the packed TranModel forward pass.

    Tuning (per perf review): v5e/v6e can raise block_b to 512-1024 and
    vmem_limit_bytes toward 64 MiB; v7x (64 MiB VMEM per core) should keep the
    defaults.  The batch tile is capped so the grid has >=2 steps whenever
    B > 8 so the "parallel" grid axis can use both v7x TensorCores.
    """
    cfg = packed["config"]
    B, F_in = x.shape
    assert F_in == cfg["input_size"], (F_in, cfg["input_size"])
    nhead, head_dim = cfg["nhead"], cfg["head_dim"]
    D = nhead * head_dim
    dff, out_size, out_pad, n_layers = cfg["dff"], cfg["out"], cfg["out_pad"], cfg["n_layers"]

    x = x.astype(jnp.float32)
    b8 = _round_up(max(B, 1), 8)
    half = _round_up((b8 + 1) // 2, 8)
    tb = max(8, min(block_b, half if b8 > 8 else 8))
    b_pad = _round_up(max(B, 1), tb)
    if b_pad != B:
        x = jnp.pad(x, ((0, b_pad - B), (0, 0)))
    grid = (b_pad // tb,)

    kernel = functools.partial(_tran_kernel, nhead=nhead, head_dim=head_dim,
                               n_layers=n_layers, dff=dff, out_pad=out_pad)

    S = NUM_TOKENS
    M = S * tb
    param_keys = ("w_pre", "vecs", "w_qkv", "wo_stack", "w_ffn1", "w_ffn2",
                  "w_out", "bd_sum", "bd_exp")
    param_bytes = sum(int(packed[k].size) * packed[k].dtype.itemsize for k in param_keys)
    flops_step = (
        M * 2 * F_in * D
        + n_layers * M * (2 * D * 3 * D + 2 * (S * D) * (S * nhead)
                          + 2 * (S * nhead) * (S * D) + 2 * (S * D) * D
                          + 4 * D * dff)
        + tb * S * 2 * D * out_pad)
    cost = pl.CostEstimate(
        flops=int(grid[0]) * int(flops_step),
        transcendentals=int(grid[0]) * int(M * S * nhead * max(n_layers, 1)),
        bytes_accessed=int(b_pad * (F_in + out_pad) * 4 + param_bytes),
    )

    const2 = lambda i: (0, 0)
    const3 = lambda i: (0, 0, 0)
    out = pl.pallas_call(
        kernel,
        out_shape=jax.ShapeDtypeStruct((b_pad, out_pad), jnp.float32),
        grid=grid,
        in_specs=[
            pl.BlockSpec((tb, F_in), lambda i: (i, 0)),          # batch-tiled input
            pl.BlockSpec(packed["w_pre"].shape, const3),          # resident weights
            pl.BlockSpec(packed["vecs"].shape, const2),
            pl.BlockSpec(packed["w_qkv"].shape, const3),
            pl.BlockSpec(packed["wo_stack"].shape, const3),
            pl.BlockSpec(packed["w_ffn1"].shape, const3),
            pl.BlockSpec(packed["w_ffn2"].shape, const3),
            pl.BlockSpec(packed["w_out"].shape, const3),
            pl.BlockSpec(packed["bd_sum"].shape, const2),
            pl.BlockSpec(packed["bd_exp"].shape, const2),
        ],
        out_specs=pl.BlockSpec((tb, out_pad), lambda i: (i, 0)),
        compiler_params=pltpu.CompilerParams(
            dimension_semantics=("parallel",),
            vmem_limit_bytes=vmem_limit_bytes),
        cost_estimate=cost,
    )(x, packed["w_pre"], packed["vecs"], packed["w_qkv"], packed["wo_stack"],
      packed["w_ffn1"], packed["w_ffn2"], packed["w_out"],
      packed["bd_sum"], packed["bd_exp"])
    return out[:B, :out_size]


# --------------------------------------------------------------------------- #
#  Pure-JAX reference of the same forward pass (mirrors the PyTorch code).     #
# --------------------------------------------------------------------------- #
def _ref_layernorm(h, g, b):
    m = jnp.mean(h, axis=-1, keepdims=True)
    v = jnp.mean((h - m) ** 2, axis=-1, keepdims=True)
    return (h - m) / jnp.sqrt(v + LN_EPS) * g + b


def reference_forward(x, raw):
    with jax.default_matmul_precision("highest"):
        n, gauge = raw["N"], raw["gauge"]
        nhead, hd, D = raw["nhead"], raw["head_dim"], raw["d_model"]
        B = x.shape[0]
        pad = jnp.zeros((B, 1), x.dtype)
        sizes = ([n + 1, n, n, n, n - 1, n - 1] if gauge else [n + 1, n, n, n, n, n])
        offs = np.cumsum([0] + sizes)
        xs = [x[:, int(offs[i]):int(offs[i + 1])] for i in range(6)]
        x0 = xs[0]
        x1 = jnp.concatenate([pad, xs[1]], axis=1)
        x2 = jnp.concatenate([pad, xs[2][:, ::-1]], axis=1)
        x3 = jnp.concatenate([pad, xs[3]], axis=1)
        if gauge:
            x4 = jnp.concatenate([pad, pad, xs[4][:, ::-1]], axis=1)
            x5 = jnp.concatenate([pad, pad, xs[5]], axis=1)
        else:
            x4 = jnp.concatenate([pad, xs[4][:, ::-1]], axis=1)
            x5 = jnp.concatenate([pad, xs[5]], axis=1)
        tok = jnp.stack([x0, x1, x2, x3, x4, x5], axis=0)              # [6, B, N+1]
        h = tok @ raw["w_pre"] + raw["b_pre"] + raw["pe"][:, None, :]  # [6, B, D]
        for lyr in raw["layers"]:
            q = (h @ lyr["wq"] + lyr["bq"]).reshape(6, B, nhead, hd)
            k = (h @ lyr["wk"] + lyr["bk"]).reshape(6, B, nhead, hd)
            v = (h @ lyr["wv"] + lyr["bv"]).reshape(6, B, nhead, hd)
            scores = jnp.einsum("tbhd,sbhd->bhts", q, k) / math.sqrt(hd)
            attn = jax.nn.softmax(scores, axis=-1)
            ctx = jnp.einsum("bhts,sbhd->tbhd", attn, v).reshape(6, B, D)
            h = _ref_layernorm(h + ctx @ lyr["wo"] + lyr["bo"], lyr["ln1_g"], lyr["ln1_b"])
            ff = jnp.maximum(h @ lyr["w1"] + lyr["b1"], 0.0) @ lyr["w2"] + lyr["b2"]
            h = _ref_layernorm(h + ff, lyr["ln2_g"], lyr["ln2_b"])
        y = jnp.transpose(h, (1, 0, 2)).reshape(B, 6 * D)  # avg_pool1d(k=1) = identity
        y = _ref_layernorm(y, raw["lnf_g"], raw["lnf_b"])
        return y @ raw["w_out"] + raw["b_out"]
        # TODO(synk): general k/s avg_pool1d (non-default) is not implemented.


if __name__ == "__main__":
    key = jax.random.PRNGKey(0)
    configs = [
        dict(input_size=13, batch=16),   # 6N+1 -> gauge=False branch
        dict(input_size=11, batch=24),   # 6N-1 -> gauge=True branch
    ]
    for i, cfg in enumerate(configs):
        kx, kp = jax.random.split(jax.random.fold_in(key, i))
        x = jax.random.normal(kx, (cfg["batch"], cfg["input_size"]), dtype=jnp.float32)
        raw = init_raw_params(kp, cfg["input_size"], output_size=1, nhead=8,
                              embedding_size=8, hidden_size=256, block_numbers=1)
        ref = np.asarray(reference_forward(x, raw))

        # 1) Exact-structure validation: f32 matmul operands, tight tolerance.
        packed_f32 = pack_params(raw, compute_dtype=jnp.float32)
        out_f32 = jax.block_until_ready(tran_model_forward(x, packed_f32, block_b=64))
        assert out_f32.shape == (cfg["batch"], 1), out_f32.shape
        np.testing.assert_allclose(np.asarray(out_f32), ref, rtol=2e-3, atol=2e-3)

        # 2) Performance configuration: bf16 MXU operands with f32 accumulation
        #    (expected mixed-precision deviation ~1e-2; loose sanity band).
        packed_bf16 = pack_params(raw)                       # default bf16
        out_bf16 = jax.block_until_ready(tran_model_forward(x, packed_bf16, block_b=64))
        assert out_bf16.shape == (cfg["batch"], 1), out_bf16.shape
        assert np.all(np.isfinite(np.asarray(out_bf16)))
        np.testing.assert_allclose(np.asarray(out_bf16), np.asarray(out_f32),
                                   rtol=1e-1, atol=1e-1)
    print("KERNEL_OK")
</pallas_src>

<mosaic_0001>
module attributes {stable_mosaic.version = 11 : i64} {
  func.func @_tran_kernel(%arg0: i32, %arg1: memref<8x13xf32, #tpu.memory_space<vmem>>, %arg2: memref<6x13x64xf32, #tpu.memory_space<vmem>>, %arg3: memref<16x256xf32, #tpu.memory_space<vmem>>, %arg4: memref<1x64x192xf32, #tpu.memory_space<vmem>>, %arg5: memref<1x384x64xf32, #tpu.memory_space<vmem>>, %arg6: memref<1x64x256xf32, #tpu.memory_space<vmem>>, %arg7: memref<1x256x64xf32, #tpu.memory_space<vmem>>, %arg8: memref<6x64x128xf32, #tpu.memory_space<vmem>>, %arg9: memref<384x48xf32, #tpu.memory_space<vmem>>, %arg10: memref<48x384xf32, #tpu.memory_space<vmem>>, %arg11: memref<8x128xf32, #tpu.memory_space<vmem>>) attributes {dimension_semantics = [#tpu.dimension_semantics<parallel>], iteration_bounds = array<i64: 2>, scalar_prefetch = 0 : i64, scratch_operands = 0 : i64, tpu.core_type = #tpu.core_type<tc>, window_params = [{transform_indices = @transform_0, window_bounds = array<i64: 8, 13>}, {pipeline_mode = #tpu.pipeline_mode<synchronous>, transform_indices = @transform_1, window_bounds = array<i64: 6, 13, 64>}, {pipeline_mode = #tpu.pipeline_mode<synchronous>, transform_indices = @transform_2, window_bounds = array<i64: 16, 256>}, {pipeline_mode = #tpu.pipeline_mode<synchronous>, transform_indices = @transform_3, window_bounds = array<i64: 1, 64, 192>}, {pipeline_mode = #tpu.pipeline_mode<synchronous>, transform_indices = @transform_4, window_bounds = array<i64: 1, 384, 64>}, {pipeline_mode = #tpu.pipeline_mode<synchronous>, transform_indices = @transform_5, window_bounds = array<i64: 1, 64, 256>}, {pipeline_mode = #tpu.pipeline_mode<synchronous>, transform_indices = @transform_6, window_bounds = array<i64: 1, 256, 64>}, {pipeline_mode = #tpu.pipeline_mode<synchronous>, transform_indices = @transform_7, window_bounds = array<i64: 6, 64, 128>}, {pipeline_mode = #tpu.pipeline_mode<synchronous>, transform_indices = @transform_8, window_bounds = array<i64: 384, 48>}, {pipeline_mode = #tpu.pipeline_mode<synchronous>, transform_indices = @transform_9, window_bounds = array<i64: 48, 384>}, {transform_indices = @transform_10, window_bounds = array<i64: 8, 128>}]} {
    %c0 = arith.constant 0 : index
    %c0_0 = arith.constant 0 : index
    %0 = vector.load %arg9[%c0, %c0_0] : memref<384x48xf32, #tpu.memory_space<vmem>>, vector<384x48xf32>
    %c0_1 = arith.constant 0 : index
    %c0_2 = arith.constant 0 : index
    %1 = vector.load %arg10[%c0_1, %c0_2] : memref<48x384xf32, #tpu.memory_space<vmem>>, vector<48x384xf32>
    %c0_3 = arith.constant 0 : index
    %c0_4 = arith.constant 0 : index
    %2 = vector.load %arg1[%c0_3, %c0_4] : memref<8x13xf32, #tpu.memory_space<vmem>>, vector<8x13xf32>
    %c0_5 = arith.constant 0 : index
    %c0_6 = arith.constant 0 : index
    %c0_7 = arith.constant 0 : index
    %3 = vector.load %arg2[%c0_5, %c0_6, %c0_7] : memref<6x13x64xf32, #tpu.memory_space<vmem>>, vector<1x13x64xf32>
    %4 = vector.shape_cast %3 : vector<1x13x64xf32> to vector<13x64xf32>
    %cst = arith.constant dense<0.000000e+00> : vector<8x64xf32>
    %5 = tpu.matmul %2, %4, %cst {dimension_numbers = #tpu.dot_dimension_numbers<[1], [0], [0], [1], [0, 0, 1, 1], [], []>} : vector<8x13xf32>, vector<13x64xf32>, vector<8x64xf32> -> vector<8x64xf32>
    %c0_8 = arith.constant 0 : index
    %c0_9 = arith.constant 0 : index
    %6 = vector.load %arg3[%c0_8, %c0_9] : memref<16x256xf32, #tpu.memory_space<vmem>>, vector<1x64xf32>
    %7 = vector.broadcast %6 : vector<1x64xf32> to vector<8x64xf32>
    %8 = arith.addf %5, %7 : vector<8x64xf32>
    %c1 = arith.constant 1 : index
    %c0_10 = arith.constant 0 : index
    %c0_11 = arith.constant 0 : index
    %9 = vector.load %arg2[%c1, %c0_10, %c0_11] : memref<6x13x64xf32, #tpu.memory_space<vmem>>, vector<1x13x64xf32>
    %10 = vector.shape_cast %9 : vector<1x13x64xf32> to vector<13x64xf32>
    %cst_12 = arith.constant dense<0.000000e+00> : vector<8x64xf32>
    %11 = tpu.matmul %2, %10, %cst_12 {dimension_numbers = #tpu.dot_dimension_numbers<[1], [0], [0], [1], [0, 0, 1, 1], [], []>} : vector<8x13xf32>, vector<13x64xf32>, vector<8x64xf32> -> vector<8x64xf32>
    %c1_13 = arith.constant 1 : index
    %c0_14 = arith.constant 0 : index
    %12 = vector.load %arg3[%c1_13, %c0_14] : memref<16x256xf32, #tpu.memory_space<vmem>>, vector<1x64xf32>
    %13 = vector.broadcast %12 : vector<1x64xf32> to vector<8x64xf32>
    %14 = arith.addf %11, %13 : vector<8x64xf32>
    %c2 = arith.constant 2 : index
    %c0_15 = arith.constant 0 : index
    %c0_16 = arith.constant 0 : index
    %15 = vector.load %arg2[%c2, %c0_15, %c0_16] : memref<6x13x64xf32, #tpu.memory_space<vmem>>, vector<1x13x64xf32>
    %16 = vector.shape_cast %15 : vector<1x13x64xf32> to vector<13x64xf32>
    %cst_17 = arith.constant dense<0.000000e+00> : vector<8x64xf32>
    %17 = tpu.matmul %2, %16, %cst_17 {dimension_numbers = #tpu.dot_dimension_numbers<[1], [0], [0], [1], [0, 0, 1, 1], [], []>} : vector<8x13xf32>, vector<13x64xf32>, vector<8x64xf32> -> vector<8x64xf32>
    %c2_18 = arith.constant 2 : index
    %c0_19 = arith.constant 0 : index
    %18 = vector.load %arg3[%c2_18, %c0_19] : memref<16x256xf32, #tpu.memory_space<vmem>>, vector<1x64xf32>
    %19 = vector.broadcast %18 : vector<1x64xf32> to vector<8x64xf32>
    %20 = arith.addf %17, %19 : vector<8x64xf32>
    %c3 = arith.constant 3 : index
    %c0_20 = arith.constant 0 : index
    %c0_21 = arith.constant 0 : index
    %21 = vector.load %arg2[%c3, %c0_20, %c0_21] : memref<6x13x64xf32, #tpu.memory_space<vmem>>, vector<1x13x64xf32>
    %22 = vector.shape_cast %21 : vector<1x13x64xf32> to vector<13x64xf32>
    %cst_22 = arith.constant dense<0.000000e+00> : vector<8x64xf32>
    %23 = tpu.matmul %2, %22, %cst_22 {dimension_numbers = #tpu.dot_dimension_numbers<[1], [0], [0], [1], [0, 0, 1, 1], [], []>} : vector<8x13xf32>, vector<13x64xf32>, vector<8x64xf32> -> vector<8x64xf32>
    %c3_23 = arith.constant 3 : index
    %c0_24 = arith.constant 0 : index
    %24 = vector.load %arg3[%c3_23, %c0_24] : memref<16x256xf32, #tpu.memory_space<vmem>>, vector<1x64xf32>
    %25 = vector.broadcast %24 : vector<1x64xf32> to vector<8x64xf32>
    %26 = arith.addf %23, %25 : vector<8x64xf32>
    %c4 = arith.constant 4 : index
    %c0_25 = arith.constant 0 : index
    %c0_26 = arith.constant 0 : index
    %27 = vector.load %arg2[%c4, %c0_25, %c0_26] : memref<6x13x64xf32, #tpu.memory_space<vmem>>, vector<1x13x64xf32>
    %28 = vector.shape_cast %27 : vector<1x13x64xf32> to vector<13x64xf32>
    %cst_27 = arith.constant dense<0.000000e+00> : vector<8x64xf32>
    %29 = tpu.matmul %2, %28, %cst_27 {dimension_numbers = #tpu.dot_dimension_numbers<[1], [0], [0], [1], [0, 0, 1, 1], [], []>} : vector<8x13xf32>, vector<13x64xf32>, vector<8x64xf32> -> vector<8x64xf32>
    %c4_28 = arith.constant 4 : index
    %c0_29 = arith.constant 0 : index
    %30 = vector.load %arg3[%c4_28, %c0_29] : memref<16x256xf32, #tpu.memory_space<vmem>>, vector<1x64xf32>
    %31 = vector.broadcast %30 : vector<1x64xf32> to vector<8x64xf32>
    %32 = arith.addf %29, %31 : vector<8x64xf32>
    %c5 = arith.constant 5 : index
    %c0_30 = arith.constant 0 : index
    %c0_31 = arith.constant 0 : index
    %33 = vector.load %arg2[%c5, %c0_30, %c0_31] : memref<6x13x64xf32, #tpu.memory_space<vmem>>, vector<1x13x64xf32>
    %34 = vector.shape_cast %33 : vector<1x13x64xf32> to vector<13x64xf32>
    %cst_32 = arith.constant dense<0.000000e+00> : vector<8x64xf32>
    %35 = tpu.matmul %2, %34, %cst_32 {dimension_numbers = #tpu.dot_dimension_numbers<[1], [0], [0], [1], [0, 0, 1, 1], [], []>} : vector<8x13xf32>, vector<13x64xf32>, vector<8x64xf32> -> vector<8x64xf32>
    %c5_33 = arith.constant 5 : index
    %c0_34 = arith.constant 0 : index
    %36 = vector.load %arg3[%c5_33, %c0_34] : memref<16x256xf32, #tpu.memory_space<vmem>>, vector<1x64xf32>
    %37 = vector.broadcast %36 : vector<1x64xf32> to vector<8x64xf32>
    %38 = arith.addf %35, %37 : vector<8x64xf32>
    %39 = tpu.concatenate %8, %14, %20, %26, %32, %38 in 0 : vector<8x64xf32>, vector<8x64xf32>, vector<8x64xf32>, vector<8x64xf32>, vector<8x64xf32>, vector<8x64xf32> -> vector<48x64xf32>
    %c0_35 = arith.constant 0 : index
    %c0_36 = arith.constant 0 : index
    %c0_37 = arith.constant 0 : index
    %40 = vector.load %arg4[%c0_35, %c0_36, %c0_37] : memref<1x64x192xf32, #tpu.memory_space<vmem>>, vector<1x64x192xf32>
    %41 = vector.shape_cast %40 : vector<1x64x192xf32> to vector<64x192xf32>
    %cst_38 = arith.constant dense<0.000000e+00> : vector<48x192xf32>
    %42 = tpu.matmul %39, %41, %cst_38 {dimension_numbers = #tpu.dot_dimension_numbers<[1], [0], [0], [1], [0, 0, 1, 1], [], []>} : vector<48x64xf32>, vector<64x192xf32>, vector<48x192xf32> -> vector<48x192xf32>
    %c7 = arith.constant 7 : index
    %c0_39 = arith.constant 0 : index
    %43 = vector.load %arg3[%c7, %c0_39] : memref<16x256xf32, #tpu.memory_space<vmem>>, vector<1x192xf32>
    %44 = vector.broadcast %43 : vector<1x192xf32> to vector<48x192xf32>
    %45 = arith.addf %42, %44 : vector<48x192xf32>
    %46 = vector.extract_strided_slice %45 {offsets = [0, 0], sizes = [48, 64], strides = [1, 1]} : vector<48x192xf32> to vector<48x64xf32>
    %47 = vector.extract_strided_slice %45 {offsets = [0, 64], sizes = [48, 64], strides = [1, 1]} : vector<48x192xf32> to vector<48x64xf32>
    %48 = vector.extract_strided_slice %45 {offsets = [0, 128], sizes = [48, 64], strides = [1, 1]} : vector<48x192xf32> to vector<48x64xf32>
    %49 = vector.extract_strided_slice %47 {offsets = [0, 0], sizes = [8, 64], strides = [1, 1]} : vector<48x64xf32> to vector<8x64xf32>
    %50 = vector.extract_strided_slice %47 {offsets = [8, 0], sizes = [8, 64], strides = [1, 1]} : vector<48x64xf32> to vector<8x64xf32>
    %51 = vector.extract_strided_slice %47 {offsets = [16, 0], sizes = [8, 64], strides = [1, 1]} : vector<48x64xf32> to vector<8x64xf32>
    %52 = vector.extract_strided_slice %47 {offsets = [24, 0], sizes = [8, 64], strides = [1, 1]} : vector<48x64xf32> to vector<8x64xf32>
    %53 = vector.extract_strided_slice %47 {offsets = [32, 0], sizes = [8, 64], strides = [1, 1]} : vector<48x64xf32> to vector<8x64xf32>
    %54 = vector.extract_strided_slice %47 {offsets = [40, 0], sizes = [8, 64], strides = [1, 1]} : vector<48x64xf32> to vector<8x64xf32>
    %55 = tpu.concatenate %49, %50, %51, %52, %53, %54 in 1 : vector<8x64xf32>, vector<8x64xf32>, vector<8x64xf32>, vector<8x64xf32>, vector<8x64xf32>, vector<8x64xf32> -> vector<8x384xf32>
    %56 = vector.extract_strided_slice %48 {offsets = [0, 0], sizes = [8, 64], strides = [1, 1]} : vector<48x64xf32> to vector<8x64xf32>
    %57 = vector.extract_strided_slice %48 {offsets = [8, 0], sizes = [8, 64], strides = [1, 1]} : vector<48x64xf32> to vector<8x64xf32>
    %58 = vector.extract_strided_slice %48 {offsets = [16, 0], sizes = [8, 64], strides = [1, 1]} : vector<48x64xf32> to vector<8x64xf32>
    %59 = vector.extract_strided_slice %48 {offsets = [24, 0], sizes = [8, 64], strides = [1, 1]} : vector<48x64xf32> to vector<8x64xf32>
    %60 = vector.extract_strided_slice %48 {offsets = [32, 0], sizes = [8, 64], strides = [1, 1]} : vector<48x64xf32> to vector<8x64xf32>
    %61 = vector.extract_strided_slice %48 {offsets = [40, 0], sizes = [8, 64], strides = [1, 1]} : vector<48x64xf32> to vector<8x64xf32>
    %62 = tpu.concatenate %56, %57, %58, %59, %60, %61 in 1 : vector<8x64xf32>, vector<8x64xf32>, vector<8x64xf32>, vector<8x64xf32>, vector<8x64xf32>, vector<8x64xf32> -> vector<8x384xf32>
    %63 = tpu.concatenate %55, %55, %55, %55, %55, %55 in 0 : vector<8x384xf32>, vector<8x384xf32>, vector<8x384xf32>, vector<8x384xf32>, vector<8x384xf32>, vector<8x384xf32> -> vector<48x384xf32>
    %64 = tpu.concatenate %62, %62, %62, %62, %62, %62 in 0 : vector<8x384xf32>, vector<8x384xf32>, vector<8x384xf32>, vector<8x384xf32>, vector<8x384xf32>, vector<8x384xf32> -> vector<48x384xf32>
    %65 = tpu.concatenate %46, %46, %46, %46, %46, %46 in 1 : vector<48x64xf32>, vector<48x64xf32>, vector<48x64xf32>, vector<48x64xf32>, vector<48x64xf32>, vector<48x64xf32> -> vector<48x384xf32>
    %66 = arith.mulf %65, %63 : vector<48x384xf32>
    %cst_40 = arith.constant dense<0.000000e+00> : vector<48x48xf32>
    %67 = tpu.matmul %66, %0, %cst_40 {dimension_numbers = #tpu.dot_dimension_numbers<[1], [0], [0], [1], [0, 0, 1, 1], [], []>} : vector<48x384xf32>, vector<384x48xf32>, vector<48x48xf32> -> vector<48x48xf32>
    %cst_41 = arith.constant 0.353553385 : f32
    %68 = vector.broadcast %cst_41 : f32 to vector<48x48xf32>
    %69 = arith.mulf %67, %68 : vector<48x48xf32>
    %70 = vector.extract_strided_slice %69 {offsets = [0, 0], sizes = [48, 8], strides = [1, 1]} : vector<48x48xf32> to vector<48x8xf32>
    %71 = vector.extract_strided_slice %69 {offsets = [0, 8], sizes = [48, 8], strides = [1, 1]} : vector<48x48xf32> to vector<48x8xf32>
    %72 = arith.maximumf %70, %71 : vector<48x8xf32>
    %73 = vector.extract_strided_slice %69 {offsets = [0, 16], sizes = [48, 8], strides = [1, 1]} : vector<48x48xf32> to vector<48x8xf32>
    %74 = arith.maximumf %72, %73 : vector<48x8xf32>
    %75 = vector.extract_strided_slice %69 {offsets = [0, 24], sizes = [48, 8], strides = [1, 1]} : vector<48x48xf32> to vector<48x8xf32>
    %76 = arith.maximumf %74, %75 : vector<48x8xf32>
    %77 = vector.extract_strided_slice %69 {offsets = [0, 32], sizes = [48, 8], strides = [1, 1]} : vector<48x48xf32> to vector<48x8xf32>
    %78 = arith.maximumf %76, %77 : vector<48x8xf32>
    %79 = vector.extract_strided_slice %69 {offsets = [0, 40], sizes = [48, 8], strides = [1, 1]} : vector<48x48xf32> to vector<48x8xf32>
    %80 = arith.maximumf %78, %79 : vector<48x8xf32>
    %81 = tpu.concatenate %80, %80, %80, %80, %80, %80 in 1 : vector<48x8xf32>, vector<48x8xf32>, vector<48x8xf32>, vector<48x8xf32>, vector<48x8xf32>, vector<48x8xf32> -> vector<48x48xf32>
    %82 = arith.subf %69, %81 : vector<48x48xf32>
    %83 = math.exp %82 : vector<48x48xf32>
    %84 = vector.extract_strided_slice %83 {offsets = [0, 0], sizes = [48, 8], strides = [1, 1]} : vector<48x48xf32> to vector<48x8xf32>
    %85 = vector.extract_strided_slice %83 {offsets = [0, 8], sizes = [48, 8], strides = [1, 1]} : vector<48x48xf32> to vector<48x8xf32>
    %86 = arith.addf %84, %85 : vector<48x8xf32>
    %87 = vector.extract_strided_slice %83 {offsets = [0, 16], sizes = [48, 8], strides = [1, 1]} : vector<48x48xf32> to vector<48x8xf32>
    %88 = arith.addf %86, %87 : vector<48x8xf32>
    %89 = vector.extract_strided_slice %83 {offsets = [0, 24], sizes = [48, 8], strides = [1, 1]} : vector<48x48xf32> to vector<48x8xf32>
    %90 = arith.addf %88, %89 : vector<48x8xf32>
    %91 = vector.extract_strided_slice %83 {offsets = [0, 32], sizes = [48, 8], strides = [1, 1]} : vector<48x48xf32> to vector<48x8xf32>
    %92 = arith.addf %90, %91 : vector<48x8xf32>
    %93 = vector.extract_strided_slice %83 {offsets = [0, 40], sizes = [48, 8], strides = [1, 1]} : vector<48x48xf32> to vector<48x8xf32>
    %94 = arith.addf %92, %93 : vector<48x8xf32>
    %95 = tpu.reciprocal %94 : vector<48x8xf32> -> vector<48x8xf32>
    %96 = tpu.concatenate %95, %95, %95, %95, %95, %95 in 1 : vector<48x8xf32>, vector<48x8xf32>, vector<48x8xf32>, vector<48x8xf32>, vector<48x8xf32>, vector<48x8xf32> -> vector<48x48xf32>
    %97 = arith.mulf %83, %96 : vector<48x48xf32>
    %cst_42 = arith.constant dense<0.000000e+00> : vector<48x384xf32>
    %98 = tpu.matmul %97, %1, %cst_42 {dimension_numbers = #tpu.dot_dimension_numbers<[1], [0], [0], [1], [0, 0, 1, 1], [], []>} : vector<48x48xf32>, vector<48x384xf32>, vector<48x384xf32> -> vector<48x384xf32>
    %99 = arith.mulf %98, %64 : vector<48x384xf32>
    %c0_43 = arith.constant 0 : index
    %c0_44 = arith.constant 0 : index
    %c0_45 = arith.constant 0 : index
    %100 = vector.load %arg5[%c0_43, %c0_44, %c0_45] : memref<1x384x64xf32, #tpu.memory_space<vmem>>, vector<1x384x64xf32>
    %101 = vector.shape_cast %100 : vector<1x384x64xf32> to vector<384x64xf32>
    %cst_46 = arith.constant dense<0.000000e+00> : vector<48x64xf32>
    %102 = tpu.matmul %99, %101, %cst_46 {dimension_numbers = #tpu.dot_dimension_numbers<[1], [0], [0], [1], [0, 0, 1, 1], [], []>} : vector<48x384xf32>, vector<384x64xf32>, vector<48x64xf32> -> vector<48x64xf32>
    %c8 = arith.constant 8 : index
    %c0_47 = arith.constant 0 : index
    %103 = vector.load %arg3[%c8, %c0_47] : memref<16x256xf32, #tpu.memory_space<vmem>>, vector<1x64xf32>
    %104 = vector.broadcast %103 : vector<1x64xf32> to vector<48x64xf32>
    %105 = arith.addf %102, %104 : vector<48x64xf32>
    %106 = arith.addf %39, %105 : vector<48x64xf32>
    %c9 = arith.constant 9 : index
    %c0_48 = arith.constant 0 : index
    %107 = vector.load %arg3[%c9, %c0_48] : memref<16x256xf32, #tpu.memory_space<vmem>>, vector<1x64xf32>
    %c10 = arith.constant 10 : index
    %c0_49 = arith.constant 0 : index
    %108 = vector.load %arg3[%c10, %c0_49] : memref<16x256xf32, #tpu.memory_space<vmem>>, vector<1x64xf32>
    %cst_50 = arith.constant dense<0.000000e+00> : vector<48xf32>
    %109 = vector.multi_reduction <add>, %106, %cst_50 [1] : vector<48x64xf32> to vector<48xf32>
    %110 = vector.shape_cast %109 : vector<48xf32> to vector<48x1xf32>
    %cst_51 = arith.constant 6.400000e+01 : f32
    %111 = vector.broadcast %cst_51 : f32 to vector<48x1xf32>
    %112 = arith.divf %110, %111 : vector<48x1xf32>
    %113 = vector.broadcast %112 : vector<48x1xf32> to vector<48x64xf32>
    %114 = arith.subf %106, %113 : vector<48x64xf32>
    %115 = arith.mulf %114, %114 : vector<48x64xf32>
    %cst_52 = arith.constant dense<0.000000e+00> : vector<48xf32>
    %116 = vector.multi_reduction <add>, %115, %cst_52 [1] : vector<48x64xf32> to vector<48xf32>
    %117 = vector.shape_cast %116 : vector<48xf32> to vector<48x1xf32>
    %cst_53 = arith.constant 6.400000e+01 : f32
    %118 = vector.broadcast %cst_53 : f32 to vector<48x1xf32>
    %119 = arith.divf %117, %118 : vector<48x1xf32>
    %cst_54 = arith.constant 9.99999974E-6 : f32
    %120 = vector.broadcast %cst_54 : f32 to vector<48x1xf32>
    %121 = arith.addf %119, %120 : vector<48x1xf32>
    %122 = math.rsqrt %121 : vector<48x1xf32>
    %123 = vector.broadcast %122 : vector<48x1xf32> to vector<48x64xf32>
    %124 = arith.mulf %114, %123 : vector<48x64xf32>
    %125 = vector.broadcast %107 : vector<1x64xf32> to vector<48x64xf32>
    %126 = arith.mulf %124, %125 : vector<48x64xf32>
    %127 = vector.broadcast %108 : vector<1x64xf32> to vector<48x64xf32>
    %128 = arith.addf %126, %127 : vector<48x64xf32>
    %c0_55 = arith.constant 0 : index
    %c0_56 = arith.constant 0 : index
    %c0_57 = arith.constant 0 : index
    %129 = vector.load %arg6[%c0_55, %c0_56, %c0_57] : memref<1x64x256xf32, #tpu.memory_space<vmem>>, vector<1x64x256xf32>
    %130 = vector.shape_cast %129 : vector<1x64x256xf32> to vector<64x256xf32>
    %cst_58 = arith.constant dense<0.000000e+00> : vector<48x256xf32>
    %131 = tpu.matmul %128, %130, %cst_58 {dimension_numbers = #tpu.dot_dimension_numbers<[1], [0], [0], [1], [0, 0, 1, 1], [], []>} : vector<48x64xf32>, vector<64x256xf32>, vector<48x256xf32> -> vector<48x256xf32>
    %c11 = arith.constant 11 : index
    %c0_59 = arith.constant 0 : index
    %132 = vector.load %arg3[%c11, %c0_59] : memref<16x256xf32, #tpu.memory_space<vmem>>, vector<1x256xf32>
    %133 = vector.broadcast %132 : vector<1x256xf32> to vector<48x256xf32>
    %134 = arith.addf %131, %133 : vector<48x256xf32>
    %cst_60 = arith.constant 0.000000e+00 : f32
    %135 = vector.broadcast %cst_60 : f32 to vector<48x256xf32>
    %136 = arith.maximumf %134, %135 : vector<48x256xf32>
    %c0_61 = arith.constant 0 : index
    %c0_62 = arith.constant 0 : index
    %c0_63 = arith.constant 0 : index
    %137 = vector.load %arg7[%c0_61, %c0_62, %c0_63] : memref<1x256x64xf32, #tpu.memory_space<vmem>>, vector<1x256x64xf32>
    %138 = vector.shape_cast %137 : vector<1x256x64xf32> to vector<256x64xf32>
    %cst_64 = arith.constant dense<0.000000e+00> : vector<48x64xf32>
    %139 = tpu.matmul %136, %138, %cst_64 {dimension_numbers = #tpu.dot_dimension_numbers<[1], [0], [0], [1], [0, 0, 1, 1], [], []>} : vector<48x256xf32>, vector<256x64xf32>, vector<48x64xf32> -> vector<48x64xf32>
    %c12 = arith.constant 12 : index
    %c0_65 = arith.constant 0 : index
    %140 = vector.load %arg3[%c12, %c0_65] : memref<16x256xf32, #tpu.memory_space<vmem>>, vector<1x64xf32>
    %141 = vector.broadcast %140 : vector<1x64xf32> to vector<48x64xf32>
    %142 = arith.addf %139, %141 : vector<48x64xf32>
    %143 = arith.addf %128, %142 : vector<48x64xf32>
    %c13 = arith.constant 13 : index
    %c0_66 = arith.constant 0 : index
    %144 = vector.load %arg3[%c13, %c0_66] : memref<16x256xf32, #tpu.memory_space<vmem>>, vector<1x64xf32>
    %c14 = arith.constant 14 : index
    %c0_67 = arith.constant 0 : index
    %145 = vector.load %arg3[%c14, %c0_67] : memref<16x256xf32, #tpu.memory_space<vmem>>, vector<1x64xf32>
    %cst_68 = arith.constant dense<0.000000e+00> : vector<48xf32>
    %146 = vector.multi_reduction <add>, %143, %cst_68 [1] : vector<48x64xf32> to vector<48xf32>
    %147 = vector.shape_cast %146 : vector<48xf32> to vector<48x1xf32>
    %cst_69 = arith.constant 6.400000e+01 : f32
    %148 = vector.broadcast %cst_69 : f32 to vector<48x1xf32>
    %149 = arith.divf %147, %148 : vector<48x1xf32>
    %150 = vector.broadcast %149 : vector<48x1xf32> to vector<48x64xf32>
    %151 = arith.subf %143, %150 : vector<48x64xf32>
    %152 = arith.mulf %151, %151 : vector<48x64xf32>
    %cst_70 = arith.constant dense<0.000000e+00> : vector<48xf32>
    %153 = vector.multi_reduction <add>, %152, %cst_70 [1] : vector<48x64xf32> to vector<48xf32>
    %154 = vector.shape_cast %153 : vector<48xf32> to vector<48x1xf32>
    %cst_71 = arith.constant 6.400000e+01 : f32
    %155 = vector.broadcast %cst_71 : f32 to vector<48x1xf32>
    %156 = arith.divf %154, %155 : vector<48x1xf32>
    %cst_72 = arith.constant 9.99999974E-6 : f32
    %157 = vector.broadcast %cst_72 : f32 to vector<48x1xf32>
    %158 = arith.addf %156, %157 : vector<48x1xf32>
    %159 = math.rsqrt %158 : vector<48x1xf32>
    %160 = vector.broadcast %159 : vector<48x1xf32> to vector<48x64xf32>
    %161 = arith.mulf %151, %160 : vector<48x64xf32>
    %162 = vector.broadcast %144 : vector<1x64xf32> to vector<48x64xf32>
    %163 = arith.mulf %161, %162 : vector<48x64xf32>
    %164 = vector.broadcast %145 : vector<1x64xf32> to vector<48x64xf32>
    %165 = arith.addf %163, %164 : vector<48x64xf32>
    %cst_73 = arith.constant dense<0.000000e+00> : vector<48xf32>
    %166 = vector.multi_reduction <add>, %165, %cst_73 [1] : vector<48x64xf32> to vector<48xf32>
    %167 = vector.shape_cast %166 : vector<48xf32> to vector<48x1xf32>
    %168 = vector.extract_strided_slice %167 {offsets = [0, 0], sizes = [8, 1], strides = [1, 1]} : vector<48x1xf32> to vector<8x1xf32>
    %169 = vector.extract_strided_slice %167 {offsets = [8, 0], sizes = [8, 1], strides = [1, 1]} : vector<48x1xf32> to vector<8x1xf32>
    %170 = arith.addf %168, %169 : vector<8x1xf32>
    %171 = vector.extract_strided_slice %167 {offsets = [16, 0], sizes = [8, 1], strides = [1, 1]} : vector<48x1xf32> to vector<8x1xf32>
    %172 = arith.addf %170, %171 : vector<8x1xf32>
    %173 = vector.extract_strided_slice %167 {offsets = [24, 0], sizes = [8, 1], strides = [1, 1]} : vector<48x1xf32> to vector<8x1xf32>
    %174 = arith.addf %172, %173 : vector<8x1xf32>
    %175 = vector.extract_strided_slice %167 {offsets = [32, 0], sizes = [8, 1], strides = [1, 1]} : vector<48x1xf32> to vector<8x1xf32>
    %176 = arith.addf %174, %175 : vector<8x1xf32>
    %177 = vector.extract_strided_slice %167 {offsets = [40, 0], sizes = [8, 1], strides = [1, 1]} : vector<48x1xf32> to vector<8x1xf32>
    %178 = arith.addf %176, %177 : vector<8x1xf32>
    %cst_74 = arith.constant 0.00260416674 : f32
    %179 = vector.broadcast %cst_74 : f32 to vector<8x1xf32>
    %180 = arith.mulf %178, %179 : vector<8x1xf32>
    %181 = tpu.concatenate %180, %180, %180, %180, %180, %180 in 0 : vector<8x1xf32>, vector<8x1xf32>, vector<8x1xf32>, vector<8x1xf32>, vector<8x1xf32>, vector<8x1xf32> -> vector<48x1xf32>
    %182 = vector.broadcast %181 : vector<48x1xf32> to vector<48x64xf32>
    %183 = arith.subf %165, %182 : vector<48x64xf32>
    %184 = arith.mulf %183, %183 : vector<48x64xf32>
    %cst_75 = arith.constant dense<0.000000e+00> : vector<48xf32>
    %185 = vector.multi_reduction <add>, %184, %cst_75 [1] : vector<48x64xf32> to vector<48xf32>
    %186 = vector.shape_cast %185 : vector<48xf32> to vector<48x1xf32>
    %187 = vector.extract_strided_slice %186 {offsets = [0, 0], sizes = [8, 1], strides = [1, 1]} : vector<48x1xf32> to vector<8x1xf32>
    %188 = vector.extract_strided_slice %186 {offsets = [8, 0], sizes = [8, 1], strides = [1, 1]} : vector<48x1xf32> to vector<8x1xf32>
    %189 = arith.addf %187, %188 : vector<8x1xf32>
    %190 = vector.extract_strided_slice %186 {offsets = [16, 0], sizes = [8, 1], strides = [1, 1]} : vector<48x1xf32> to vector<8x1xf32>
    %191 = arith.addf %189, %190 : vector<8x1xf32>
    %192 = vector.extract_strided_slice %186 {offsets = [24, 0], sizes = [8, 1], strides = [1, 1]} : vector<48x1xf32> to vector<8x1xf32>
    %193 = arith.addf %191, %192 : vector<8x1xf32>
    %194 = vector.extract_strided_slice %186 {offsets = [32, 0], sizes = [8, 1], strides = [1, 1]} : vector<48x1xf32> to vector<8x1xf32>
    %195 = arith.addf %193, %194 : vector<8x1xf32>
    %196 = vector.extract_strided_slice %186 {offsets = [40, 0], sizes = [8, 1], strides = [1, 1]} : vector<48x1xf32> to vector<8x1xf32>
    %197 = arith.addf %195, %196 : vector<8x1xf32>
    %cst_76 = arith.constant 0.00260416674 : f32
    %198 = vector.broadcast %cst_76 : f32 to vector<8x1xf32>
    %199 = arith.mulf %197, %198 : vector<8x1xf32>
    %cst_77 = arith.constant 9.99999974E-6 : f32
    %200 = vector.broadcast %cst_77 : f32 to vector<8x1xf32>
    %201 = arith.addf %199, %200 : vector<8x1xf32>
    %202 = math.rsqrt %201 : vector<8x1xf32>
    %203 = tpu.concatenate %202, %202, %202, %202, %202, %202 in 0 : vector<8x1xf32>, vector<8x1xf32>, vector<8x1xf32>, vector<8x1xf32>, vector<8x1xf32>, vector<8x1xf32> -> vector<48x1xf32>
    %204 = vector.broadcast %203 : vector<48x1xf32> to vector<48x64xf32>
    %205 = arith.mulf %183, %204 : vector<48x64xf32>
    %206 = vector.extract_strided_slice %205 {offsets = [0, 0], sizes = [8, 64], strides = [1, 1]} : vector<48x64xf32> to vector<8x64xf32>
    %c0_78 = arith.constant 0 : index
    %c0_79 = arith.constant 0 : index
    %c0_80 = arith.constant 0 : index
    %207 = vector.load %arg8[%c0_78, %c0_79, %c0_80] : memref<6x64x128xf32, #tpu.memory_space<vmem>>, vector<1x64x128xf32>
    %208 = vector.shape_cast %207 : vector<1x64x128xf32> to vector<64x128xf32>
    %cst_81 = arith.constant dense<0.000000e+00> : vector<8x128xf32>
    %209 = tpu.matmul %206, %208, %cst_81 {dimension_numbers = #tpu.dot_dimension_numbers<[1], [0], [0], [1], [0, 0, 1, 1], [], []>} : vector<8x64xf32>, vector<64x128xf32>, vector<8x128xf32> -> vector<8x128xf32>
    %210 = vector.extract_strided_slice %205 {offsets = [8, 0], sizes = [8, 64], strides = [1, 1]} : vector<48x64xf32> to vector<8x64xf32>
    %c1_82 = arith.constant 1 : index
    %c0_83 = arith.constant 0 : index
    %c0_84 = arith.constant 0 : index
    %211 = vector.load %arg8[%c1_82, %c0_83, %c0_84] : memref<6x64x128xf32, #tpu.memory_space<vmem>>, vector<1x64x128xf32>
    %212 = vector.shape_cast %211 : vector<1x64x128xf32> to vector<64x128xf32>
    %cst_85 = arith.constant dense<0.000000e+00> : vector<8x128xf32>
    %213 = tpu.matmul %210, %212, %cst_85 {dimension_numbers = #tpu.dot_dimension_numbers<[1], [0], [0], [1], [0, 0, 1, 1], [], []>} : vector<8x64xf32>, vector<64x128xf32>, vector<8x128xf32> -> vector<8x128xf32>
    %214 = arith.addf %209, %213 : vector<8x128xf32>
    %215 = vector.extract_strided_slice %205 {offsets = [16, 0], sizes = [8, 64], strides = [1, 1]} : vector<48x64xf32> to vector<8x64xf32>
    %c2_86 = arith.constant 2 : index
    %c0_87 = arith.constant 0 : index
    %c0_88 = arith.constant 0 : index
    %216 = vector.load %arg8[%c2_86, %c0_87, %c0_88] : memref<6x64x128xf32, #tpu.memory_space<vmem>>, vector<1x64x128xf32>
    %217 = vector.shape_cast %216 : vector<1x64x128xf32> to vector<64x128xf32>
    %cst_89 = arith.constant dense<0.000000e+00> : vector<8x128xf32>
    %218 = tpu.matmul %215, %217, %cst_89 {dimension_numbers = #tpu.dot_dimension_numbers<[1], [0], [0], [1], [0, 0, 1, 1], [], []>} : vector<8x64xf32>, vector<64x128xf32>, vector<8x128xf32> -> vector<8x128xf32>
    %219 = arith.addf %214, %218 : vector<8x128xf32>
    %220 = vector.extract_strided_slice %205 {offsets = [24, 0], sizes = [8, 64], strides = [1, 1]} : vector<48x64xf32> to vector<8x64xf32>
    %c3_90 = arith.constant 3 : index
    %c0_91 = arith.constant 0 : index
    %c0_92 = arith.constant 0 : index
    %221 = vector.load %arg8[%c3_90, %c0_91, %c0_92] : memref<6x64x128xf32, #tpu.memory_space<vmem>>, vector<1x64x128xf32>
    %222 = vector.shape_cast %221 : vector<1x64x128xf32> to vector<64x128xf32>
    %cst_93 = arith.constant dense<0.000000e+00> : vector<8x128xf32>
    %223 = tpu.matmul %220, %222, %cst_93 {dimension_numbers = #tpu.dot_dimension_numbers<[1], [0], [0], [1], [0, 0, 1, 1], [], []>} : vector<8x64xf32>, vector<64x128xf32>, vector<8x128xf32> -> vector<8x128xf32>
    %224 = arith.addf %219, %223 : vector<8x128xf32>
    %225 = vector.extract_strided_slice %205 {offsets = [32, 0], sizes = [8, 64], strides = [1, 1]} : vector<48x64xf32> to vector<8x64xf32>
    %c4_94 = arith.constant 4 : index
    %c0_95 = arith.constant 0 : index
    %c0_96 = arith.constant 0 : index
    %226 = vector.load %arg8[%c4_94, %c0_95, %c0_96] : memref<6x64x128xf32, #tpu.memory_space<vmem>>, vector<1x64x128xf32>
    %227 = vector.shape_cast %226 : vector<1x64x128xf32> to vector<64x128xf32>
    %cst_97 = arith.constant dense<0.000000e+00> : vector<8x128xf32>
    %228 = tpu.matmul %225, %227, %cst_97 {dimension_numbers = #tpu.dot_dimension_numbers<[1], [0], [0], [1], [0, 0, 1, 1], [], []>} : vector<8x64xf32>, vector<64x128xf32>, vector<8x128xf32> -> vector<8x128xf32>
    %229 = arith.addf %224, %228 : vector<8x128xf32>
    %230 = vector.extract_strided_slice %205 {offsets = [40, 0], sizes = [8, 64], strides = [1, 1]} : vector<48x64xf32> to vector<8x64xf32>
    %c5_98 = arith.constant 5 : index
    %c0_99 = arith.constant 0 : index
    %c0_100 = arith.constant 0 : index
    %231 = vector.load %arg8[%c5_98, %c0_99, %c0_100] : memref<6x64x128xf32, #tpu.memory_space<vmem>>, vector<1x64x128xf32>
    %232 = vector.shape_cast %231 : vector<1x64x128xf32> to vector<64x128xf32>
    %cst_101 = arith.constant dense<0.000000e+00> : vector<8x128xf32>
    %233 = tpu.matmul %230, %232, %cst_101 {dimension_numbers = #tpu.dot_dimension_numbers<[1], [0], [0], [1], [0, 0, 1, 1], [], []>} : vector<8x64xf32>, vector<64x128xf32>, vector<8x128xf32> -> vector<8x128xf32>
    %234 = arith.addf %229, %233 : vector<8x128xf32>
    %c6 = arith.constant 6 : index
    %c0_102 = arith.constant 0 : index
    %235 = vector.load %arg3[%c6, %c0_102] : memref<16x256xf32, #tpu.memory_space<vmem>>, vector<1x128xf32>
    %236 = vector.broadcast %235 : vector<1x128xf32> to vector<8x128xf32>
    %237 = arith.addf %234, %236 : vector<8x128xf32>
    %c0_103 = arith.constant 0 : index
    %c0_104 = arith.constant 0 : index
    %238 = vector.load %arg11[%c0_103, %c0_104] : memref<8x128xf32, #tpu.memory_space<vmem>>, vector<8x128xf32>
    tpu.vector_store %arg11[%c0_103, %c0_104], %237 {strides = array<i32>} : memref<8x128xf32, #tpu.memory_space<vmem>>, vector<8x128xf32>,
    return
  }
  func.func @transform_0(%arg0: i32) -> (i32, i32) {
    %c0_i32 = arith.constant 0 : i32
    %c0_i32_0 = arith.constant 0 : i32
    return %arg0, %c0_i32 : i32, i32
  }
  func.func @transform_1(%arg0: i32) -> (i32, i32, i32) {
    %c0_i32 = arith.constant 0 : i32
    %c0_i32_0 = arith.constant 0 : i32
    %c0_i32_1 = arith.constant 0 : i32
    %c0_i32_2 = arith.constant 0 : i32
    return %c0_i32, %c0_i32_0, %c0_i32_1 : i32, i32, i32
  }
  func.func @transform_2(%arg0: i32) -> (i32, i32) {
    %c0_i32 = arith.constant 0 : i32
    %c0_i32_0 = arith.constant 0 : i32
    %c0_i32_1 = arith.constant 0 : i32
    return %c0_i32, %c0_i32_0 : i32, i32
  }
  func.func @transform_3(%arg0: i32) -> (i32, i32, i32) {
    %c0_i32 = arith.constant 0 : i32
    %c0_i32_0 = arith.constant 0 : i32
    %c0_i32_1 = arith.constant 0 : i32
    %c0_i32_2 = arith.constant 0 : i32
    return %c0_i32, %c0_i32_0, %c0_i32_1 : i32, i32, i32
  }
  func.func @transform_4(%arg0: i32) -> (i32, i32, i32) {
    %c0_i32 = arith.constant 0 : i32
    %c0_i32_0 = arith.constant 0 : i32
    %c0_i32_1 = arith.constant 0 : i32
    %c0_i32_2 = arith.constant 0 : i32
    return %c0_i32, %c0_i32_0, %c0_i32_1 : i32, i32, i32
  }
  func.func @transform_5(%arg0: i32) -> (i32, i32, i32) {
    %c0_i32 = arith.constant 0 : i32
    %c0_i32_0 = arith.constant 0 : i32
    %c0_i32_1 = arith.constant 0 : i32
    %c0_i32_2 = arith.constant 0 : i32
    return %c0_i32, %c0_i32_0, %c0_i32_1 : i32, i32, i32
  }
  func.func @transform_6(%arg0: i32) -> (i32, i32, i32) {
    %c0_i32 = arith.constant 0 : i32
    %c0_i32_0 = arith.constant 0 : i32
    %c0_i32_1 = arith.constant 0 : i32
    %c0_i32_2 = arith.constant 0 : i32
    return %c0_i32, %c0_i32_0, %c0_i32_1 : i32, i32, i32
  }
  func.func @transform_7(%arg0: i32) -> (i32, i32, i32) {
    %c0_i32 = arith.constant 0 : i32
    %c0_i32_0 = arith.constant 0 : i32
    %c0_i32_1 = arith.constant 0 : i32
    %c0_i32_2 = arith.constant 0 : i32
    return %c0_i32, %c0_i32_0, %c0_i32_1 : i32, i32, i32
  }
  func.func @transform_8(%arg0: i32) -> (i32, i32) {
    %c0_i32 = arith.constant 0 : i32
    %c0_i32_0 = arith.constant 0 : i32
    %c0_i32_1 = arith.constant 0 : i32
    return %c0_i32, %c0_i32_0 : i32, i32
  }
  func.func @transform_9(%arg0: i32) -> (i32, i32) {
    %c0_i32 = arith.constant 0 : i32
    %c0_i32_0 = arith.constant 0 : i32
    %c0_i32_1 = arith.constant 0 : i32
    return %c0_i32, %c0_i32_0 : i32, i32
  }
  func.func @transform_10(%arg0: i32) -> (i32, i32) {
    %c0_i32 = arith.constant 0 : i32
    %c0_i32_0 = arith.constant 0 : i32
    return %arg0, %c0_i32 : i32, i32
  }
}

</mosaic_0001>

<bundles_post_ra>
// kernel: tpu_custom_call.1
= control target key start
LH: loop header
LB: loop body
LE: loop exit
PB: predicated region body
PF: predicated region fallthrough
CT: control target
= control target key end

     0   :  { %15 = vsyncpa [#allocation3], 0  ;;  %s6226_s0 = inlined_call_operand.vmem [shape: f32[16,13], index: 0, kind: input, shape index: {}]   ;;  %s6227_s1 = inlined_call_operand.vmem [shape: f32[6,13,64], index: 1, kind: input, shape index: {}]   ;;  %s6228_s2 = inlined_call_operand.vmem [shape: f32[16,256], index: 2, kind: input, shape index: {}]   ;;  %s6229_s3 = inlined_call_operand.vmem [shape: f32[1,64,192], index: 3, kind: input, shape index: {}]   ;;  %s6230_s4 = inlined_call_operand.vmem [shape: f32[1,384,64], index: 4, kind: input, shape index: {}]   ;;  %s6231_s5 = inlined_call_operand.vmem [shape: f32[1,64,256], index: 5, kind: input, shape index: {}]   ;;  %s6232_s6 = inlined_call_operand.vmem [shape: f32[1,256,64], index: 6, kind: input, shape index: {}]   ;;  %s6233_s7 = inlined_call_operand.vmem [shape: f32[6,64,128], index: 7, kind: input, shape index: {}]   ;;  %s6234_s8 = inlined_call_operand.vmem [shape: f32[384,48], index: 8, kind: input, shape index: {}]   ;;  %s6235_s9 = inlined_call_operand.vmem [shape: f32[48,384], index: 9, kind: input, shape index: {}]   ;;  %s6236_s10 = inlined_call_operand.hbm [shape: f32[16,128], index: 10, kind: output, shape index: {}]  }
   0x1   :  { %17 = vsyncpa [#allocation3 + $0x1], 0  ;;  %s4640_s13 = smov 0   ;;  %s4642_s14 = smov 0  }
   0x2   :  { %s4644_s15 = smov 0   ;;  %s4646_s16 = smov 0  }
   0x3 LB: > { %6244 = sst [smem:[#allocation5_spill]] %s4562_s15  ;;  %s4661_s17 = sadd.s32 4294967295, %s4566_s16   ;;  %s4566_s16 = sphi %s4646_s16, %s6257_s16   ;;  %s4562_s15 = sphi %s4644_s15, %s6254_s15   ;;  %s4558_s14 = sphi %s4642_s14, %s6256_s14   ;;  %s4554_s13 = sphi %s4640_s13, %s6255_s13  }
   0x4   : > { %s3444_s18 = sadd.s32 4294967294, %s4566_s16   ;;  %s4665_s19 = sadd.s32 1, %s4566_s16  }
   0x5   : > { %s245_s20 = sadd.s32 1, %s4562_s15  ;;  %s242_s21 = ssub.s32 %s4566_s16, %s4665_s19 }
   0x6   : > { %p255_p0 = scmp.ne.s32.totalorder %s4562_s15, %s4558_s14  ;;  %p243_p1 = scmp.eq.s32.totalorder %s242_s21, 0 }
   0x7   : > { %p256_p2 = scmp.eq.s32.totalorder %s4661_s17, 1  ;;  %p261_p3 = scmp.ne.s32.totalorder %s4558_s14, %s4554_s13 }
   0x8   : > { %p262_p4 = scmp.eq.s32.totalorder %s3444_s18, 1  ;;  %p3447_p7 = scmp.ge.s32.totalorder %s4566_s16, 1 }
   0x9   : > { %s4676_s22 = scalar_select %p243_p1, %s4562_s15, %s245_s20  }
   0xa   : > { %p4678_p5 = por %p256_p2, %p255_p0  ;;  %p4682_p6 = por %p262_p4, %p261_p3 }
   0xb   : > { %6245 = sst [smem:[#allocation6_spill]] %s4676_s22  ;;  %p314_p8 = scmp.lt.s32.totalorder %s4566_s16, 3 }
   0xd   : > { %p315_p9 = pnand %p3447_p7, %p314_p8 }
   0xe   : > { %v422_v0 = vld [vmem:[%s6227_s1] sm:$0xff] (!%p315_p9)  ;;  %v423_v1 = vld [vmem:[%s6227_s1 + $0x8] sm:$0x1f] (!%p315_p9)  ;;  %vm429_vm0 = vcmask (!%p315_p9), 1044480   ;;  %v4568_v2 = vmov (!%p315_p9), 0.0|0.0   ;;  %vm4569_vm1 = vmmov (!%p315_p9), 1  }
   0xf   : > { %318 = sbr.rel (%p315_p9) target bundleno = 3756 (0xeac), region = 60  ;;  %4085 = vmatprep.subr.bf16.mxu0 (!%p315_p9), %v4568_v2  ;;  %v4086_v3 = vpack.c.bf16 (!%p315_p9), %v423_v1, %v422_v0  ;;  %vm4695_vm2 = vmpackc.low (!%p315_p9), %vm429_vm0, %vm4569_vm1  ;;  %p351_p10 = scmp.lt.s32.totalorder (!%p315_p9), %s4661_s17, 1  ;;  %4097 = vmatprep.subr.bf16.mxu1 (!%p315_p9), %v4568_v2  ;;  %vm4570_vm3 = vmmov (!%p315_p9), 0   ;;  %v4571_v5 = vmov (!%p315_p9), 0.0   ;;  %v3452_v6 = vld [vmem:[%s6227_s1 + $0x10] sm:$0xff] (!%p315_p9)  ;;  %vm425_vm4 = vcmask (!%p315_p9), 105472  }
  0x10   : > { %3830 = vmatprep.mubr.msk.f32.mxu0 (!%p315_p9), %vm4570_vm3, %v4571_v5  ;;  %v3453_v7 = vld [vmem:[%s6227_s1 + $0x18] sm:$0x1f] (!%p315_p9)  ;;  %v3460_v8 = vld [vmem:[%s6227_s1 + $0x30] sm:$0xff] (!%p315_p9)  ;;  %3851 = vmatprep.mubr.msk.f32.mxu1 (!%p315_p9), %vm4570_vm3, %v4571_v5  ;;  %v3456_v14 = vld [vmem:[%s6227_s1 + $0x20] sm:$0xff] (!%p315_p9)  ;;  %vm917_vm5 = vcmask (!%p315_p9), 523264   ;;  %s6238_s26 = smov (!%p315_p9), 64  }
  0x11   : > { %4088 = vmatpush3.bf16.msk.msra.mxu0 (!%p315_p9), %vm4695_vm2, %v4086_v3  ;;  %v3461_v9 = vld [vmem:[%s6227_s1 + $0x38] sm:$0x1f] (!%p315_p9)  ;;  %v3468_v11 = vld [vmem:[%s6227_s1 + $0x50] sm:$0xff] (!%p315_p9)  ;;  %v4090_v13 = vpack.c.bf16 (!%p315_p9), %v3453_v7, %v3452_v6  ;;  %v3457_v15 = vld [vmem:[%s6227_s1 + $0x28] sm:$0x1f] (!%p315_p9)  ;;  %s4573_s28 = smov (!%p315_p9), 104  }
  0x12   : > { %4089 = vmatprep.subr.bf16.mxu0 (!%p315_p9), %v4568_v2  ;;  %v4098_v10 = vpack.c.bf16 (!%p315_p9), %v3461_v9, %v3460_v8  ;;  %v3469_v12 = vld [vmem:[%s6227_s1 + $0x58] sm:$0x1f] (!%p315_p9)  ;;  %v4094_v18 = vpack.c.bf16 (!%p315_p9), %v3457_v15, %v3456_v14  ;;  %v3464_v19 = vld [vmem:[%s6227_s1 + $0x40] sm:$0xff] (!%p315_p9)  ;;  %v3465_v20 = vld [vmem:[%s6227_s1 + $0x48] sm:$0x1f] (!%p315_p9)  ;;  %s4574_s29 = smov (!%p315_p9), 120  }
  0x13   : > { %v4106_v17 = vpack.c.bf16 (!%p315_p9), %v3469_v12, %v3468_v11  ;;  %v889_v21 = vld [vmem:[%s6229_s3 + $0x8] sm:$0xff] (!%p315_p9)  ;;  %v891_v22 = vld [vmem:[%s6229_s3 + $0x18] sm:$0xff] (!%p315_p9)  ;;  %v4102_v23 = vpack.c.bf16 (!%p315_p9), %v3465_v20, %v3464_v19  ;;  %v888_v25 = vld [vmem:[%s6229_s3] sm:$0xff] (!%p315_p9)  ;;  %s4575_s30 = smov (!%p315_p9), 88   ;;  %s4577_s12 = smov (!%p315_p9), 96   ;;  %vm1521_vm6 = vcmask (!%p315_p9), 64512  }
  0x14   : > { %4100 = vmatpush3.bf16.msk.msra.mxu1 (!%p315_p9), %vm4695_vm2, %v4098_v10  ;;  %v4109_v24 = vpack.c.bf16 (!%p315_p9), %v891_v22, %v889_v21  ;;  %v890_v26 = vld [vmem:[%s6229_s3 + $0x10] sm:$0xff] (!%p315_p9)  ;;  %v893_v27 = vld [vmem:[%s6229_s3 + $0x28] sm:$0xff] (!%p315_p9)  ;;  %v895_v28 = vld [vmem:[%s6229_s3 + $0x38] sm:$0xff] (!%p315_p9)  ;;  %s6240_s18 = smov (!%p315_p9), 24   ;;  %s4580_s25 = smov (!%p315_p9), 16   ;;  %vm1528_vm7 = vcmask (!%p315_p9), 130048  }
  0x15   : > { %4105 = vmatprep.subr.bf16.mxu1 (!%p315_p9), %v4568_v2  ;;  %v4111_v29 = vpack.c.bf16 (!%p315_p9), %v890_v26, %v888_v25  ;;  %v4113_v30 = vpack.c.bf16 (!%p315_p9), %v895_v28, %v893_v27  ;;  %v892_v31 = vld [vmem:[%s6229_s3 + $0x20] sm:$0xff] (!%p315_p9)  ;;  %v894_v32 = vld [vmem:[%s6229_s3 + $0x30] sm:$0xff] (!%p315_p9)  ;;  %v897_v33 = vld [vmem:[%s6229_s3 + $0x48] sm:$0xff] (!%p315_p9)  ;;  %s4581_s15 = smov (!%p315_p9), 32   ;;  %s4582_s22 = smov (!%p315_p9), 40   ;;  %vm1535_vm8 = vcmask (!%p315_p9), 195584  }
  0x16   : > { %s352_s21 = scalar_select %p351_p10, %s4661_s17, 1  ;;  %v899_v34 = vld [vmem:[%s6229_s3 + $0x58] sm:$0xff]  ;;  %v4115_v35 = vpack.c.bf16 %v894_v32, %v892_v31  ;;  %v896_v37 = vld [vmem:[%s6229_s3 + $0x40] sm:$0xff]  ;;  %v898_v38 = vld [vmem:[%s6229_s3 + $0x50] sm:$0xff]  ;;  %vm1542_vm9 = vcmask 261120   ;;  %vm1549_vm10 = vcmask 326656  }
  0x17   : > { %v4117_v36 = vpack.c.bf16 %v899_v34, %v897_v33  ;;  %v901_v39 = vld [vmem:[%s6229_s3 + $0x68] sm:$0xff]  ;;  %v903_v40 = vld [vmem:[%s6229_s3 + $0x78] sm:$0xff]  ;;  %v4119_v41 = vpack.c.bf16 %v898_v38, %v896_v37  ;;  %v900_v43 = vld [vmem:[%s6229_s3 + $0x60] sm:$0xff]  ;;  %vm1838_vm11 = vcmask 392192  }
  0x18   : > { %s3449_s11 = sshll.u32 %s352_s21, 3  ;;  %v4121_v42 = vpack.c.bf16 %v903_v40, %v901_v39  ;;  %v902_v44 = vld [vmem:[%s6229_s3 + $0x70] sm:$0xff]  ;;  %v424_v46 = vld [vmem:[%s6228_s2] ss:$0 sm:$0xff]  ;;  %v506_v50 = vld [vmem:[%s6228_s2 + $0x1] ss:$0 sm:$0xff] }
  0x19   : > { %s354_s20 = scalar_lea.vmem %s6226_s0, %s3449_s11  ;;  %v4123_v45 = vpack.c.bf16 %v902_v44, %v900_v43  ;;  %v583_v56 = vld [vmem:[%s6228_s2 + $0x2] ss:$0 sm:$0xff]  ;;  %v660_v60 = vld [vmem:[%s6228_s2 + $0x3] ss:$0 sm:$0xff]  ;;  %v737_v0 = vld [vmem:[%s6228_s2 + $0x4] ss:$0 sm:$0xff] }
  0x1a   : > { %v421_v16 = vld [vmem:[%s354_s20] sm:$0xff]  ;;  %v372_v9 = vld [vmem:[%s6234_s8 + $0x88] sm:$0xff]  ;;  %v374_v14 = vld [vmem:[%s6234_s8 + $0x98] sm:$0xff]  ;;  %s4576_s11 = smov 112   ;;  %s6242_s20 = smov 8  }
  0x1b   : > { %3831 = vmatmul.mubr.msk.f32.vlgmr.msra.gmra.mrb[0].mxu0 %vm425_vm4, %v421_v16  ;;  %3852 = vmatmul.mubr.msk.f32.vlgmr.msra.gmra.mrb[0].mxu1 %vm425_vm4, %v421_v16  ;;  %v814_v6 = vld [vmem:[%s6228_s2 + $0x5] ss:$0 sm:$0xff]  ;;  %v356_v12 = vld [vmem:[%s6234_s8 + $0x8] sm:$0xff]  ;;  %v377_v28 = vld [vmem:[%s6234_s8 + $0xb0] sm:$0xff] }
  0x1c   : > { %4092 = vmatpush3.bf16.msk.msra.mxu0 %vm4695_vm2, %v4090_v13  ;;  %3837 = vmatprep.mubr.msk.f32.mxu0 %vm4570_vm3, %v4571_v5  ;;  %v371_v8 = vld [vmem:[%s6234_s8 + $0x80] sm:$0xff]  ;;  %v373_v13 = vld [vmem:[%s6234_s8 + $0x90] sm:$0xff]  ;;  %v376_v20 = vld [vmem:[%s6234_s8 + $0xa8] sm:$0xff] }
  0x1d   : > { %4093 = vmatprep.subr.bf16.mxu0 %v4568_v2  ;;  %4108 = vmatpush3.bf16.msk.msra.mxu1 %vm4695_vm2, %v4106_v17  ;;  %v355_v10 = vld [vmem:[%s6234_s8] sm:$0xff]  ;;  %v4125_v11 = vpack.c.bf16 %v372_v9, %v371_v8  ;;  %v357_v17 = vld [vmem:[%s6234_s8 + $0x10] sm:$0xff]  ;;  %v360_v26 = vld [vmem:[%s6234_s8 + $0x28] sm:$0xff] }
  0x1e   : > { %3865 = vmatprep.mubr.msk.f32.mxu1 %vm4570_vm3, %v4571_v5  ;;  %v4127_v15 = vpack.c.bf16 %v356_v12, %v355_v10  ;;  %v375_v19 = vld [vmem:[%s6234_s8 + $0xa0] sm:$0xff]  ;;  %v390_v31 = vld [vmem:[%s6234_s8 + $0x118] sm:$0xff]  ;;  %v361_v37 = vld [vmem:[%s6234_s8 + $0x30] sm:$0xff] }
  0x1f   : > { %3838 = vmatmul.mubr.msk.f32.vlgmr.msra.gmra.mrb[2].mxu0 %vm425_vm4, %v421_v16  ;;  %4126 = vmatprep.subr.bf16.mxu1 %v4125_v11  ;;  %v387_v22 = vld [vmem:[%s6234_s8 + $0x100] sm:$0xff]  ;;  %v362_v38 = vld [vmem:[%s6234_s8 + $0x38] sm:$0xff]  ;;  %v396_v8 = vld [vmem:[%s6234_s8 + $0x148] sm:$0xff] }
  0x20   : > { %4096 = vmatpush3.bf16.msk.msra.mxu0 %vm4695_vm2, %v4094_v18  ;;  %3844 = vmatprep.mubr.msk.f32.mxu0 %vm4570_vm3, %v4571_v5  ;;  %v358_v18 = vld [vmem:[%s6234_s8 + $0x18] sm:$0xff]  ;;  %v359_v25 = vld [vmem:[%s6234_s8 + $0x20] sm:$0xff] }
  0x21   : > { %4101 = vmatprep.subr.bf16.mxu0 %v4568_v2  ;;  %3866 = vmatmul.mubr.msk.f32.vlgmr.msra.gmra.mrb[2].mxu1 %vm425_vm4, %v421_v16  ;;  %v4131_v21 = vpack.c.bf16 %v358_v18, %v357_v17  ;;  %v4135_v33 = vpack.c.bf16 %v360_v26, %v359_v25  ;;  %v391_v34 = vld [vmem:[%s6234_s8 + $0x120] sm:$0xff]  ;;  %v369_v17 = vld [vmem:[%s6234_s8 + $0x70] sm:$0xff]  ;;  %v370_v18 = vld [vmem:[%s6234_s8 + $0x78] sm:$0xff] }
  0x22   : > { %4128 = vmatpush3.bf16.msra.mxu1 %v4127_v15  ;;  %v379_v40 = vld [vmem:[%s6234_s8 + $0xc0] sm:$0xff]  ;;  %v386_v15 = vld [vmem:[%s6234_s8 + $0xf8] sm:$0xff] }
  0x23   : > { %3845 = vmatmul.mubr.msk.f32.vlgmr.msra.gmra.mrb[4].mxu0 %vm425_vm4, %v421_v16  ;;  %v363_v44 = vld [vmem:[%s6234_s8 + $0x40] sm:$0xff] }
  0x24   : > { %4104 = vmatpush3.bf16.msk.msra.mxu0 %vm4695_vm2, %v4102_v23  ;;  %3858 = vmatprep.mubr.msk.f32.mxu0 %vm4570_vm3, %v4571_v5  ;;  %v388_v23 = vld [vmem:[%s6234_s8 + $0x108] sm:$0xff] }
  0x25   : > { %4110 = vmatprep.subr.bf16.mxu0 %v4109_v24  ;;  %v4133_v24 = vpack.c.bf16 %v376_v20, %v375_v19  ;;  %v4157_v27 = vpack.c.bf16 %v388_v23, %v387_v22  ;;  %v3472_v12 = vld [vmem:[%s6228_s2 + $0x7] ss:$8 sm:$0x3]  ;;  %v4155_v20 = vpack.c.bf16 %v370_v18, %v369_v17  ;;  %v397_v22 = vld [vmem:[%s6234_s8 + $0x150] sm:$0xff]  ;;  %v398_v23 = vld [vmem:[%s6234_s8 + $0x158] sm:$0xff] }
  0x27   : > { %3859 = vmatmul.mubr.msk.f32.vlgmr.msra.gmra.mrb[6].mxu0 %vm425_vm4, %v421_v16  ;;  %v4129_v16 = vpack.c.bf16 %v374_v14, %v373_v13  ;;  %v385_v14 = vld [vmem:[%s6234_s8 + $0xf0] sm:$0xff] }
  0x28   : > { %4112 = vmatpush1.bf16.msra.mxu0 %v4111_v29  ;;  %1000 = vmatprep.mubr.f32.mxu0 %v4571_v5  ;;  %v378_v29 = vld [vmem:[%s6234_s8 + $0xb8] sm:$0xff] }
  0x29   : > { %4114 = vmatprep.subr.bf16.mxu0 %v4113_v30  ;;  %4130 = vmatprep.subr.bf16.mxu1 %v4129_v16  ;;  %v389_v30 = vld [vmem:[%s6234_s8 + $0x110] sm:$0xff]  ;;  %v4153_v16 = vpack.c.bf16 %v386_v15, %v385_v14 }
  0x2a   : > { %v4161_v32 = vpack.c.bf16 %v390_v31, %v389_v30  ;;  %4132 = vmatpush3.bf16.msra.mxu1 %v4131_v21  ;;  %v400_v30 = vld [vmem:[%s6234_s8 + $0x168] sm:$0xff] }
  0x2b   : > { %4134 = vmatprep.subr.bf16.mxu1 %v4133_v24  ;;  %v4177_v24 = vpack.c.bf16 %v398_v23, %v397_v22 }
  0x2c   : > { %4116 = vmatpush1.bf16.msra.mxu0 %v4115_v35  ;;  %v392_v35 = vld [vmem:[%s6234_s8 + $0x128] sm:$0xff] }
  0x2d   : > { %4118 = vmatprep.subr.bf16.mxu0 %v4117_v36  ;;  %v4137_v36 = vpack.c.bf16 %v378_v29, %v377_v28  ;;  %v4165_v39 = vpack.c.bf16 %v392_v35, %v391_v34  ;;  %v399_v29 = vld [vmem:[%s6234_s8 + $0x160] sm:$0xff]  ;;  %v401_v34 = vld [vmem:[%s6234_s8 + $0x170] sm:$0xff]  ;;  %v402_v35 = vld [vmem:[%s6234_s8 + $0x178] sm:$0xff] }
  0x2e   : > { %4136 = vmatpush3.bf16.msra.mxu1 %v4135_v33  ;;  %v4181_v31 = vpack.c.bf16 %v400_v30, %v399_v29 }
  0x2f   : > { %4138 = vmatprep.subr.bf16.mxu1 %v4137_v36  ;;  %v4185_v36 = vpack.c.bf16 %v402_v35, %v401_v34 }
  0x30   : > { %4120 = vmatpush1.bf16.msra.mxu0 %v4119_v41  ;;  %v380_v41 = vld [vmem:[%s6234_s8 + $0xc8] sm:$0xff] }
  0x31   : > { %4122 = vmatprep.subr.bf16.mxu0 %v4121_v42  ;;  %v4139_v42 = vpack.c.bf16 %v362_v38, %v361_v37  ;;  %v4141_v43 = vpack.c.bf16 %v380_v41, %v379_v40 }
  0x33   : > { %4140 = vmatpush3.bf16.msra.mxu1 %v4139_v42 }
  0x34   : > { %4124 = vmatpush1.bf16.msra.mxu0 %v4123_v45  ;;  %v364_v45 = vld [vmem:[%s6234_s8 + $0x48] sm:$0xff]  ;;  %4142 = vmatprep.subr.bf16.mxu1 %v4141_v43 }
  0x35   : > { %4158 = vmatprep.subr.bf16.mxu0 %v4157_v27 }
  0xee   : > { %v499_v47 = vpop.f32.mrb[0].mxu0  ;;  %v730_v51 = vpop.f32.mrb[0].mxu1 }
  0xef   : > { %v4821_v48 = vadd.f32 %v499_v47, %v424_v46  ;;  %v3832_v49 = vpop.f32.mrb[1].mxu0  ;;  %v3853_v52 = vpop.f32.mrb[1].mxu1  ;;  %v4842_v63 = vadd.f32 %v730_v51, %v660_v60  ;;  %v4143_v46 = vpack.c.bf16 %v364_v45, %v363_v44  ;;  %v907_v47 = vlaneseq  ;;  %v383_v60 = vld [vmem:[%s6234_s8 + $0xe0] sm:$0xff] }
  0xf0   : > { %v381_v49 = vld [vmem:[%s6234_s8 + $0xd0] sm:$0xff] }
  0xf1   : > { %3473 = vmatmul.mubr.msk.f32.vlgmr.msra.gmra.mrb[8].mxu0 %vm917_vm5, %v4821_v48  ;;  %4144 = vmatpush3.bf16.msra.mxu1 %v4143_v46  ;;  %v365_v52 = vld [vmem:[%s6234_s8 + $0x50] sm:$0xff] }
  0xf2   : > { %v576_v53 = vpop.f32.mrb[2].mxu0  ;;  %1006 = vmatprep.mubr.f32.mxu0 %v4571_v5  ;;  %4160 = vmatpush3.bf16.msra.mxu0 %v4157_v27 }
  0xf3   : > { %v4829_v54 = vadd.f32 %v576_v53, %v506_v50  ;;  %v3839_v55 = vpop.f32.mrb[3].mxu0  ;;  %4162 = vmatprep.subr.bf16.mxu0 %v4161_v32  ;;  %v382_v50 = vld [vmem:[%s6234_s8 + $0xd8] sm:$0xff] }
  0xf4   : > { %v884_v57 = vpop.f32.mrb[2].mxu1  ;;  %v4145_v51 = vpack.c.bf16 %v382_v50, %v381_v49  ;;  %v366_v53 = vld [vmem:[%s6234_s8 + $0x58] sm:$0xff]  ;;  %v4955_v55 = vshrl.u32 %v907_v47, 7 }
  0xf5   : > { %3474 = vmatmul.mubr.msk.f32.gmra.mrb[10].mxu0 %vm917_vm5, %v4829_v54  ;;  %v3867_v58 = vpop.f32.mrb[3].mxu1  ;;  %v4860_v7 = vadd.f32 %v884_v57, %v814_v6  ;;  %v393_v57 = vld [vmem:[%s6234_s8 + $0x130] sm:$0xff]  ;;  %v395_v6 = vld [vmem:[%s6234_s8 + $0x140] sm:$0xff] }
  0xf6   : > { %v653_v59 = vpop.f32.mrb[4].mxu0  ;;  %1012 = vmatprep.mubr.f32.mxu0 %v4571_v5  ;;  %4164 = vmatpush3.bf16.msra.mxu0 %v4161_v32  ;;  %v394_v58 = vld [vmem:[%s6234_s8 + $0x138] sm:$0xff]  ;;  %v909_v9 = vsub.s32 0, %v4955_v55  ;;  %v4173_v11 = vpack.c.bf16 %v396_v8, %v395_v6  ;;  %v913_v13 = vsub.s32 1, %v4955_v55 }
  0xf7   : > { %v4840_v61 = vadd.f32 %v653_v59, %v583_v56  ;;  %v3846_v62 = vpop.f32.mrb[5].mxu0  ;;  %4166 = vmatprep.subr.bf16.mxu0 %v4165_v39  ;;  %v4147_v56 = vpack.c.bf16 %v366_v53, %v365_v52  ;;  %4146 = vmatprep.subr.bf16.mxu1 %v4145_v51  ;;  %v4169_v59 = vpack.c.bf16 %v394_v58, %v393_v57 }
  0xf8   : > { %v384_v62 = vld [vmem:[%s6234_s8 + $0xe8] sm:$0xff]  ;;  %v910_v19 = vrot.slane %v3472_v12, %v909_v9  ;;  %v5002_v21 = vrot.slane %v3472_v12, %v913_v13 }
  0xf9   : > { %3475 = vmatmul.mubr.msk.f32.gmra.mrb[12].mxu0 %vm917_vm5, %v4840_v61  ;;  %4148 = vmatpush3.bf16.msra.mxu1 %v4147_v56 }
  0xfa   : > { %1018 = vmatprep.mubr.f32.mxu0 %v4571_v5  ;;  %v807_v1 = vpop.f32.mrb[6].mxu0  ;;  %4168 = vmatpush3.bf16.msra.mxu0 %v4165_v39 }
  0xfb   : > { %v3860_v3 = vpop.f32.mrb[7].mxu0  ;;  %v4850_v4 = vadd.f32 %v807_v1, %v737_v0  ;;  %v367_v0 = vld [vmem:[%s6234_s8 + $0x60] sm:$0xff]  ;;  %v4149_v1 = vpack.c.bf16 %v384_v62, %v383_v60  ;;  %4170 = vmatprep.subr.bf16.mxu0 %v4169_v59 }
  0xfc   : > { %v368_v3 = vld [vmem:[%s6234_s8 + $0x68] sm:$0xff] }
  0xfd   : > { %3476 = vmatmul.mubr.msk.f32.gmra.mrb[14].mxu0 %vm917_vm5, %v4842_v63  ;;  %v4151_v10 = vpack.c.bf16 %v368_v3, %v367_v0  ;;  %4150 = vmatprep.subr.bf16.mxu1 %v4149_v1 }
  0xfe   : > { %1024 = vmatprep.mubr.f32.mxu0 %v4571_v5  ;;  %4172 = vmatpush3.bf16.msra.mxu0 %v4169_v59 }
  0xff   : > { %4152 = vmatpush3.bf16.msra.mxu1 %v4151_v10  ;;  %4174 = vmatprep.subr.bf16.mxu0 %v4173_v11 }
 0x100   : > { %4154 = vmatprep.subr.bf16.mxu1 %v4153_v16 }
 0x101   : > { %3477 = vmatmul.mubr.msk.f32.gmra.mrb[16].mxu0 %vm917_vm5, %v4850_v4 }
 0x102   : > { %1030 = vmatprep.mubr.f32.mxu0 %v4571_v5  ;;  %4176 = vmatpush3.bf16.msra.mxu0 %v4173_v11 }
 0x103   : > { %4156 = vmatpush3.bf16.msra.mxu1 %v4155_v20  ;;  %4178 = vmatprep.subr.bf16.mxu0 %v4177_v24 }
 0x105   : > { %3478 = vmatmul.mubr.msk.f32.gmra.mrb[18].mxu0 %vm917_vm5, %v4860_v7 }
 0x106   : > { %4180 = vmatpush3.bf16.msra.mxu0 %v4177_v24 }
 0x107   : > { %4182 = vmatprep.subr.bf16.mxu0 %v4181_v31 }
 0x10a   : > { %4184 = vmatpush3.bf16.msra.mxu0 %v4181_v31 }
 0x10b   : > { %4186 = vmatprep.subr.bf16.mxu0 %v4185_v36 }
 0x10e   : > { %4188 = vmatpush3.bf16.msra.mxu0 %v4185_v36 }
 0x1c4   : > { %v1002_v25 = vpop.f32.mrb[8].mxu0 }
 0x1c5   : > { %v1003_v26 = vadd.f32 %v1002_v25, %v910_v19  ;;  %v1004_v27 = vpop.f32.mrb[9].mxu0 }
 0x1c6   : > { %v5011_v28 = vadd.f32 %v1004_v27, %v5002_v21 }
 0x1c7   : > { %1038 = vrot.lane.b32.xlu0 %v1003_v26, %s6238_s26 }
 0x1c8   : > { %v1008_v32 = vpop.f32.mrb[10].mxu0 }
 0x1c9   : > { %v5020_v33 = vpop.f32.mrb[11].mxu0  ;;  %v1009_v50 = vadd.f32 %v1008_v32, %v910_v19 }
 0x1cc   : > { %v1014_v37 = vpop.f32.mrb[12].mxu0 }
 0x1cd   : > { %v1015_v38 = vadd.f32 %v1014_v37, %v910_v19  ;;  %v1016_v39 = vpop.f32.mrb[13].mxu0 }
 0x1ce   : > { %v5029_v40 = vadd.f32 %v1016_v39, %v5002_v21 }
 0x1cf   : > { %1042 = vrot.lane.b32.xlu0 %v1015_v38, %s6238_s26 }
 0x1d0   : > { %v1020_v41 = vpop.f32.mrb[14].mxu0 }
 0x1d1   : > { %v1021_v42 = vadd.f32 %v1020_v41, %v910_v19  ;;  %v5032_v43 = vpop.f32.mrb[15].mxu0 }
 0x1d3   : > { %1072 = vrot.lane.b32.xlu0 %v1021_v42, %s6238_s26 }
 0x1d4   : > { %v1026_v44 = vpop.f32.mrb[16].mxu0 }
 0x1d5   : > { %v1027_v45 = vadd.f32 %v1026_v44, %v910_v19  ;;  %v1028_v46 = vpop.f32.mrb[17].mxu0 }
 0x1d6   : > { %v5036_v47 = vadd.f32 %v1028_v46, %v5002_v21 }
 0x1d7   : > { %1046 = vrot.lane.b32.xlu1 %v1027_v45, %s6238_s26 }
 0x1d8   : > { %v1032_v49 = vpop.f32.mrb[18].mxu0 }
 0x1d9   : > { %v5039_v51 = vpop.f32.mrb[19].mxu0  ;;  %v1033_v52 = vadd.f32 %v1032_v49, %v910_v19 }
 0x1db   : > { %1070 = vrot.lane.b32.xlu1 %v1009_v50, %s6238_s26 }
 0x1df   : > { %1074 = vrot.lane.b32.xlu1 %v1033_v52, %s6238_s26  ;;  %s348_s26 = sand.u32 1, %s4558_s14  }
 0x1e0   : > { %s3372_s27 = scalar_lea.sflag [#allocation3], %s348_s26 }
 0x239   : > { %v1039_v53 = vpop.permute.xlu0 %1038 }
 0x23a   : > { %v1049_v56 = vsel %vm917_vm5, %v1039_v53, %v1009_v50  ;;  %v1079_v57 = vsel %vm917_vm5, %v1003_v26, %v1039_v53 }
 0x23b   : > { %v1085_v62 = vmul.f32 %v1079_v57, %v1049_v56 }
 0x241   : > { %v1043_v58 = vpop.permute.xlu0 %1042 }
 0x242   : > { %v1050_v59 = vsel %vm917_vm5, %v1043_v58, %v1021_v42  ;;  %v1081_v8 = vsel %vm917_vm5, %v1015_v38, %v1043_v58 }
 0x243   : > { %v1086_v60 = vmul.f32 %v1079_v57, %v1050_v59  ;;  %v1092_v19 = vmul.f32 %v1081_v8, %v1050_v59  ;;  %v1091_v24 = vmul.f32 %v1081_v8, %v1049_v56 }
 0x245   : > { %1167 = vmatprep.mubr.f32.mxu1 %v1086_v60  ;;  %v1073_v11 = vpop.permute.xlu0 %1072 }
 0x246   : > { %1168 = vmatmul.mubr.f32.vlgmr.msra.gmra.mrb[4].mxu1 %v1085_v62  ;;  %v1082_v20 = vsel %vm917_vm5, %v1021_v42, %v1073_v11 }
 0x247   : > { %v1095_v26 = vmul.f32 %v1082_v20, %v1050_v59  ;;  %v1094_v29 = vmul.f32 %v1082_v20, %v1049_v56 }
 0x249   : > { %v1047_v0 = vpop.permute.xlu1 %1046 }
 0x24a   : > { %v1051_v1 = vsel %vm917_vm5, %v1047_v0, %v1033_v52  ;;  %v1083_v17 = vsel %vm917_vm5, %v1027_v45, %v1047_v0 }
 0x24b   : > { %v1087_v3 = vmul.f32 %v1079_v57, %v1051_v1  ;;  %v1093_v16 = vmul.f32 %v1081_v8, %v1051_v1  ;;  %v1096_v22 = vmul.f32 %v1082_v20, %v1051_v1  ;;  %v1099_v25 = vmul.f32 %v1083_v17, %v1051_v1 }
 0x24c   : > { %v1098_v30 = vmul.f32 %v1083_v17, %v1050_v59  ;;  %v1097_v31 = vmul.f32 %v1083_v17, %v1049_v56 }
 0x24d   : > { %v1071_v6 = vpop.permute.xlu1 %1070  ;;  %3900 = vmatprep.mubr.f32.mxu0 %v1087_v3 }
 0x24e   : > { %v1080_v10 = vsel %vm917_vm5, %v1009_v50, %v1071_v6 }
 0x24f   : > { %v1090_v12 = vmul.f32 %v1080_v10, %v1051_v1  ;;  %v1089_v14 = vmul.f32 %v1080_v10, %v1050_v59  ;;  %v1088_v15 = vmul.f32 %v1080_v10, %v1049_v56 }
 0x251   : > { %v1075_v18 = vpop.permute.xlu1 %1074  ;;  %1172 = vmatprep.mubr.f32.mxu1 %v1089_v14  ;;  %3901 = vmatmul.mubr.f32.vlgmr.msra.gmra.mrb[20].mxu0 %v1090_v12 }
 0x252   : > { %1173 = vmatmul.mubr.f32.gmra.mrb[6].mxu1 %v1088_v15  ;;  %3903 = vmatprep.mubr.f32.mxu0 %v1093_v16  ;;  %v1084_v23 = vsel %vm917_vm5, %v1033_v52, %v1075_v18 }
 0x253   : > { %1177 = vmatprep.mubr.f32.mxu1 %v1092_v19  ;;  %v1102_v27 = vmul.f32 %v1084_v23, %v1051_v1  ;;  %v1101_v32 = vmul.f32 %v1084_v23, %v1050_v59  ;;  %v1100_v34 = vmul.f32 %v1084_v23, %v1049_v56 }
 0x255   : > { %3904 = vmatmul.mubr.f32.gmra.mrb[22].mxu0 %v1096_v22 }
 0x256   : > { %1178 = vmatmul.mubr.f32.gmra.mrb[8].mxu1 %v1091_v24  ;;  %3906 = vmatprep.mubr.f32.mxu0 %v1099_v25 }
 0x257   : > { %1182 = vmatprep.mubr.f32.mxu1 %v1095_v26 }
 0x259   : > { %3907 = vmatmul.mubr.f32.gmra.mrb[24].mxu0 %v1102_v27 }
 0x25a   : > { %1183 = vmatmul.mubr.f32.gmra.mrb[10].mxu1 %v1094_v29 }
 0x25b   : > { %1187 = vmatprep.mubr.f32.mxu1 %v1098_v30 }
 0x25e   : > { %1188 = vmatmul.mubr.f32.gmra.mrb[12].mxu1 %v1097_v31 }
 0x25f   : > { %1192 = vmatprep.mubr.f32.mxu1 %v1101_v32 }
 0x262   : > { %1193 = vmatmul.mubr.f32.gmra.mrb[14].mxu1 %v1100_v34 }
 0x263   : > { %1921 = vmatprep.mubr.f32.mxu1 %v4571_v5 }
 0x319   : > { %v3598_v35 = vpop.f32.mrb[4].mxu1 }
 0x31a   : > { %v3599_v36 = vpop.f32.mrb[5].mxu1 }
 0x31b   : > { %v3600_v37 = vadd.f32 %v3599_v36, %v3598_v35 }
 0x324   : > { %v3902_v38 = vpop.f32.mrb[20].mxu0 }
 0x325   : > { %v3601_v39 = vpop.f32.mrb[6].mxu1  ;;  %v1264_v41 = vpop.f32.mrb[21].mxu0 }
 0x326   : > { %v1265_v42 = vadd.f32 %v3600_v37, %v1264_v41  ;;  %v3602_v44 = vpop.f32.mrb[7].mxu1 }
 0x327   : > { %v3603_v45 = vadd.f32 %v3602_v44, %v3601_v39 }
 0x328   : > { %v3905_v46 = vpop.f32.mrb[22].mxu0  ;;  %v5063_v10 = vmul.f32 0.35355338, %v1265_v42 }
 0x329   : > { %v1270_v49 = vadd.f32 %v3902_v38, %v3603_v45  ;;  %v3604_v50 = vpop.f32.mrb[8].mxu1  ;;  %v1274_v52 = vpop.f32.mrb[23].mxu0 }
 0x32a   : > { %v3605_v53 = vpop.f32.mrb[9].mxu1 }
 0x32b   : > { %v5053_v57 = vmul.f32 0.35355338, %v1270_v49  ;;  %v3606_v56 = vadd.f32 %v3605_v53, %v3604_v50 }
 0x32c   : > { %v3908_v58 = vpop.f32.mrb[24].mxu0 }
 0x32d   : > { %v1275_v59 = vadd.f32 %v3606_v56, %v1274_v52  ;;  %1355 = vrot.lane.b32.xlu1 %v5053_v57, %s4573_s28  ;;  %1307 = vrot.lane.b32.xlu0 %v5053_v57, %s4574_s29  ;;  %v3607_v60 = vpop.f32.mrb[10].mxu1  ;;  %v1284_v62 = vpop.f32.mrb[25].mxu0 }
 0x32e   : > { %v3608_v0 = vpop.f32.mrb[11].mxu1 }
 0x32f   : > { %v3609_v1 = vadd.f32 %v3608_v0, %v3607_v60  ;;  %v5077_v18 = vmul.f32 0.35355338, %v1275_v59 }
 0x331   : > { %v1280_v3 = vadd.f32 %v3905_v46, %v3609_v1  ;;  %1403 = vrot.lane.b32.xlu1 %v5053_v57, %s4575_s30  ;;  %1331 = vrot.lane.b32.xlu0 %v5053_v57, %s4576_s11  ;;  %v3610_v6 = vpop.f32.mrb[12].mxu1 }
 0x332   : > { %v3611_v8 = vpop.f32.mrb[13].mxu1 }
 0x333   : > { %v3612_v11 = vadd.f32 %v3611_v8, %v3610_v6  ;;  %v5087_v19 = vmul.f32 0.35355338, %v1280_v3 }
 0x335   : > { %v1285_v12 = vadd.f32 %v3612_v11, %v1284_v62  ;;  %1379 = vrot.lane.b32.xlu0 %v5053_v57, %s4577_s12  ;;  %1329 = vrot.lane.b32.xlu1 %v5063_v10, %s4576_s11  ;;  %v3613_v14 = vpop.f32.mrb[14].mxu1 }
 0x336   : > { %v3614_v15 = vpop.f32.mrb[15].mxu1 }
 0x337   : > { %v3615_v16 = vadd.f32 %v3614_v15, %v3613_v14  ;;  %v5101_v20 = vmul.f32 0.35355338, %v1285_v12 }
 0x339   : > { %v1290_v17 = vadd.f32 %v3908_v58, %v3615_v16  ;;  %1353 = vrot.lane.b32.xlu1 %v5063_v10, %s4573_s28  ;;  %1305 = vrot.lane.b32.xlu0 %v5063_v10, %s4574_s29 }
 0x33b   : > { %v5111_v22 = vmul.f32 0.35355338, %v1290_v17 }
 0x33d   : > { %1377 = vrot.lane.b32.xlu1 %v5063_v10, %s4577_s12  ;;  %1401 = vrot.lane.b32.xlu0 %v5063_v10, %s4575_s30 }
 0x341   : > { %1333 = vrot.lane.b32.xlu1 %v5077_v18, %s4576_s11  ;;  %1309 = vrot.lane.b32.xlu0 %v5077_v18, %s4574_s29 }
 0x345   : > { %1381 = vrot.lane.b32.xlu1 %v5077_v18, %s4577_s12  ;;  %1357 = vrot.lane.b32.xlu0 %v5077_v18, %s4573_s28 }
 0x349   : > { %1405 = vrot.lane.b32.xlu0 %v5077_v18, %s4575_s30  ;;  %1311 = vrot.lane.b32.xlu1 %v5087_v19, %s4574_s29 }
 0x34d   : > { %1335 = vrot.lane.b32.xlu0 %v5087_v19, %s4576_s11  ;;  %1359 = vrot.lane.b32.xlu1 %v5087_v19, %s4573_s28 }
 0x351   : > { %1383 = vrot.lane.b32.xlu0 %v5087_v19, %s4577_s12  ;;  %1407 = vrot.lane.b32.xlu1 %v5087_v19, %s4575_s30 }
 0x355   : > { %1313 = vrot.lane.b32.xlu0 %v5101_v20, %s4574_s29  ;;  %1337 = vrot.lane.b32.xlu1 %v5101_v20, %s4576_s11 }
 0x359   : > { %1361 = vrot.lane.b32.xlu0 %v5101_v20, %s4573_s28  ;;  %1385 = vrot.lane.b32.xlu1 %v5101_v20, %s4577_s12 }
 0x35d   : > { %1339 = vrot.lane.b32.xlu0 %v5111_v22, %s4576_s11  ;;  %1315 = vrot.lane.b32.xlu1 %v5111_v22, %s4574_s29 }
 0x361   : > { %1363 = vrot.lane.b32.xlu0 %v5111_v22, %s4573_s28  ;;  %1409 = vrot.lane.b32.xlu1 %v5101_v20, %s4575_s30 }
 0x365   : > { %1387 = vrot.lane.b32.xlu0 %v5111_v22, %s4577_s12  ;;  %1411 = vrot.lane.b32.xlu1 %v5111_v22, %s4575_s30 }
 0x39f   : > { %v1356_v23 = vpop.permute.xlu1 %1355  ;;  %v1308_v24 = vpop.permute.xlu0 %1307 }
 0x3a0   : > { %v1324_v25 = vmax.f32 %v5053_v57, %v1308_v24 }
 0x3a3   : > { %v1404_v26 = vpop.permute.xlu1 %1403  ;;  %v1332_v27 = vpop.permute.xlu0 %1331 }
 0x3a4   : > { %v1348_v29 = vmax.f32 %v1324_v25, %v1332_v27 }
 0x3a6   : > { %v1372_v30 = vmax.f32 %v1348_v29, %v1356_v23 }
 0x3a7   : > { %v1330_v31 = vpop.permute.xlu1 %1329  ;;  %v1380_v32 = vpop.permute.xlu0 %1379 }
 0x3a8   : > { %v1396_v34 = vmax.f32 %v1372_v30, %v1380_v32 }
 0x3aa   : > { %v5126_v35 = vmax.f32 %v1396_v34, %v1404_v26 }
 0x3ab   : > { %v1354_v36 = vpop.permute.xlu1 %1353  ;;  %v1306_v37 = vpop.permute.xlu0 %1305 }
 0x3ac   : > { %v1323_v38 = vmax.f32 %v5063_v10, %v1306_v37  ;;  %1469 = vrot.lane.b32.xlu1 %v5126_v35, %s6240_s18  ;;  %1433 = vrot.lane.b32.xlu0 %v5126_v35, %s6242_s20 }
 0x3ae   : > { %v1347_v39 = vmax.f32 %v1323_v38, %v1330_v31 }
 0x3af   : > { %v1378_v41 = vpop.permute.xlu1 %1377  ;;  %v1402_v42 = vpop.permute.xlu0 %1401 }
 0x3b0   : > { %v1371_v44 = vmax.f32 %v1347_v39, %v1354_v36  ;;  %1451 = vrot.lane.b32.xlu0 %v5126_v35, %s4580_s25 }
 0x3b2   : > { %v1395_v45 = vmax.f32 %v1371_v44, %v1378_v41 }
 0x3b3   : > { %v1334_v46 = vpop.permute.xlu1 %1333  ;;  %v1310_v49 = vpop.permute.xlu0 %1309 }
 0x3b4   : > { %v5135_v50 = vmax.f32 %v1395_v45, %v1402_v42  ;;  %v1325_v52 = vmax.f32 %v5077_v18, %v1310_v49  ;;  %1487 = vrot.lane.b32.xlu0 %v5126_v35, %s4581_s15 }
 0x3b6   : > { %1449 = vrot.lane.b32.xlu1 %v5135_v50, %s4580_s25  ;;  %v1349_v53 = vmax.f32 %v1325_v52, %v1334_v46 }
 0x3b7   : > { %v1382_v56 = vpop.permute.xlu1 %1381  ;;  %v1358_v58 = vpop.permute.xlu0 %1357 }
 0x3b8   : > { %v1373_v59 = vmax.f32 %v1349_v53, %v1358_v58  ;;  %1505 = vrot.lane.b32.xlu0 %v5126_v35, %s4582_s22 }
 0x3ba   : > { %1485 = vrot.lane.b32.xlu1 %v5135_v50, %s4581_s15  ;;  %v1397_v0 = vmax.f32 %v1373_v59, %v1382_v56 }
 0x3bb   : > { %v1312_v60 = vpop.permute.xlu1 %1311  ;;  %v1406_v62 = vpop.permute.xlu0 %1405 }
 0x3bc   : > { %1431 = vrot.lane.b32.xlu0 %v5135_v50, %s6242_s20  ;;  %v1326_v1 = vmax.f32 %v5087_v19, %v1312_v60  ;;  %v5151_v8 = vmax.f32 %v1397_v0, %v1406_v62 }
 0x3be   : > { %1503 = vrot.lane.b32.xlu1 %v5135_v50, %s4582_s22 }
 0x3bf   : > { %v1360_v3 = vpop.permute.xlu1 %1359  ;;  %v1336_v6 = vpop.permute.xlu0 %1335 }
 0x3c0   : > { %v1350_v11 = vmax.f32 %v1326_v1, %v1336_v6  ;;  %1467 = vrot.lane.b32.xlu0 %v5135_v50, %s6240_s18 }
 0x3c2   : > { %1435 = vrot.lane.b32.xlu1 %v5151_v8, %s6242_s20  ;;  %v1374_v12 = vmax.f32 %v1350_v11, %v1360_v3 }
 0x3c3   : > { %v1408_v14 = vpop.permute.xlu1 %1407  ;;  %v1384_v15 = vpop.permute.xlu0 %1383 }
 0x3c4   : > { %v1398_v16 = vmax.f32 %v1374_v12, %v1384_v15  ;;  %1471 = vrot.lane.b32.xlu0 %v5151_v8, %s6240_s18 }
 0x3c6   : > { %v5159_v17 = vmax.f32 %v1398_v16, %v1408_v14  ;;  %1453 = vrot.lane.b32.xlu1 %v5151_v8, %s4580_s25 }
 0x3c7   : > { %v1338_v23 = vpop.permute.xlu1 %1337  ;;  %v1314_v24 = vpop.permute.xlu0 %1313 }
 0x3c8   : > { %v1327_v25 = vmax.f32 %v5101_v20, %v1314_v24  ;;  %1437 = vrot.lane.b32.xlu0 %v5159_v17, %s6242_s20 }
 0x3ca   : > { %1489 = vrot.lane.b32.xlu1 %v5151_v8, %s4581_s15  ;;  %v1351_v26 = vmax.f32 %v1327_v25, %v1338_v23 }
 0x3cb   : > { %v1386_v27 = vpop.permute.xlu1 %1385  ;;  %v1362_v29 = vpop.permute.xlu0 %1361 }
 0x3cc   : > { %1455 = vrot.lane.b32.xlu0 %v5159_v17, %s4580_s25  ;;  %v1375_v30 = vmax.f32 %v1351_v26, %v1362_v29 }
 0x3ce   : > { %1507 = vrot.lane.b32.xlu1 %v5151_v8, %s4582_s22  ;;  %v1399_v37 = vmax.f32 %v1375_v30, %v1386_v27 }
 0x3cf   : > { %v1316_v31 = vpop.permute.xlu1 %1315  ;;  %v1340_v32 = vpop.permute.xlu0 %1339 }
 0x3d0   : > { %v1328_v34 = vmax.f32 %v5111_v22, %v1316_v31  ;;  %1491 = vrot.lane.b32.xlu0 %v5159_v17, %s4581_s15 }
 0x3d2   : > { %v1352_v36 = vmax.f32 %v1328_v34, %v1340_v32  ;;  %1473 = vrot.lane.b32.xlu1 %v5159_v17, %s6240_s18 }
 0x3d3   : > { %v1410_v38 = vpop.permute.xlu1 %1409  ;;  %v1364_v39 = vpop.permute.xlu0 %1363 }
 0x3d4   : > { %v5177_v41 = vmax.f32 %v1399_v37, %v1410_v38  ;;  %1509 = vrot.lane.b32.xlu0 %v5159_v17, %s4582_s22  ;;  %v1376_v42 = vmax.f32 %v1352_v36, %v1364_v39 }
 0x3d6   : > { %1439 = vrot.lane.b32.xlu1 %v5177_v41, %s6242_s20 }
 0x3d7   : > { %v1388_v44 = vpop.permute.xlu0 %1387  ;;  %v1412_v46 = vpop.permute.xlu1 %1411 }
 0x3d8   : > { %v1400_v45 = vmax.f32 %v1376_v42, %v1388_v44  ;;  %1475 = vrot.lane.b32.xlu0 %v5177_v41, %s6240_s18 }
 0x3da   : > { %v5185_v49 = vmax.f32 %v1400_v45, %v1412_v46  ;;  %1457 = vrot.lane.b32.xlu1 %v5177_v41, %s4580_s25 }
 0x3dc   : > { %1441 = vrot.lane.b32.xlu0 %v5185_v49, %s6242_s20 }
 0x3de   : > { %1493 = vrot.lane.b32.xlu1 %v5177_v41, %s4581_s15 }
 0x3e0   : > { %1459 = vrot.lane.b32.xlu0 %v5185_v49, %s4580_s25 }
 0x3e2   : > { %1511 = vrot.lane.b32.xlu1 %v5177_v41, %s4582_s22 }
 0x3e4   : > { %1495 = vrot.lane.b32.xlu0 %v5185_v49, %s4581_s15 }
 0x3e6   : > { %1477 = vrot.lane.b32.xlu1 %v5185_v49, %s6240_s18 }
 0x3ea   : > { %1513 = vrot.lane.b32.xlu1 %v5185_v49, %s4582_s22 }
 0x41e   : > { %v1434_v52 = vpop.permute.xlu0 %1433  ;;  %v1470_v56 = vpop.permute.xlu1 %1469 }
 0x41f   : > { %v1523_v58 = vsel %vm1521_vm6, %v5126_v35, %v1434_v52 }
 0x422   : > { %v1452_v53 = vpop.permute.xlu0 %1451 }
 0x423   : > { %v1530_v59 = vsel %vm1528_vm7, %v1523_v58, %v1452_v53 }
 0x424   : > { %v1537_v0 = vsel %vm1535_vm8, %v1530_v59, %v1470_v56 }
 0x426   : > { %v1488_v60 = vpop.permute.xlu0 %1487 }
 0x427   : > { %v1544_v1 = vsel %vm1542_vm9, %v1537_v0, %v1488_v60 }
 0x428   : > { %v1450_v62 = vpop.permute.xlu1 %1449 }
 0x42a   : > { %v1506_v3 = vpop.permute.xlu0 %1505 }
 0x42b   : > { %v1551_v6 = vsel %vm1549_vm10, %v1544_v1, %v1506_v3 }
 0x42c   : > { %v1557_v11 = vsub.f32 %v5053_v57, %v1551_v6  ;;  %v1486_v12 = vpop.permute.xlu1 %1485 }
 0x42e   : > { %v1564_v14 = vmul.f32 1.442695, %v1557_v11  ;;  %v1432_v15 = vpop.permute.xlu0 %1431 }
 0x42f   : > { %v1522_v35 = vsel %vm1521_vm6, %v5135_v50, %v1432_v15 }
 0x430   : > { %4454 = vpow2.f32 %v1564_v14  ;;  %v1504_v16 = vpop.permute.xlu1 %1503  ;;  %v1529_v23 = vsel %vm1528_vm7, %v1522_v35, %v1450_v62 }
 0x432   : > { %v1468_v24 = vpop.permute.xlu0 %1467 }
 0x433   : > { %v1536_v25 = vsel %vm1535_vm8, %v1529_v23, %v1468_v24 }
 0x434   : > { %v1543_v26 = vsel %vm1542_vm9, %v1536_v25, %v1486_v12  ;;  %v1436_v27 = vpop.permute.xlu1 %1435 }
 0x435   : > { %v1550_v29 = vsel %vm1549_vm10, %v1543_v26, %v1504_v16  ;;  %v1524_v36 = vsel %vm1521_vm6, %v5151_v8, %v1436_v27 }
 0x436   : > { %v1556_v57 = vsub.f32 %v5063_v10, %v1550_v29  ;;  %v1472_v30 = vpop.permute.xlu0 %1471 }
 0x438   : > { %v1562_v31 = vmul.f32 1.442695, %v1556_v57  ;;  %v1454_v32 = vpop.permute.xlu1 %1453 }
 0x439   : > { %v1531_v37 = vsel %vm1528_vm7, %v1524_v36, %v1454_v32 }
 0x43a   : > { %v5217_v34 = vpop.eup %4454  ;;  %4456 = vpow2.f32 %v1562_v31  ;;  %v1438_v50 = vpop.permute.xlu0 %1437  ;;  %v1538_v39 = vsel %vm1535_vm8, %v1531_v37, %v1472_v30 }
 0x43b   : > { %1630 = vrot.lane.b32.xlu1 %v5217_v34, %s4573_s28  ;;  %1582 = vrot.lane.b32.xlu0 %v5217_v34, %s4574_s29  ;;  %v1525_v52 = vsel %vm1521_vm6, %v5159_v17, %v1438_v50 }
 0x43c   : > { %v1490_v38 = vpop.permute.xlu1 %1489 }
 0x43d   : > { %v1545_v8 = vsel %vm1542_vm9, %v1538_v39, %v1490_v38 }
 0x43e   : > { %v1456_v10 = vpop.permute.xlu0 %1455 }
 0x43f   : > { %1678 = vrot.lane.b32.xlu1 %v5217_v34, %s4575_s30  ;;  %1606 = vrot.lane.b32.xlu0 %v5217_v34, %s4576_s11  ;;  %v1532_v56 = vsel %vm1528_vm7, %v1525_v52, %v1456_v10 }
 0x440   : > { %v1508_v42 = vpop.permute.xlu1 %1507 }
 0x441   : > { %v1552_v44 = vsel %vm1549_vm10, %v1545_v8, %v1508_v42 }
 0x442   : > { %v1558_v45 = vsub.f32 %v5077_v18, %v1552_v44  ;;  %v1492_v46 = vpop.permute.xlu0 %1491 }
 0x443   : > { %1654 = vrot.lane.b32.xlu0 %v5217_v34, %s4577_s12 }
 0x444   : > { %v5238_v53 = vpop.eup %4456  ;;  %v1566_v58 = vmul.f32 1.442695, %v1558_v45  ;;  %v1474_v59 = vpop.permute.xlu1 %1473 }
 0x445   : > { %v1539_v60 = vsel %vm1535_vm8, %v1532_v56, %v1474_v59  ;;  %1604 = vrot.lane.b32.xlu1 %v5238_v53, %s4576_s11 }
 0x446   : > { %4458 = vpow2.f32 %v1566_v58  ;;  %v1546_v18 = vsel %vm1542_vm9, %v1539_v60, %v1492_v46  ;;  %v1510_v62 = vpop.permute.xlu0 %1509 }
 0x447   : > { %v1553_v17 = vsel %vm1549_vm10, %v1546_v18, %v1510_v62  ;;  %1580 = vrot.lane.b32.xlu0 %v5238_v53, %s4574_s29 }
 0x448   : > { %v1559_v0 = vsub.f32 %v5087_v19, %v1553_v17  ;;  %v1440_v1 = vpop.permute.xlu1 %1439 }
 0x449   : > { %1628 = vrot.lane.b32.xlu1 %v5238_v53, %s4573_s28  ;;  %v1526_v12 = vsel %vm1521_vm6, %v5177_v41, %v1440_v1 }
 0x44a   : > { %v1568_v3 = vmul.f32 1.442695, %v1559_v0  ;;  %v1476_v6 = vpop.permute.xlu0 %1475 }
 0x44b   : > { %1676 = vrot.lane.b32.xlu0 %v5238_v53, %s4575_s30 }
 0x44c   : > { %v1458_v11 = vpop.permute.xlu1 %1457  ;;  %4460 = vpow2.f32 %v1568_v3 }
 0x44d   : > { %1652 = vrot.lane.b32.xlu1 %v5238_v53, %s4577_s12  ;;  %v1533_v19 = vsel %vm1528_vm7, %v1526_v12, %v1458_v11 }
 0x44e   : > { %v1442_v14 = vpop.permute.xlu0 %1441  ;;  %v1540_v16 = vsel %vm1535_vm8, %v1533_v19, %v1476_v6 }
 0x44f   : > { %v1527_v27 = vsel %vm1521_vm6, %v5185_v49, %v1442_v14 }
 0x450   : > { %v5257_v15 = vpop.eup %4458  ;;  %v1494_v35 = vpop.permute.xlu1 %1493 }
 0x451   : > { %1608 = vrot.lane.b32.xlu1 %v5257_v15, %s4576_s11  ;;  %1584 = vrot.lane.b32.xlu0 %v5257_v15, %s4574_s29  ;;  %v1547_v23 = vsel %vm1542_vm9, %v1540_v16, %v1494_v35  ;;  %v404_v35 = vld [vmem:[%s6235_s9 + $0x8] sm:$0xff]  ;;  %v407_v16 = vld [vmem:[%s6235_s9 + $0x20] sm:$0xff] }
 0x452   : > { %v1460_v25 = vpop.permute.xlu0 %1459 }
 0x453   : > { %v1534_v57 = vsel %vm1528_vm7, %v1527_v27, %v1460_v25  ;;  %v4189_v25 = vpack.c.bf16 %v407_v16, %v404_v35  ;;  %v405_v27 = vld [vmem:[%s6235_s9 + $0x10] sm:$0xff] }
 0x454   : > { %v1512_v24 = vpop.permute.xlu1 %1511 }
 0x455   : > { %v1554_v41 = vsel %vm1549_vm10, %v1547_v23, %v1512_v24  ;;  %1656 = vrot.lane.b32.xlu1 %v5257_v15, %s4577_s12  ;;  %1632 = vrot.lane.b32.xlu0 %v5257_v15, %s4573_s28 }
 0x456   : > { %v1560_v26 = vsub.f32 %v5101_v20, %v1554_v41  ;;  %v5274_v29 = vpop.eup %4460  ;;  %v1496_v50 = vpop.permute.xlu0 %1495  ;;  %v403_v41 = vld [vmem:[%s6235_s9] sm:$0xff]  ;;  %4190 = vmatprep.subr.bf16.mxu1 %v4189_v25 }
 0x458   : > { %v1570_v30 = vmul.f32 1.442695, %v1560_v26  ;;  %v1478_v31 = vpop.permute.xlu1 %1477  ;;  %v406_v26 = vld [vmem:[%s6235_s9 + $0x18] sm:$0xff] }
 0x459   : > { %v1541_v32 = vsel %vm1535_vm8, %v1534_v57, %v1478_v31  ;;  %1680 = vrot.lane.b32.xlu0 %v5257_v15, %s4575_s30  ;;  %1586 = vrot.lane.b32.xlu1 %v5274_v29, %s4574_s29  ;;  %v4191_v57 = vpack.c.bf16 %v406_v26, %v403_v41 }
 0x45a   : > { %4462 = vpow2.f32 %v1570_v30  ;;  %v1548_v36 = vsel %vm1542_vm9, %v1541_v32, %v1496_v50  ;;  %v408_v30 = vld [vmem:[%s6235_s9 + $0x28] sm:$0xff] }
 0x45b   : > { %v4201_v32 = vpack.c.bf16 %v408_v30, %v405_v27  ;;  %4192 = vmatpush1.bf16.msra.mxu1 %v4191_v57 }
 0x45c   : > { %v1514_v20 = vpop.permute.xlu1 %1513 }
 0x45d   : > { %v1555_v49 = vsel %vm1549_vm10, %v1548_v36, %v1514_v20  ;;  %1610 = vrot.lane.b32.xlu0 %v5274_v29, %s4576_s11  ;;  %1634 = vrot.lane.b32.xlu1 %v5274_v29, %s4573_s28  ;;  %v410_v36 = vld [vmem:[%s6235_s9 + $0x38] sm:$0xff] }
 0x45e   : > { %v1561_v37 = vsub.f32 %v5111_v22, %v1555_v49  ;;  %v413_v49 = vld [vmem:[%s6235_s9 + $0x50] sm:$0xff]  ;;  %4202 = vmatprep.subr.bf16.mxu0 %v4201_v32 }
 0x45f   : > { %4204 = vmatpush3.bf16.msra.mxu0 %v4201_v32 }
 0x460   : > { %v1572_v38 = vmul.f32 1.442695, %v1561_v37 }
 0x461   : > { %1658 = vrot.lane.b32.xlu0 %v5274_v29, %s4577_s12  ;;  %1682 = vrot.lane.b32.xlu1 %v5274_v29, %s4575_s30 }
 0x462   : > { %4464 = vpow2.f32 %v1572_v38  ;;  %v4193_v38 = vpack.c.bf16 %v413_v49, %v410_v36 }
 0x464   : > { %v5293_v10 = vpop.eup %4462  ;;  %4194 = vmatprep.subr.bf16.mxu1 %v4193_v38 }
 0x465   : > { %1612 = vrot.lane.b32.xlu1 %v5293_v10, %s4576_s11  ;;  %1588 = vrot.lane.b32.xlu0 %v5293_v10, %s4574_s29 }
 0x469   : > { %1660 = vrot.lane.b32.xlu1 %v5293_v10, %s4577_s12  ;;  %1636 = vrot.lane.b32.xlu0 %v5293_v10, %s4573_s28 }
 0x46c   : > { %v5303_v22 = vpop.eup %4464 }
 0x46d   : > { %1614 = vrot.lane.b32.xlu0 %v5303_v22, %s4576_s11  ;;  %1590 = vrot.lane.b32.xlu1 %v5303_v22, %s4574_s29 }
 0x471   : > { %1638 = vrot.lane.b32.xlu0 %v5303_v22, %s4573_s28  ;;  %1684 = vrot.lane.b32.xlu1 %v5293_v10, %s4575_s30 }
 0x475   : > { %1662 = vrot.lane.b32.xlu0 %v5303_v22, %s4577_s12  ;;  %1686 = vrot.lane.b32.xlu1 %v5303_v22, %s4575_s30  ;;  %s3448_s30 = sshll.u32 %s348_s26, 3 }
 0x4ad   : > { %v1631_v39 = vpop.permute.xlu1 %1630  ;;  %v1583_v8 = vpop.permute.xlu0 %1582 }
 0x4ae   : > { %v1599_v42 = vadd.f32 %v5217_v34, %v1583_v8  ;;  %v412_v8 = vld [vmem:[%s6235_s9 + $0x48] sm:$0xff] }
 0x4b1   : > { %v1607_v44 = vpop.permute.xlu0 %1606  ;;  %v1679_v46 = vpop.permute.xlu1 %1678 }
 0x4b2   : > { %v1623_v45 = vadd.f32 %v1607_v44, %v1599_v42  ;;  %v411_v42 = vld [vmem:[%s6235_s9 + $0x40] sm:$0xff] }
 0x4b4   : > { %v1647_v52 = vadd.f32 %v1631_v39, %v1623_v45  ;;  %v409_v39 = vld [vmem:[%s6235_s9 + $0x30] sm:$0xff]  ;;  %v414_v45 = vld [vmem:[%s6235_s9 + $0x58] sm:$0xff] }
 0x4b5   : > { %v1655_v56 = vpop.permute.xlu0 %1654  ;;  %v4195_v44 = vpack.c.bf16 %v412_v8, %v409_v39 }
 0x4b6   : > { %v1671_v58 = vadd.f32 %v1655_v56, %v1647_v52  ;;  %v4205_v52 = vpack.c.bf16 %v414_v45, %v411_v42 }
 0x4b7   : > { %v1605_v59 = vpop.permute.xlu1 %1604  ;;  %4196 = vmatpush1.bf16.msra.mxu1 %v4195_v44 }
 0x4b8   : > { %v1695_v60 = vadd.f32 %v1679_v46, %v1671_v58  ;;  %4206 = vmatprep.subr.bf16.mxu0 %v4205_v52 }
 0x4b9   : > { %v1581_v18 = vpop.permute.xlu0 %1580  ;;  %4208 = vmatpush3.bf16.msra.mxu0 %v4205_v52 }
 0x4ba   : > { %4466 = vrcp.f32 %v1695_v60  ;;  %v1598_v62 = vadd.f32 %v5238_v53, %v1581_v18  ;;  %v419_v60 = vld [vmem:[%s6235_s9 + $0x80] sm:$0xff] }
 0x4bb   : > { %v1629_v17 = vpop.permute.xlu1 %1628 }
 0x4bc   : > { %v1622_v0 = vadd.f32 %v1605_v59, %v1598_v62  ;;  %v416_v59 = vld [vmem:[%s6235_s9 + $0x68] sm:$0xff] }
 0x4bd   : > { %v1677_v3 = vpop.permute.xlu0 %1676  ;;  %v4197_v62 = vpack.c.bf16 %v419_v60, %v416_v59 }
 0x4be   : > { %v1646_v1 = vadd.f32 %v1629_v17, %v1622_v0  ;;  %v415_v17 = vld [vmem:[%s6235_s9 + $0x60] sm:$0xff]  ;;  %v418_v0 = vld [vmem:[%s6235_s9 + $0x78] sm:$0xff] }
 0x4bf   : > { %v1653_v6 = vpop.permute.xlu1 %1652  ;;  %4198 = vmatprep.subr.bf16.mxu1 %v4197_v62 }
 0x4c0   : > { %v1670_v11 = vadd.f32 %v1653_v6, %v1646_v1  ;;  %v417_v1 = vld [vmem:[%s6235_s9 + $0x70] sm:$0xff]  ;;  %v420_v6 = vld [vmem:[%s6235_s9 + $0x88] sm:$0xff] }
 0x4c2   : > { %v1694_v12 = vadd.f32 %v1677_v3, %v1670_v11  ;;  %v4199_v3 = vpack.c.bf16 %v418_v0, %v415_v17  ;;  %v2087_v0 = vld [vmem:[%s6230_s4 + $0x80] sm:$0xff] }
 0x4c3   : > { %v1609_v14 = vpop.permute.xlu1 %1608  ;;  %v1585_v19 = vpop.permute.xlu0 %1584 }
 0x4c4   : > { %v5325_v23 = vpop.eup %4466  ;;  %4468 = vrcp.f32 %v1694_v12  ;;  %v1600_v24 = vadd.f32 %v5257_v15, %v1585_v19  ;;  %4200 = vmatpush1.bf16.msra.mxu1 %v4199_v3 }
 0x4c5   : > { %1750 = vrot.lane.b32.xlu1 %v5325_v23, %s6240_s18  ;;  %1714 = vrot.lane.b32.xlu0 %v5325_v23, %s6242_s20  ;;  %s6250_s18 = smov 8   ;;  %s6251_s20 = smov 24  }
 0x4c6   : > { %v1624_v31 = vadd.f32 %v1609_v14, %v1600_v24  ;;  %v4209_v14 = vpack.c.bf16 %v420_v6, %v417_v1  ;;  %v2088_v1 = vld [vmem:[%s6230_s4 + $0x88] sm:$0xff]  ;;  %v2103_v6 = vld [vmem:[%s6230_s4 + $0x100] sm:$0xff] }
 0x4c7   : > { %v1657_v50 = vpop.permute.xlu1 %1656  ;;  %v1633_v20 = vpop.permute.xlu0 %1632  ;;  %v4213_v3 = vpack.c.bf16 %v2088_v1, %v2087_v0  ;;  %v2073_v0 = vld [vmem:[%s6230_s4 + $0x10] sm:$0xff]  ;;  %v2074_v1 = vld [vmem:[%s6230_s4 + $0x18] sm:$0xff] }
 0x4c8   : > { %v1648_v37 = vadd.f32 %v1633_v20, %v1624_v31  ;;  %4210 = vmatprep.subr.bf16.mxu0 %v4209_v14 }
 0x4c9   : > { %1732 = vrot.lane.b32.xlu0 %v5325_v23, %s4580_s25  ;;  %4212 = vmatpush3.bf16.msra.mxu0 %v4209_v14 }
 0x4ca   : > { %v1672_v46 = vadd.f32 %v1657_v50, %v1648_v37  ;;  %4214 = vmatprep.subr.bf16.mxu1 %v4213_v3 }
 0x4cb   : > { %v1587_v56 = vpop.permute.xlu1 %1586  ;;  %v1681_v58 = vpop.permute.xlu0 %1680 }
 0x4cc   : > { %v1696_v18 = vadd.f32 %v1681_v58, %v1672_v46  ;;  %v1601_v12 = vadd.f32 %v5274_v29, %v1587_v56 }
 0x4cd   : > { %1768 = vrot.lane.b32.xlu0 %v5325_v23, %s4581_s15 }
 0x4ce   : > { %v5384_v11 = vpop.eup %4468  ;;  %4470 = vrcp.f32 %v1696_v18 }
 0x4cf   : > { %v1635_v19 = vpop.permute.xlu1 %1634  ;;  %1730 = vrot.lane.b32.xlu1 %v5384_v11, %s4580_s25  ;;  %v1611_v35 = vpop.permute.xlu0 %1610 }
 0x4d0   : > { %v1625_v16 = vadd.f32 %v1611_v35, %v1601_v12  ;;  %v2104_v12 = vld [vmem:[%s6230_s4 + $0x108] sm:$0xff]  ;;  %v1035_v35 = vadd.f32 %v5039_v51, %v5002_v21 }
 0x4d1   : > { %1786 = vrot.lane.b32.xlu0 %v5325_v23, %s4582_s22  ;;  %v4245_v14 = vpack.c.bf16 %v2104_v12, %v2103_v6  ;;  %v2091_v6 = vld [vmem:[%s6230_s4 + $0xa0] sm:$0xff] }
 0x4d2   : > { %v1649_v24 = vadd.f32 %v1635_v19, %v1625_v16  ;;  %v1023_v19 = vadd.f32 %v5032_v43, %v5002_v21  ;;  %v1011_v16 = vadd.f32 %v5020_v33, %v5002_v21 }
 0x4d3   : > { %v1683_v25 = vpop.permute.xlu1 %1682  ;;  %1766 = vrot.lane.b32.xlu1 %v5384_v11, %s4581_s15  ;;  %v1659_v41 = vpop.permute.xlu0 %1658  ;;  %4246 = vmatprep.subr.bf16.mxu0 %v4245_v14 }
 0x4d4   : > { %v1673_v26 = vadd.f32 %v1659_v41, %v1649_v24 }
 0x4d5   : > { %1712 = vrot.lane.b32.xlu0 %v5384_v11, %s6250_s18 }
 0x4d6   : > { %v1697_v27 = vadd.f32 %v1683_v25, %v1673_v26 }
 0x4d7   : > { %v1613_v57 = vpop.permute.xlu1 %1612  ;;  %1784 = vrot.lane.b32.xlu1 %v5384_v11, %s4582_s22  ;;  %v1589_v30 = vpop.permute.xlu0 %1588 }
 0x4d8   : > { %4472 = vrcp.f32 %v1697_v27  ;;  %v1602_v31 = vadd.f32 %v5293_v10, %v1589_v30  ;;  %v5400_v32 = vpop.eup %4470 }
 0x4d9   : > { %1748 = vrot.lane.b32.xlu0 %v5384_v11, %s6251_s20 }
 0x4da   : > { %v1626_v50 = vadd.f32 %v1613_v57, %v1602_v31 }
 0x4db   : > { %v1661_v20 = vpop.permute.xlu1 %1660  ;;  %1716 = vrot.lane.b32.xlu1 %v5400_v32, %s6250_s18  ;;  %v1637_v36 = vpop.permute.xlu0 %1636 }
 0x4dc   : > { %v1650_v49 = vadd.f32 %v1637_v36, %v1626_v50 }
 0x4dd   : > { %1752 = vrot.lane.b32.xlu0 %v5400_v32, %s6251_s20 }
 0x4de   : > { %v1674_v44 = vadd.f32 %v1661_v20, %v1650_v49 }
 0x4df   : > { %v1591_v37 = vpop.permute.xlu1 %1590  ;;  %1734 = vrot.lane.b32.xlu1 %v5400_v32, %s4580_s25  ;;  %v1615_v38 = vpop.permute.xlu0 %1614 }
 0x4e0   : > { %v1603_v39 = vadd.f32 %v5303_v22, %v1591_v37 }
 0x4e2   : > { %v5409_v8 = vpop.eup %4472  ;;  %v1627_v42 = vadd.f32 %v1615_v38, %v1603_v39  ;;  %v2072_v38 = vld [vmem:[%s6230_s4 + $0x8] sm:$0xff] }
 0x4e3   : > { %v1685_v45 = vpop.permute.xlu1 %1684  ;;  %1770 = vrot.lane.b32.xlu1 %v5400_v32, %s4581_s15  ;;  %1718 = vrot.lane.b32.xlu0 %v5409_v8, %s6250_s18  ;;  %v1639_v46 = vpop.permute.xlu0 %1638 }
 0x4e4   : > { %v1698_v52 = vadd.f32 %v1685_v45, %v1674_v44  ;;  %v1651_v56 = vadd.f32 %v1639_v46, %v1627_v42  ;;  %v2090_v45 = vld [vmem:[%s6230_s4 + $0x98] sm:$0xff]  ;;  %v2105_v46 = vld [vmem:[%s6230_s4 + $0x110] sm:$0xff] }
 0x4e6   : > { %4474 = vrcp.f32 %v1698_v52  ;;  %v2106_v52 = vld [vmem:[%s6230_s4 + $0x118] sm:$0xff] }
 0x4e7   : > { %1788 = vrot.lane.b32.xlu1 %v5400_v32, %s4582_s22  ;;  %1736 = vrot.lane.b32.xlu0 %v5409_v8, %s4580_s25  ;;  %v1663_v58 = vpop.permute.xlu0 %1662  ;;  %v1687_v60 = vpop.permute.xlu1 %1686  ;;  %v4249_v3 = vpack.c.bf16 %v2106_v52, %v2105_v46 }
 0x4e8   : > { %v1675_v59 = vadd.f32 %v1663_v58, %v1651_v56 }
 0x4ea   : > { %v1699_v18 = vadd.f32 %v1687_v60, %v1675_v59 }
 0x4eb   : > { %1754 = vrot.lane.b32.xlu1 %v5409_v8, %s6251_s20  ;;  %1772 = vrot.lane.b32.xlu0 %v5409_v8, %s4581_s15 }
 0x4ec   : > { %4476 = vrcp.f32 %v1699_v18 }
 0x4ef   : > { %1790 = vrot.lane.b32.xlu0 %v5409_v8, %s4582_s22 }
 0x4f0   : > { %v5425_v62 = vpop.eup %4474 }
 0x4f1   : > { %1720 = vrot.lane.b32.xlu1 %v5425_v62, %s6250_s18 }
 0x4f3   : > { %1756 = vrot.lane.b32.xlu0 %v5425_v62, %s6251_s20 }
 0x4f5   : > { %1738 = vrot.lane.b32.xlu1 %v5425_v62, %s4580_s25 }
 0x4f6   : > { %v5433_v17 = vpop.eup %4476 }
 0x4f7   : > { %1722 = vrot.lane.b32.xlu0 %v5433_v17, %s6250_s18 }
 0x4f9   : > { %1774 = vrot.lane.b32.xlu1 %v5425_v62, %s4581_s15 }
 0x4fb   : > { %1740 = vrot.lane.b32.xlu0 %v5433_v17, %s4580_s25  ;;  %s6252_s25 = smov 64  }
 0x4fd   : > { %1792 = vrot.lane.b32.xlu1 %v5425_v62, %s4582_s22 }
 0x4ff   : > { %1776 = vrot.lane.b32.xlu0 %v5433_v17, %s4581_s15  ;;  %s350_s15 = scalar_lea.vmem [#allocation2], %s3448_s30 }
 0x501   : > { %1758 = vrot.lane.b32.xlu1 %v5433_v17, %s6251_s20 }
 0x503   : > { %1057 = vrot.lane.b32.xlu0 %v1023_v19, %s6252_s25 }
 0x505   : > { %1794 = vrot.lane.b32.xlu1 %v5433_v17, %s4582_s22  ;;  %s3385_s22 = sshll.u32 %s350_s15, 4  ;;  %s6186_s22 = int_to_ptr.vmem [resolvable:$true] %s3385_s22 }
 0x506   : > { %s4504_s28 = scalar_lea.vmem %s6186_s22, 128 }
 0x507   : > { %1061 = vrot.lane.b32.xlu0 %v1035_v35, %s6252_s25  ;;  %v2108_v35 = vld [vmem:[%s6230_s4 + $0x128] sm:$0xff]  ;;  %p4505_p11 = scmp.ne.s32.totalorder %s6186_s22, %s4504_s28 }
 0x509   : > { %1053 = vrot.lane.b32.xlu1 %v1011_v16, %s6252_s25  ;;  %v4219_v16 = vpack.c.bf16 %v2074_v1, %v2073_v0  ;;  %s3545_s25 = sshll.u32 %s4661_s17, 7  ;;  %p4506_p12 = pnand %p4505_p11, %p4678_p5 }
 0x50a   : > { %s6184_s21 = scalar_lea.hbm %s6236_s10, %s3545_s25  ;;  %s4584_s17 = smov [#allocation2]  }
 0x50b   : > { %p4507_p13 = pneg %p4506_p12  ;;  %s4508_s29 = sshll.u32 %s4584_s17, 4  ;;  %s4509_s29 = int_to_ptr.vmem [resolvable:$false] %s4508_s29 }
 0x50c   : > { %s4510_s30 = scalar_lea.vmem %s4509_s29, 256  ;;  %p4511_p0 = scmp.lt.s32.totalorder %s6186_s22, %s4509_s29 }
 0x50d   : > { %p4512_p1 = scmp.lt.s32.totalorder %s4510_s30, %s4504_s28 }
 0x50f   : > { %p4513_p2 = por %p4512_p1, %p4511_p0 }
 0x511   : > { %p4514_p3 = pnand %p4513_p2, %p4507_p13 }
 0x537   : > { %v1715_v24 = vpop.permute.xlu0 %1714  ;;  %v1751_v25 = vpop.permute.xlu1 %1750 }
 0x538   : > { %v1803_v51 = vsel %vm1521_vm6, %v5325_v23, %v1715_v24  ;;  %v2071_v23 = vld [vmem:[%s6230_s4] sm:$0xff] }
 0x539   : > { %v4215_v59 = vpack.c.bf16 %v2072_v38, %v2071_v23 }
 0x53b   : > { %v1733_v43 = vpop.permute.xlu0 %1732 }
 0x53c   : > { %v1809_v31 = vsel %vm1528_vm7, %v1803_v51, %v1733_v43  ;;  %v2094_v51 = vld [vmem:[%s6230_s4 + $0xb8] sm:$0xff] }
 0x53d   : > { %v1815_v50 = vsel %vm1535_vm8, %v1809_v31, %v1751_v25  ;;  %v2075_v25 = vld [vmem:[%s6230_s4 + $0x20] sm:$0xff]  ;;  %v2110_v31 = vld [vmem:[%s6230_s4 + $0x138] sm:$0xff] }
 0x53f   : > { %v1769_v41 = vpop.permute.xlu0 %1768 }
 0x540   : > { %v1821_v49 = vsel %vm1542_vm9, %v1815_v50, %v1769_v41  ;;  %v2076_v41 = vld [vmem:[%s6230_s4 + $0x28] sm:$0xff] }
 0x541   : > { %v1731_v26 = vpop.permute.xlu1 %1730 }
 0x543   : > { %v1787_v27 = vpop.permute.xlu0 %1786 }
 0x544   : > { %v1827_v39 = vsel %vm1549_vm10, %v1821_v49, %v1787_v27 }
 0x545   : > { %v1767_v57 = vpop.permute.xlu1 %1766  ;;  %v1833_v60 = vmul.f32 %v5217_v34, %v1827_v39  ;;  %v2092_v34 = vld [vmem:[%s6230_s4 + $0xa8] sm:$0xff] }
 0x546   : > { %v4221_v43 = vpack.c.bf16 %v2092_v34, %v2091_v6  ;;  %v2096_v39 = vld [vmem:[%s6230_s4 + $0xc8] sm:$0xff]  ;;  %v2113_v6 = vld [vmem:[%s6230_s4 + $0x150] sm:$0xff] }
 0x547   : > { %v1713_v30 = vpop.permute.xlu0 %1712 }
 0x548   : > { %v1802_v21 = vsel %vm1521_vm6, %v5384_v11, %v1713_v30  ;;  %v2089_v11 = vld [vmem:[%s6230_s4 + $0x90] sm:$0xff] }
 0x549   : > { %v1785_v33 = vpop.permute.xlu1 %1784  ;;  %v1808_v20 = vsel %vm1528_vm7, %v1802_v21, %v1731_v26  ;;  %v4217_v18 = vpack.c.bf16 %v2090_v45, %v2089_v11  ;;  %v2109_v30 = vld [vmem:[%s6230_s4 + $0x130] sm:$0xff]  ;;  %v4223_v21 = vpack.c.bf16 %v2076_v41, %v2075_v25 }
 0x54a   : > { %v4257_v49 = vpack.c.bf16 %v2110_v31, %v2109_v30 }
 0x54b   : > { %v1749_v36 = vpop.permute.xlu0 %1748 }
 0x54c   : > { %v1814_v37 = vsel %vm1535_vm8, %v1808_v20, %v1749_v36  ;;  %v2077_v20 = vld [vmem:[%s6230_s4 + $0x30] sm:$0xff]  ;;  %v2078_v36 = vld [vmem:[%s6230_s4 + $0x38] sm:$0xff] }
 0x54d   : > { %v1820_v42 = vsel %vm1542_vm9, %v1814_v37, %v1767_v57  ;;  %v1717_v44 = vpop.permute.xlu1 %1716  ;;  %v2095_v37 = vld [vmem:[%s6230_s4 + $0xc0] sm:$0xff]  ;;  %v4227_v52 = vpack.c.bf16 %v2078_v36, %v2077_v20 }
 0x54e   : > { %v1826_v56 = vsel %vm1549_vm10, %v1820_v42, %v1785_v33  ;;  %v1804_v24 = vsel %vm1521_vm6, %v5400_v32, %v1717_v44  ;;  %v2111_v42 = vld [vmem:[%s6230_s4 + $0x140] sm:$0xff]  ;;  %v2112_v44 = vld [vmem:[%s6230_s4 + $0x148] sm:$0xff] }
 0x54f   : > { %v1832_v58 = vmul.f32 %v5238_v53, %v1826_v56  ;;  %v1753_v12 = vpop.permute.xlu0 %1752  ;;  %v2107_v53 = vld [vmem:[%s6230_s4 + $0x120] sm:$0xff] }
 0x550   : > { %v4253_v26 = vpack.c.bf16 %v2108_v35, %v2107_v53  ;;  %v2081_v35 = vld [vmem:[%s6230_s4 + $0x50] sm:$0xff] }
 0x551   : > { %v1735_v19 = vpop.permute.xlu1 %1734  ;;  %3479 = vmatmul.mubr.msk.f32.vlgmr.msra.gmra.mrb[16].mxu1 %vm1838_vm11, %v1832_v58  ;;  %3921 = vmatprep.mubr.msk.f32.mxu0 %vm1838_vm11, %v1832_v58  ;;  %v4229_v58 = vpack.c.bf16 %v2096_v39, %v2095_v37 }
 0x552   : > { %3922 = vmatmul.mubr.msk.f32.vlgmr.msra.gmra.mrb[26].mxu0 %vm1838_vm11, %v1833_v60  ;;  %1927 = vmatprep.mubr.f32.mxu1 %v4571_v5  ;;  %v1810_v27 = vsel %vm1528_vm7, %v1804_v24, %v1735_v19 }
 0x553   : > { %4216 = vmatpush3.bf16.msra.mxu1 %v4215_v59  ;;  %4248 = vmatpush3.bf16.msra.mxu0 %v4245_v14  ;;  %v2093_v14 = vld [vmem:[%s6230_s4 + $0xb0] sm:$0xff]  ;;  %v1816_v33 = vsel %vm1535_vm8, %v1810_v27, %v1753_v12  ;;  %v2079_v59 = vld [vmem:[%s6230_s4 + $0x40] sm:$0xff]  ;;  %v2114_v12 = vld [vmem:[%s6230_s4 + $0x158] sm:$0xff] }
 0x554   : > { %4218 = vmatprep.subr.bf16.mxu1 %v4217_v18  ;;  %4250 = vmatprep.subr.bf16.mxu0 %v4249_v3  ;;  %v4225_v50 = vpack.c.bf16 %v2094_v51, %v2093_v14  ;;  %v4261_v18 = vpack.c.bf16 %v2112_v44, %v2111_v42  ;;  %v4265_v24 = vpack.c.bf16 %v2114_v12, %v2113_v6  ;;  %v2115_v14 = vld [vmem:[%s6230_s4 + $0x160] sm:$0xff]  ;;  %v2116_v27 = vld [vmem:[%s6230_s4 + $0x168] sm:$0xff]  ;;  %v2118_v12 = vld [vmem:[%s6230_s4 + $0x178] sm:$0xff] }
 0x555   : > { %v1771_v57 = vpop.permute.xlu1 %1770  ;;  %3480 = vmatmul.mubr.msk.f32.gmra.mrb[18].mxu1 %vm1838_vm11, %v1833_v60  ;;  %v1719_v32 = vpop.permute.xlu0 %1718  ;;  %v2080_v60 = vld [vmem:[%s6230_s4 + $0x48] sm:$0xff] }
 0x556   : > { %1933 = vmatprep.mubr.f32.mxu1 %v4571_v5  ;;  %v1822_v23 = vsel %vm1542_vm9, %v1816_v33, %v1771_v57  ;;  %v1805_v56 = vsel %vm1521_vm6, %v5409_v8, %v1719_v32  ;;  %v4231_v34 = vpack.c.bf16 %v2080_v60, %v2079_v59  ;;  %v2084_v33 = vld [vmem:[%s6230_s4 + $0x68] sm:$0xff] }
 0x557   : > { %4220 = vmatpush3.bf16.msra.mxu1 %v4219_v16  ;;  %4252 = vmatpush3.bf16.msra.mxu0 %v4249_v3  ;;  %v2098_v3 = vld [vmem:[%s6230_s4 + $0xd8] sm:$0xff] }
 0x558   : > { %4222 = vmatprep.subr.bf16.mxu1 %v4221_v43  ;;  %4254 = vmatprep.subr.bf16.mxu0 %v4253_v26  ;;  %v2082_v16 = vld [vmem:[%s6230_s4 + $0x58] sm:$0xff]  ;;  %v2099_v43 = vld [vmem:[%s6230_s4 + $0xe0] sm:$0xff] }
 0x559   : > { %v1789_v38 = vpop.permute.xlu1 %1788  ;;  %v1737_v11 = vpop.permute.xlu0 %1736  ;;  %v4235_v30 = vpack.c.bf16 %v2082_v16, %v2081_v35 }
 0x55a   : > { %v1828_v45 = vsel %vm1549_vm10, %v1822_v23, %v1789_v38  ;;  %v1811_v0 = vsel %vm1528_vm7, %v1805_v56, %v1737_v11 }
 0x55b   : > { %v1834_v46 = vmul.f32 %v5257_v15, %v1828_v45  ;;  %4224 = vmatpush3.bf16.msra.mxu1 %v4223_v21  ;;  %4256 = vmatpush3.bf16.msra.mxu0 %v4253_v26  ;;  %v2097_v15 = vld [vmem:[%s6230_s4 + $0xd0] sm:$0xff]  ;;  %v2100_v26 = vld [vmem:[%s6230_s4 + $0xe8] sm:$0xff]  ;;  %v2083_v21 = vld [vmem:[%s6230_s4 + $0x60] sm:$0xff] }
 0x55c   : > { %4226 = vmatprep.subr.bf16.mxu1 %v4225_v50  ;;  %4258 = vmatprep.subr.bf16.mxu0 %v4257_v49  ;;  %v4233_v53 = vpack.c.bf16 %v2098_v3, %v2097_v15  ;;  %v4237_v31 = vpack.c.bf16 %v2100_v26, %v2099_v43  ;;  %v4269_v50 = vpack.c.bf16 %v2116_v27, %v2115_v14  ;;  %v2117_v3 = vld [vmem:[%s6230_s4 + $0x170] sm:$0xff] }
 0x55d   : > { %v1755_v1 = vpop.permute.xlu1 %1754  ;;  %3481 = vmatmul.mubr.msk.f32.gmra.mrb[20].mxu1 %vm1838_vm11, %v1834_v46  ;;  %3924 = vmatprep.mubr.msk.f32.mxu0 %vm1838_vm11, %v1834_v46  ;;  %v1773_v8 = vpop.permute.xlu0 %1772  ;;  %v4239_v36 = vpack.c.bf16 %v2084_v33, %v2083_v21 }
 0x55e   : > { %v1817_v19 = vsel %vm1535_vm8, %v1811_v0, %v1755_v1  ;;  %1939 = vmatprep.mubr.f32.mxu1 %v4571_v5  ;;  %v2102_v0 = vld [vmem:[%s6230_s4 + $0xf8] sm:$0xff] }
 0x55f   : > { %4228 = vmatpush3.bf16.msra.mxu1 %v4227_v52  ;;  %4260 = vmatpush3.bf16.msra.mxu0 %v4257_v49  ;;  %v1823_v25 = vsel %vm1542_vm9, %v1817_v19, %v1773_v8  ;;  %v2085_v8 = vld [vmem:[%s6230_s4 + $0x70] sm:$0xff]  ;;  %v4273_v19 = vpack.c.bf16 %v2118_v12, %v2117_v3 }
 0x560   : > { %4230 = vmatprep.subr.bf16.mxu1 %v4229_v58  ;;  %4262 = vmatprep.subr.bf16.mxu0 %v4261_v18 }
 0x561   : > { %v1791_v41 = vpop.permute.xlu0 %1790 }
 0x562   : > { %v1829_v57 = vsel %vm1549_vm10, %v1823_v25, %v1791_v41 }
 0x563   : > { %v1835_v32 = vmul.f32 %v5274_v29, %v1829_v57  ;;  %v1721_v51 = vpop.permute.xlu1 %1720  ;;  %4232 = vmatpush3.bf16.msra.mxu1 %v4231_v34  ;;  %4264 = vmatpush3.bf16.msra.mxu0 %v4261_v18 }
 0x564   : > { %4234 = vmatprep.subr.bf16.mxu1 %v4233_v53  ;;  %4266 = vmatprep.subr.bf16.mxu0 %v4265_v24  ;;  %v1806_v49 = vsel %vm1521_vm6, %v5425_v62, %v1721_v51 }
 0x565   : > { %3482 = vmatmul.mubr.msk.f32.gmra.mrb[22].mxu1 %vm1838_vm11, %v1835_v32  ;;  %3925 = vmatmul.mubr.msk.f32.gmra.mrb[28].mxu0 %vm1838_vm11, %v1835_v32  ;;  %v1757_v29 = vpop.permute.xlu0 %1756 }
 0x566   : > { %1945 = vmatprep.mubr.f32.mxu1 %v4571_v5 }
 0x567   : > { %v1739_v20 = vpop.permute.xlu1 %1738  ;;  %4236 = vmatpush3.bf16.msra.mxu1 %v4235_v30  ;;  %4268 = vmatpush3.bf16.msra.mxu0 %v4265_v24 }
 0x568   : > { %4238 = vmatprep.subr.bf16.mxu1 %v4237_v31  ;;  %4270 = vmatprep.subr.bf16.mxu0 %v4269_v50  ;;  %v1812_v23 = vsel %vm1528_vm7, %v1806_v49, %v1739_v20 }
 0x569   : > { %v1723_v37 = vpop.permute.xlu0 %1722  ;;  %v1818_v11 = vsel %vm1535_vm8, %v1812_v23, %v1757_v29 }
 0x56a   : > { %v1807_v52 = vsel %vm1521_vm6, %v5433_v17, %v1723_v37  ;;  %v2101_v17 = vld [vmem:[%s6230_s4 + $0xf0] sm:$0xff] }
 0x56b   : > { %v1775_v38 = vpop.permute.xlu1 %1774  ;;  %4240 = vmatpush3.bf16.msra.mxu1 %v4239_v36  ;;  %4272 = vmatpush3.bf16.msra.mxu0 %v4269_v50  ;;  %v4241_v1 = vpack.c.bf16 %v2102_v0, %v2101_v17  ;;  %v2119_v0 = vld [vmem:[%s6228_s2 + $0x10] ss:$0 sm:$0xff] }
 0x56c   : > { %v1824_v39 = vsel %vm1542_vm9, %v1818_v11, %v1775_v38  ;;  %4274 = vmatprep.subr.bf16.mxu0 %v4273_v19 }
 0x56d   : > { %v1741_v44 = vpop.permute.xlu0 %1740  ;;  %4242 = vmatprep.subr.bf16.mxu1 %v4241_v1 }
 0x56e   : > { %v1813_v62 = vsel %vm1528_vm7, %v1807_v52, %v1741_v44 }
 0x56f   : > { %v1793_v42 = vpop.permute.xlu1 %1792  ;;  %4276 = vmatpush3.bf16.msra.mxu0 %v4273_v19 }
 0x570   : > { %v1830_v45 = vsel %vm1549_vm10, %v1824_v39, %v1793_v42 }
 0x571   : > { %v1836_v46 = vmul.f32 %v5293_v10, %v1830_v45  ;;  %v1777_v59 = vpop.permute.xlu0 %1776 }
 0x573   : > { %v1759_v56 = vpop.permute.xlu1 %1758  ;;  %3483 = vmatmul.mubr.msk.f32.gmra.mrb[24].mxu1 %vm1838_vm11, %v1836_v46  ;;  %3927 = vmatprep.mubr.msk.f32.mxu0 %vm1838_vm11, %v1836_v46 }
 0x574   : > { %v1819_v58 = vsel %vm1535_vm8, %v1813_v62, %v1759_v56  ;;  %1951 = vmatprep.mubr.f32.mxu1 %v4571_v5 }
 0x575   : > { %v1825_v18 = vsel %vm1542_vm9, %v1819_v58, %v1777_v59  ;;  %v1058_v34 = vpop.permute.xlu0 %1057 }
 0x576   : > { %v1065_v43 = vsel %vm917_vm5, %v5029_v40, %v1058_v34 }
 0x577   : > { %v1795_v60 = vpop.permute.xlu1 %1794 }
 0x578   : > { %v1831_v10 = vsel %vm1549_vm10, %v1825_v18, %v1795_v60 }
 0x579   : > { %v1837_v15 = vmul.f32 %v5303_v22, %v1831_v10  ;;  %v2086_v22 = vld [vmem:[%s6230_s4 + $0x78] sm:$0xff]  ;;  %v1062_v35 = vpop.permute.xlu0 %1061 }
 0x57a   : > { %v4243_v6 = vpack.c.bf16 %v2086_v22, %v2085_v8  ;;  %v1066_v25 = vsel %vm917_vm5, %v5036_v47, %v1062_v35 }
 0x57b   : > { %3484 = vmatmul.mubr.msk.f32.gmra.mrb[26].mxu1 %vm1838_vm11, %v1837_v15  ;;  %3928 = vmatmul.mubr.msk.f32.gmra.mrb[30].mxu0 %vm1838_vm11, %v1837_v15  ;;  %v1054_v53 = vpop.permute.xlu1 %1053 }
 0x57c   : > { %4244 = vmatpush3.bf16.msra.mxu1 %v4243_v6  ;;  %v1064_v16 = vsel %vm917_vm5, %v5011_v28, %v1054_v53 }
 0x624   : > { %v1923_v24 = vpop.f32.mrb[16].mxu1 }
 0x625   : > { %v2053_v41 = vmul.f32 %v1923_v24, %v1064_v16  ;;  %v1925_v26 = vpop.f32.mrb[17].mxu1  ;;  %v3923_v14 = vpop.f32.mrb[26].mxu0 }
 0x626   : > { %v2054_v27 = vmul.f32 %v1925_v26, %v1065_v43  ;;  %v2058_v57 = vmul.f32 %v3923_v14, %v1066_v25  ;;  %v2024_v32 = vpop.f32.mrb[27].mxu0 }
 0x627   : > { %v2055_v51 = vmul.f32 %v2024_v32, %v1066_v25 }
 0x628   : > { %v1929_v30 = vpop.f32.mrb[18].mxu1  ;;  %2184 = vmatprep.mubr.f32.mxu1 %v2054_v27 }
 0x629   : > { %v2056_v31 = vmul.f32 %v1929_v30, %v1064_v16  ;;  %v1931_v21 = vpop.f32.mrb[19].mxu1  ;;  %2185 = vmatmul.mubr.f32.vlgmr.msra.gmra.mrb[28].mxu1 %v2053_v41  ;;  %3962 = vmatprep.mubr.f32.mxu0 %v2055_v51 }
 0x62a   : > { %v2057_v28 = vmul.f32 %v1931_v21, %v1065_v43  ;;  %3963 = vmatmul.mubr.f32.vlgmr.msra.gmra.mrb[32].mxu0 %v2058_v57 }
 0x62c   : > { %2189 = vmatprep.mubr.f32.mxu1 %v2057_v28 }
 0x62d   : > { %2190 = vmatmul.mubr.f32.gmra.mrb[30].mxu1 %v2056_v31 }
 0x630   : > { %v1935_v40 = vpop.f32.mrb[20].mxu1 }
 0x631   : > { %v2059_v33 = vmul.f32 %v1935_v40, %v1064_v16  ;;  %v1937_v47 = vpop.f32.mrb[21].mxu1 }
 0x632   : > { %v2060_v50 = vmul.f32 %v1937_v47, %v1065_v43 }
 0x634   : > { %2194 = vmatprep.mubr.f32.mxu1 %v2060_v50 }
 0x635   : > { %2195 = vmatmul.mubr.f32.gmra.mrb[32].mxu1 %v2059_v33 }
 0x638   : > { %v1941_v29 = vpop.f32.mrb[22].mxu1  ;;  %v3926_v20 = vpop.f32.mrb[28].mxu0 }
 0x639   : > { %v2062_v36 = vmul.f32 %v1941_v29, %v1064_v16  ;;  %v2064_v49 = vmul.f32 %v3926_v20, %v1066_v25  ;;  %v1943_v37 = vpop.f32.mrb[23].mxu1  ;;  %v2034_v23 = vpop.f32.mrb[29].mxu0 }
 0x63a   : > { %v2063_v38 = vmul.f32 %v1943_v37, %v1065_v43  ;;  %v2061_v11 = vmul.f32 %v2034_v23, %v1066_v25 }
 0x63c   : > { %2199 = vmatprep.mubr.f32.mxu1 %v2063_v38  ;;  %3965 = vmatprep.mubr.f32.mxu0 %v2061_v11 }
 0x63d   : > { %2200 = vmatmul.mubr.f32.gmra.mrb[34].mxu1 %v2062_v36  ;;  %3966 = vmatmul.mubr.f32.gmra.mrb[34].mxu0 %v2064_v49 }
 0x646   : > { %v1947_v39 = vpop.f32.mrb[24].mxu1 }
 0x647   : > { %v2065_v42 = vmul.f32 %v1947_v39, %v1064_v16  ;;  %v1949_v44 = vpop.f32.mrb[25].mxu1 }
 0x648   : > { %v2066_v45 = vmul.f32 %v1949_v44, %v1065_v43 }
 0x64a   : > { %2204 = vmatprep.mubr.f32.mxu1 %v2066_v45 }
 0x64b   : > { %2205 = vmatmul.mubr.f32.gmra.mrb[36].mxu1 %v2065_v42 }
 0x64e   : > { %v1953_v46 = vpop.f32.mrb[26].mxu1  ;;  %v3929_v52 = vpop.f32.mrb[30].mxu0 }
 0x64f   : > { %v2068_v62 = vmul.f32 %v1953_v46, %v1064_v16  ;;  %v2070_v56 = vmul.f32 %v3929_v52, %v1066_v25  ;;  %v1955_v58 = vpop.f32.mrb[27].mxu1  ;;  %v2044_v59 = vpop.f32.mrb[31].mxu0 }
 0x650   : > { %v2069_v60 = vmul.f32 %v1955_v58, %v1065_v43  ;;  %v2067_v18 = vmul.f32 %v2044_v59, %v1066_v25 }
 0x652   : > { %2209 = vmatprep.mubr.f32.mxu1 %v2069_v60  ;;  %3968 = vmatprep.mubr.f32.mxu0 %v2067_v18 }
 0x653   : > { %2210 = vmatmul.mubr.f32.gmra.mrb[38].mxu1 %v2068_v62  ;;  %3969 = vmatmul.mubr.f32.gmra.mrb[36].mxu0 %v2070_v56 }
 0x654   : > { %2520 = vmatprep.mubr.f32.mxu0 %v4571_v5 }
 0x6fc   : > { %v3682_v10 = vpop.f32.mrb[28].mxu1 }
 0x6fd   : > { %v3683_v15 = vpop.f32.mrb[29].mxu1  ;;  %v3964_v17 = vpop.f32.mrb[32].mxu0 }
 0x6fe   : > { %v3684_v1 = vadd.f32 %v3683_v15, %v3682_v10  ;;  %v2281_v8 = vpop.f32.mrb[33].mxu0 }
 0x700   : > { %v2187_v22 = vadd.f32 %v3684_v1, %v2119_v0  ;;  %v3685_v3 = vpop.f32.mrb[30].mxu1 }
 0x701   : > { %v3686_v6 = vpop.f32.mrb[31].mxu1 }
 0x702   : > { %v2282_v12 = vadd.f32 %v2281_v8, %v2187_v22  ;;  %v3687_v19 = vadd.f32 %v3686_v6, %v3685_v3 }
 0x704   : > { %v2310_v34 = vadd.f32 %v2282_v12, %v4821_v48  ;;  %v2192_v53 = vadd.f32 %v3687_v19, %v2119_v0  ;;  %v2410_v12 = vld [vmem:[%s6231_s5 + $0x8] sm:$0xff]  ;;  %v2412_v19 = vld [vmem:[%s6231_s5 + $0x18] sm:$0xff] }
 0x706   : > { %v2287_v35 = vadd.f32 %v3964_v17, %v2192_v53  ;;  %v2318_v16 = vsel %vm917_vm5, %v2310_v34, 0.0  ;;  %v2409_v53 = vld [vmem:[%s6231_s5] sm:$0xff] }
 0x707   : > { %2319 = vadd.xlane.f32.xlu1 %v2318_v16 }
 0x708   : > { %v3688_v24 = vpop.f32.mrb[32].mxu1  ;;  %v2311_v43 = vadd.f32 %v2287_v35, %v4829_v54  ;;  %v2411_v35 = vld [vmem:[%s6231_s5 + $0x10] sm:$0xff] }
 0x709   : > { %v3689_v25 = vpop.f32.mrb[33].mxu1 }
 0x70a   : > { %v3690_v41 = vadd.f32 %v3689_v25, %v3688_v24  ;;  %v2321_v26 = vsel %vm917_vm5, %v2311_v43, 0.0  ;;  %v4279_v24 = vpack.c.bf16 %v2411_v35, %v2409_v53  ;;  %v2416_v25 = vld [vmem:[%s6231_s5 + $0x38] sm:$0xff]  ;;  %v2593_v53 = vld [vmem:[%s6232_s6 + $0xc0] sm:$0xff]  ;;  %v2594_v35 = vld [vmem:[%s6232_s6 + $0xc8] sm:$0xff] }
 0x70b   : > { %2322 = vadd.xlane.f32.xlu0 %v2321_v26  ;;  %v2413_v26 = vld [vmem:[%s6231_s5 + $0x20] sm:$0xff] }
 0x70c   : > { %v2197_v57 = vadd.f32 %v3690_v41, %v2119_v0 }
 0x710   : > { %v3691_v14 = vpop.f32.mrb[34].mxu1  ;;  %v3967_v27 = vpop.f32.mrb[34].mxu0 }
 0x711   : > { %v3692_v32 = vpop.f32.mrb[35].mxu1  ;;  %v2291_v51 = vpop.f32.mrb[35].mxu0 }
 0x712   : > { %v3693_v30 = vadd.f32 %v3692_v32, %v3691_v14  ;;  %v2292_v48 = vadd.f32 %v2291_v51, %v2197_v57  ;;  %v2415_v14 = vld [vmem:[%s6231_s5 + $0x30] sm:$0xff]  ;;  %v2418_v57 = vld [vmem:[%s6231_s5 + $0x48] sm:$0xff]  ;;  %v2420_v32 = vld [vmem:[%s6231_s5 + $0x58] sm:$0xff] }
 0x713   : > { %v4285_v51 = vpack.c.bf16 %v2420_v32, %v2418_v57  ;;  %v2579_v57 = vld [vmem:[%s6232_s6 + $0x50] sm:$0xff]  ;;  %v2580_v32 = vld [vmem:[%s6232_s6 + $0x58] sm:$0xff] }
 0x714   : > { %v2202_v31 = vadd.f32 %v3693_v30, %v2119_v0  ;;  %v2312_v21 = vadd.f32 %v2292_v48, %v4840_v61  ;;  %v2417_v30 = vld [vmem:[%s6231_s5 + $0x40] sm:$0xff]  ;;  %v2419_v48 = vld [vmem:[%s6231_s5 + $0x50] sm:$0xff] }
 0x716   : > { %v2297_v28 = vadd.f32 %v3967_v27, %v2202_v31  ;;  %v2324_v40 = vsel %vm917_vm5, %v2312_v21, 0.0  ;;  %v4283_v27 = vpack.c.bf16 %v2415_v14, %v2413_v26  ;;  %v4287_v31 = vpack.c.bf16 %v2419_v48, %v2417_v30  ;;  %v2596_v26 = vld [vmem:[%s6232_s6 + $0xd8] sm:$0xff]  ;;  %v2598_v30 = vld [vmem:[%s6232_s6 + $0xe8] sm:$0xff] }
 0x717   : > { %2325 = vadd.xlane.f32.xlu0 %v2324_v40  ;;  %v4315_v48 = vpack.c.bf16 %v2580_v32, %v2579_v57  ;;  %v3491_v57 = vld [vmem:[%s6228_s2 + $0x13] ss:$8 sm:$0x3] }
 0x718   : > { %v2313_v54 = vadd.f32 %v2297_v28, %v4842_v63  ;;  %v2424_v28 = vld [vmem:[%s6231_s5 + $0x78] sm:$0xff]  ;;  %v2431_v32 = vrot.slane %v3491_v57, %v909_v9 }
 0x71a   : > { %v2327_v33 = vsel %vm917_vm5, %v2313_v54, 0.0 }
 0x71b   : > { %2328 = vadd.xlane.f32.xlu1 %v2327_v33  ;;  %v2421_v33 = vld [vmem:[%s6231_s5 + $0x60] sm:$0xff] }
 0x71e   : > { %v3694_v47 = vpop.f32.mrb[36].mxu1 }
 0x71f   : > { %v3695_v50 = vpop.f32.mrb[37].mxu1 }
 0x720   : > { %v3696_v29 = vadd.f32 %v3695_v50, %v3694_v47  ;;  %v2423_v47 = vld [vmem:[%s6231_s5 + $0x70] sm:$0xff] }
 0x722   : > { %v2207_v49 = vadd.f32 %v3696_v29, %v2119_v0  ;;  %v4291_v29 = vpack.c.bf16 %v2423_v47, %v2421_v33 }
 0x726   : > { %v3697_v20 = vpop.f32.mrb[38].mxu1  ;;  %v3970_v36 = vpop.f32.mrb[36].mxu0 }
 0x727   : > { %v3698_v37 = vpop.f32.mrb[39].mxu1  ;;  %v2301_v23 = vpop.f32.mrb[37].mxu0 }
 0x728   : > { %v3699_v38 = vadd.f32 %v3698_v37, %v3697_v20  ;;  %v2302_v11 = vadd.f32 %v2301_v23, %v2207_v49 }
 0x72a   : > { %v2212_v61 = vadd.f32 %v3699_v38, %v2119_v0  ;;  %v5680_v39 = vadd.f32 %v2302_v11, %v4850_v4 }
 0x72c   : > { %v2307_v42 = vadd.f32 %v3970_v36, %v2212_v61  ;;  %v2330_v63 = vsel %vm917_vm5, %v5680_v39, 0.0 }
 0x72d   : > { %2331 = vadd.xlane.f32.xlu0 %v2330_v63  ;;  %v2569_v63 = vld [vmem:[%s6232_s6] sm:$0xff] }
 0x72e   : > { %v5685_v44 = vadd.f32 %v2307_v42, %v4860_v7  ;;  %v2586_v42 = vld [vmem:[%s6232_s6 + $0x88] sm:$0xff] }
 0x730   : > { %v2333_v45 = vsel %vm917_vm5, %v5685_v44, 0.0 }
 0x731   : > { %2334 = vadd.xlane.f32.xlu1 %v2333_v45  ;;  %v2570_v45 = vld [vmem:[%s6232_s6 + $0x8] sm:$0xff] }
 0x794   : > { %v2320_v46 = vpop.xlane.xlu1 %2319 }
 0x795   : > { %v2337_v52 = vmul.f32 0.015625, %v2320_v46  ;;  %v2587_v46 = vld [vmem:[%s6232_s6 + $0x90] sm:$0xff] }
 0x797   : > { %v5689_v62 = vsub.f32 %v2310_v34, %v2337_v52  ;;  %v4277_v34 = vpack.c.bf16 %v2412_v19, %v2410_v12  ;;  %v2588_v52 = vld [vmem:[%s6232_s6 + $0x98] sm:$0xff]  ;;  %v2575_v19 = vld [vmem:[%s6232_s6 + $0x30] sm:$0xff] }
 0x798   : > { %v2323_v56 = vpop.xlane.xlu0 %2322 }
 0x799   : > { %v2338_v58 = vmul.f32 0.015625, %v2323_v56  ;;  %v2349_v4 = vmul.f32 %v5689_v62, %v5689_v62  ;;  %4278 = vmatprep.subr.bf16.mxu0 %v4277_v34  ;;  %v4295_v56 = vpack.c.bf16 %v2570_v45, %v2569_v63  ;;  %v2576_v34 = vld [vmem:[%s6232_s6 + $0x38] sm:$0xff] }
 0x79a   : > { %4280 = vmatpush1.bf16.msra.mxu0 %v4279_v24  ;;  %v4309_v24 = vpack.c.bf16 %v2594_v35, %v2593_v53 }
 0x79b   : > { %v5693_v59 = vsub.f32 %v2311_v43, %v2338_v58  ;;  %v2355_v60 = vsel %vm917_vm5, %v2349_v4, 0.0  ;;  %v2414_v43 = vld [vmem:[%s6231_s5 + $0x28] sm:$0xff]  ;;  %v4297_v58 = vpack.c.bf16 %v2588_v52, %v2587_v46  ;;  %v2571_v4 = vld [vmem:[%s6232_s6 + $0x10] sm:$0xff] }
 0x79c   : > { %2356 = vadd.xlane.f32.xlu0 %v2355_v60  ;;  %v4281_v41 = vpack.c.bf16 %v2416_v25, %v2414_v43  ;;  %v2572_v60 = vld [vmem:[%s6232_s6 + $0x18] sm:$0xff]  ;;  %v2577_v43 = vld [vmem:[%s6232_s6 + $0x40] sm:$0xff]  ;;  %v2578_v25 = vld [vmem:[%s6232_s6 + $0x48] sm:$0xff] }
 0x79d   : > { %v2350_v7 = vmul.f32 %v5693_v59, %v5693_v59  ;;  %v4311_v14 = vpack.c.bf16 %v2578_v25, %v2577_v43  ;;  %v2599_v43 = vld [vmem:[%s6232_s6 + $0xf0] sm:$0xff]  ;;  %v2600_v25 = vld [vmem:[%s6232_s6 + $0xf8] sm:$0xff] }
 0x79e   : > { %4282 = vmatprep.subr.bf16.mxu0 %v4281_v41  ;;  %v2595_v41 = vld [vmem:[%s6232_s6 + $0xd0] sm:$0xff] }
 0x79f   : > { %v2358_v18 = vsel %vm917_vm5, %v2350_v7, 0.0  ;;  %4284 = vmatpush1.bf16.msra.mxu0 %v4283_v27  ;;  %v2589_v7 = vld [vmem:[%s6232_s6 + $0xa0] sm:$0xff]  ;;  %v4313_v27 = vpack.c.bf16 %v2596_v26, %v2595_v41  ;;  %v4321_v41 = vpack.c.bf16 %v2600_v25, %v2599_v43  ;;  %v2583_v26 = vld [vmem:[%s6232_s6 + $0x70] sm:$0xff] }
 0x7a0   : > { %2359 = vadd.xlane.f32.xlu1 %v2358_v18  ;;  %4286 = vmatprep.subr.bf16.mxu0 %v4285_v51  ;;  %v2590_v18 = vld [vmem:[%s6232_s6 + $0xa8] sm:$0xff]  ;;  %v2597_v51 = vld [vmem:[%s6232_s6 + $0xe0] sm:$0xff] }
 0x7a3   : > { %4288 = vmatpush1.bf16.msra.mxu0 %v4287_v31  ;;  %v4317_v31 = vpack.c.bf16 %v2598_v30, %v2597_v51  ;;  %v2435_v51 = vrot.slane %v3491_v57, %v913_v13 }
 0x7a4   : > { %v2326_v10 = vpop.xlane.xlu0 %2325 }
 0x7a5   : > { %v2339_v15 = vmul.f32 0.015625, %v2326_v10  ;;  %v4299_v10 = vpack.c.bf16 %v2572_v60, %v2571_v4 }
 0x7a7   : > { %v5699_v17 = vsub.f32 %v2312_v21, %v2339_v15  ;;  %v2422_v21 = vld [vmem:[%s6231_s5 + $0x68] sm:$0xff]  ;;  %v4301_v15 = vpack.c.bf16 %v2590_v18, %v2589_v7 }
 0x7a8   : > { %v2329_v0 = vpop.xlane.xlu1 %2328 }
 0x7a9   : > { %v2340_v1 = vmul.f32 0.015625, %v2329_v0  ;;  %v2351_v8 = vmul.f32 %v5699_v17, %v5699_v17  ;;  %v2573_v0 = vld [vmem:[%s6232_s6 + $0x20] sm:$0xff] }
 0x7ab   : > { %v5703_v22 = vsub.f32 %v2313_v54, %v2340_v1  ;;  %v2361_v3 = vsel %vm917_vm5, %v2351_v8, 0.0  ;;  %v4289_v54 = vpack.c.bf16 %v2424_v28, %v2422_v21  ;;  %v2574_v1 = vld [vmem:[%s6232_s6 + $0x28] sm:$0xff]  ;;  %v2591_v8 = vld [vmem:[%s6232_s6 + $0xb0] sm:$0xff] }
 0x7ac   : > { %2362 = vadd.xlane.f32.xlu0 %v2361_v3  ;;  %v2592_v3 = vld [vmem:[%s6232_s6 + $0xb8] sm:$0xff] }
 0x7ad   : > { %v2352_v6 = vmul.f32 %v5703_v22, %v5703_v22  ;;  %4290 = vmatprep.subr.bf16.mxu0 %v4289_v54  ;;  %v4305_v12 = vpack.c.bf16 %v2592_v3, %v2591_v8 }
 0x7ae   : > { %4292 = vmatpush1.bf16.msra.mxu0 %v4291_v29  ;;  %v2316_v29 = vld [vmem:[%s6228_s2 + $0x11] ss:$0 sm:$0xff] }
 0x7af   : > { %v2364_v16 = vsel %vm917_vm5, %v2352_v6, 0.0  ;;  %4325 = vmatprep.subr.bf16.mxu0 %v4568_v2  ;;  %v4303_v6 = vpack.c.bf16 %v2574_v1, %v2573_v0 }
 0x7b0   : > { %2365 = vadd.xlane.f32.xlu1 %v2364_v16  ;;  %v4307_v16 = vpack.c.bf16 %v2576_v34, %v2575_v19 }
 0x7ba   : > { %v2332_v40 = vpop.xlane.xlu0 %2331 }
 0x7bb   : > { %v2341_v50 = vmul.f32 0.015625, %v2332_v40 }
 0x7bd   : > { %v5758_v20 = vsub.f32 %v5680_v39, %v2341_v50  ;;  %v2585_v39 = vld [vmem:[%s6232_s6 + $0x80] sm:$0xff] }
 0x7be   : > { %v2335_v36 = vpop.xlane.xlu1 %2334 }
 0x7bf   : > { %v2342_v49 = vmul.f32 0.015625, %v2335_v36  ;;  %v2353_v37 = vmul.f32 %v5758_v20, %v5758_v20 }
 0x7c1   : > { %v5764_v23 = vsub.f32 %v5685_v44, %v2342_v49  ;;  %v2367_v38 = vsel %vm917_vm5, %v2353_v37, 0.0  ;;  %v4293_v44 = vpack.c.bf16 %v2586_v42, %v2585_v39  ;;  %v2317_v37 = vld [vmem:[%s6228_s2 + $0x12] ss:$0 sm:$0xff] }
 0x7c2   : > { %2368 = vadd.xlane.f32.xlu0 %v2367_v38 }
 0x7c3   : > { %v2354_v11 = vmul.f32 %v5764_v23, %v5764_v23  ;;  %4294 = vmatprep.subr.bf16.mxu1 %v4293_v44 }
 0x7c4   : > { %4296 = vmatpush3.bf16.msra.mxu1 %v4295_v56 }
 0x7c5   : > { %v2370_v61 = vsel %vm917_vm5, %v2354_v11, 0.0  ;;  %4298 = vmatprep.subr.bf16.mxu1 %v4297_v58 }
 0x7c6   : > { %2371 = vadd.xlane.f32.xlu1 %v2370_v61 }
 0x7c8   : > { %4300 = vmatpush3.bf16.msra.mxu1 %v4299_v10 }
 0x7c9   : > { %4302 = vmatprep.subr.bf16.mxu1 %v4301_v15 }
 0x7cc   : > { %4304 = vmatpush3.bf16.msra.mxu1 %v4303_v6 }
 0x7cd   : > { %4306 = vmatprep.subr.bf16.mxu1 %v4305_v12 }
 0x7d0   : > { %4308 = vmatpush3.bf16.msra.mxu1 %v4307_v16 }
 0x7d1   : > { %4310 = vmatprep.subr.bf16.mxu1 %v4309_v24 }
 0x7d4   : > { %4312 = vmatpush3.bf16.msra.mxu1 %v4311_v14  ;;  %v2584_v14 = vld [vmem:[%s6232_s6 + $0x78] sm:$0xff] }
 0x7d5   : > { %4314 = vmatprep.subr.bf16.mxu1 %v4313_v27  ;;  %v4323_v27 = vpack.c.bf16 %v2584_v14, %v2583_v26 }
 0x7d8   : > { %4316 = vmatpush3.bf16.msra.mxu1 %v4315_v48 }
 0x7d9   : > { %4318 = vmatprep.subr.bf16.mxu1 %v4317_v31 }
 0x829   : > { %v2357_v21 = vpop.xlane.xlu0 %2356 }
 0x82a   : > { %v2373_v28 = vmul.f32 0.015625, %v2357_v21 }
 0x82c   : > { %v2379_v40 = vadd.f32 1e-05, %v2373_v28 }
 0x82d   : > { %v2360_v54 = vpop.xlane.xlu1 %2359 }
 0x82e   : > { %4478 = vrsqrt.f32 %v2379_v40  ;;  %v2374_v33 = vmul.f32 0.015625, %v2360_v54 }
 0x830   : > { %v2380_v47 = vadd.f32 1e-05, %v2374_v33 }
 0x832   : > { %4480 = vrsqrt.f32 %v2380_v47 }
 0x838   : > { %v4479_v50 = vpop.eup %4478 }
 0x839   : > { %v2391_v36 = vmul.f32 %v4479_v50, %v5689_v62  ;;  %v2363_v49 = vpop.xlane.xlu0 %2362 }
 0x83a   : > { %v2375_v38 = vmul.f32 0.015625, %v2363_v49 }
 0x83b   : > { %v2397_v11 = vmul.f32 %v2391_v36, %v2316_v29 }
 0x83c   : > { %v4481_v61 = vpop.eup %4480  ;;  %v2381_v39 = vadd.f32 1e-05, %v2375_v38 }
 0x83d   : > { %v5855_v42 = vadd.f32 %v2397_v11, %v2317_v37  ;;  %v2366_v63 = vpop.xlane.xlu1 %2365  ;;  %v2392_v44 = vmul.f32 %v4481_v61, %v5693_v59 }
 0x83e   : > { %4482 = vrsqrt.f32 %v2381_v39  ;;  %v2376_v45 = vmul.f32 0.015625, %v2366_v63 }
 0x83f   : > { %3492 = vmatmul.mubr.msk.f32.vlgmr.msra.gmra.mrb[38].mxu0 %vm917_vm5, %v5855_v42  ;;  %v2398_v62 = vmul.f32 %v2392_v44, %v2316_v29 }
 0x840   : > { %v2382_v46 = vadd.f32 1e-05, %v2376_v45  ;;  %2526 = vmatprep.mubr.f32.mxu0 %v4571_v5 }
 0x841   : > { %v5861_v52 = vadd.f32 %v2398_v62, %v2317_v37 }
 0x842   : > { %4484 = vrsqrt.f32 %v2382_v46 }
 0x843   : > { %3493 = vmatmul.mubr.msk.f32.gmra.mrb[40].mxu0 %vm917_vm5, %v5861_v52 }
 0x844   : > { %2532 = vmatprep.mubr.f32.mxu0 %v4571_v5 }
 0x848   : > { %v4483_v56 = vpop.eup %4482 }
 0x849   : > { %v2393_v59 = vmul.f32 %v4483_v56, %v5699_v17 }
 0x84b   : > { %v2399_v58 = vmul.f32 %v2393_v59, %v2316_v29 }
 0x84c   : > { %v4485_v4 = vpop.eup %4484 }
 0x84d   : > { %v5867_v60 = vadd.f32 %v2399_v58, %v2317_v37  ;;  %v2394_v7 = vmul.f32 %v4485_v4, %v5703_v22 }
 0x84f   : > { %v2369_v18 = vpop.xlane.xlu0 %2368  ;;  %3494 = vmatmul.mubr.msk.f32.gmra.mrb[42].mxu0 %vm917_vm5, %v5867_v60  ;;  %v2400_v10 = vmul.f32 %v2394_v7, %v2316_v29 }
 0x850   : > { %v2377_v15 = vmul.f32 0.015625, %v2369_v18  ;;  %2538 = vmatprep.mubr.f32.mxu0 %v4571_v5 }
 0x851   : > { %v5873_v0 = vadd.f32 %v2400_v10, %v2317_v37 }
 0x852   : > { %v2383_v1 = vadd.f32 1e-05, %v2377_v15 }
 0x853   : > { %3495 = vmatmul.mubr.msk.f32.gmra.mrb[44].mxu0 %vm917_vm5, %v5873_v0  ;;  %v2372_v17 = vpop.xlane.xlu1 %2371 }
 0x854   : > { %4486 = vrsqrt.f32 %v2383_v1  ;;  %v2378_v8 = vmul.f32 0.015625, %v2372_v17  ;;  %2544 = vmatprep.mubr.f32.mxu0 %v4571_v5 }
 0x856   : > { %v2384_v22 = vadd.f32 1e-05, %v2378_v8 }
 0x858   : > { %4488 = vrsqrt.f32 %v2384_v22  ;;  %v2601_v22 = vld [vmem:[%s6228_s2 + $0x14] ss:$0 sm:$0xff] }
 0x85e   : > { %v4487_v3 = vpop.eup %4486 }
 0x85f   : > { %v2395_v6 = vmul.f32 %v4487_v3, %v5758_v20  ;;  %v2581_v20 = vld [vmem:[%s6232_s6 + $0x60] sm:$0xff] }
 0x861   : > { %v2401_v12 = vmul.f32 %v2395_v6, %v2316_v29 }
 0x862   : > { %v4489_v19 = vpop.eup %4488 }
 0x863   : > { %v5879_v34 = vadd.f32 %v2401_v12, %v2317_v37  ;;  %v2396_v53 = vmul.f32 %v4489_v19, %v5764_v23  ;;  %v2582_v23 = vld [vmem:[%s6232_s6 + $0x68] sm:$0xff] }
 0x864   : > { %v4319_v24 = vpack.c.bf16 %v2582_v23, %v2581_v20 }
 0x865   : > { %3496 = vmatmul.mubr.msk.f32.gmra.mrb[46].mxu0 %vm917_vm5, %v5879_v34  ;;  %v2402_v35 = vmul.f32 %v2396_v53, %v2316_v29 }
 0x866   : > { %2550 = vmatprep.mubr.f32.mxu0 %v4571_v5  ;;  %4320 = vmatpush3.bf16.msra.mxu1 %v4319_v24 }
 0x867   : > { %v5885_v16 = vadd.f32 %v2402_v35, %v2317_v37  ;;  %4322 = vmatprep.subr.bf16.mxu1 %v4321_v41 }
 0x869   : > { %3497 = vmatmul.mubr.msk.f32.gmra.mrb[48].mxu0 %vm917_vm5, %v5885_v16 }
 0x86a   : > { %3987 = vmatprep.mubr.msk.f32.mxu0 %vm4570_vm3, %v4571_v5  ;;  %4324 = vmatpush3.bf16.msra.mxu1 %v4323_v27 }
 0x86b   : > { %4337 = vmatprep.subr.bf16.mxu1 %v4568_v2 }
 0x912   : > { %v2522_v30 = vpop.f32.mrb[38].mxu0 }
 0x913   : > { %v2523_v48 = vadd.f32 %v2522_v30, %v2431_v32  ;;  %v2524_v31 = vpop.f32.mrb[39].mxu0 }
 0x914   : > { %v2525_v21 = vadd.f32 %v2524_v31, %v2435_v51 }
 0x915   : > { %v2557_v54 = vmax.f32 %v2523_v48, 0.0 }
 0x916   : > { %v2558_v28 = vmax.f32 %v2525_v21, 0.0  ;;  %v2528_v40 = vpop.f32.mrb[40].mxu0 }
 0x917   : > { %v2529_v33 = vadd.f32 %v2528_v40, %v2431_v32  ;;  %v2530_v47 = vpop.f32.mrb[41].mxu0 }
 0x918   : > { %v2531_v50 = vadd.f32 %v2530_v47, %v2435_v51  ;;  %2666 = vmatprep.mubr.f32.mxu1 %v2558_v28 }
 0x919   : > { %2667 = vmatmul.mubr.f32.vlgmr.msra.gmra.mrb[40].mxu1 %v2557_v54  ;;  %v2559_v36 = vmax.f32 %v2529_v33, 0.0 }
 0x91a   : > { %v2560_v29 = vmax.f32 %v2531_v50, 0.0 }
 0x91c   : > { %2671 = vmatprep.mubr.f32.mxu1 %v2560_v29 }
 0x91d   : > { %2672 = vmatmul.mubr.f32.gmra.mrb[42].mxu1 %v2559_v36 }
 0x922   : > { %v2534_v9 = vpop.f32.mrb[42].mxu0 }
 0x923   : > { %v2535_v49 = vadd.f32 %v2534_v9, %v2431_v32  ;;  %v2536_v55 = vpop.f32.mrb[43].mxu0 }
 0x924   : > { %v2537_v13 = vadd.f32 %v2536_v55, %v2435_v51 }
 0x925   : > { %v2561_v11 = vmax.f32 %v2535_v49, 0.0 }
 0x926   : > { %v2562_v37 = vmax.f32 %v2537_v13, 0.0  ;;  %v2540_v38 = vpop.f32.mrb[44].mxu0 }
 0x927   : > { %v2541_v61 = vadd.f32 %v2540_v38, %v2431_v32  ;;  %v2542_v39 = vpop.f32.mrb[45].mxu0 }
 0x928   : > { %v2543_v63 = vadd.f32 %v2542_v39, %v2435_v51  ;;  %2676 = vmatprep.mubr.f32.mxu1 %v2562_v37 }
 0x929   : > { %2677 = vmatmul.mubr.f32.gmra.mrb[44].mxu1 %v2561_v11  ;;  %v2563_v45 = vmax.f32 %v2541_v61, 0.0 }
 0x92a   : > { %v2564_v44 = vmax.f32 %v2543_v63, 0.0 }
 0x92c   : > { %2681 = vmatprep.mubr.f32.mxu1 %v2564_v44 }
 0x92d   : > { %2682 = vmatmul.mubr.f32.gmra.mrb[46].mxu1 %v2563_v45 }
 0x938   : > { %v2546_v62 = vpop.f32.mrb[46].mxu0 }
 0x939   : > { %v2547_v46 = vadd.f32 %v2546_v62, %v2431_v32  ;;  %v2548_v56 = vpop.f32.mrb[47].mxu0 }
 0x93a   : > { %v2549_v59 = vadd.f32 %v2548_v56, %v2435_v51 }
 0x93b   : > { %v2565_v7 = vmax.f32 %v2547_v46, 0.0 }
 0x93c   : > { %v2566_v58 = vmax.f32 %v2549_v59, 0.0  ;;  %v2552_v4 = vpop.f32.mrb[48].mxu0 }
 0x93d   : > { %v2553_v18 = vadd.f32 %v2552_v4, %v2431_v32  ;;  %v2554_v10 = vpop.f32.mrb[49].mxu0 }
 0x93e   : > { %v2555_v15 = vadd.f32 %v2554_v10, %v2435_v51  ;;  %2686 = vmatprep.mubr.f32.mxu1 %v2566_v58 }
 0x93f   : > { %2687 = vmatmul.mubr.f32.gmra.mrb[48].mxu1 %v2565_v7  ;;  %v2567_v17 = vmax.f32 %v2553_v18, 0.0 }
 0x940   : > { %v2568_v1 = vmax.f32 %v2555_v15, 0.0 }
 0x942   : > { %2691 = vmatprep.mubr.f32.mxu1 %v2568_v1 }
 0x943   : > { %2692 = vmatmul.mubr.f32.gmra.mrb[50].mxu1 %v2567_v17 }
 0x944   : > { %4006 = vmatprep.mubr.msk.f32.mxu1 %vm4570_vm3, %v4571_v5 }
 0x9ec   : > { %v3754_v8 = vpop.f32.mrb[40].mxu1 }
 0x9ed   : > { %v3755_v3 = vpop.f32.mrb[41].mxu1 }
 0x9ee   : > { %v3756_v6 = vadd.f32 %v3755_v3, %v3754_v8 }
 0x9f0   : > { %v2669_v12 = vadd.f32 %v3756_v6, %v2601_v22  ;;  %v3757_v19 = vpop.f32.mrb[42].mxu1 }
 0x9f1   : > { %v3758_v53 = vpop.f32.mrb[43].mxu1 }
 0x9f2   : > { %v3759_v35 = vadd.f32 %v3758_v53, %v3757_v19  ;;  %v2697_v20 = vadd.f32 %v2669_v12, %v5855_v42 }
 0x9f4   : > { %v2674_v23 = vadd.f32 %v3759_v35, %v2601_v22  ;;  %v2705_v24 = vsel %vm917_vm5, %v2697_v20, 0.0 }
 0x9f5   : > { %2706 = vadd.xlane.f32.xlu0 %v2705_v24 }
 0x9f6   : > { %v2698_v43 = vadd.f32 %v2674_v23, %v5861_v52 }
 0x9f8   : > { %v2708_v25 = vsel %vm917_vm5, %v2698_v43, 0.0 }
 0x9f9   : > { %2709 = vadd.xlane.f32.xlu1 %v2708_v25  ;;  %v2703_v25 = vld [vmem:[%s6228_s2 + $0x15] ss:$0 sm:$0xff] }
 0x9fc   : > { %v3760_v41 = vpop.f32.mrb[44].mxu1 }
 0x9fd   : > { %v3761_v26 = vpop.f32.mrb[45].mxu1 }
 0x9fe   : > { %v3762_v14 = vadd.f32 %v3761_v26, %v3760_v41 }
 0xa00   : > { %v2679_v27 = vadd.f32 %v3762_v14, %v2601_v22  ;;  %v3763_v57 = vpop.f32.mrb[46].mxu1 }
 0xa01   : > { %v3764_v32 = vpop.f32.mrb[47].mxu1 }
 0xa02   : > { %v3765_v51 = vadd.f32 %v3764_v32, %v3763_v57  ;;  %v2699_v30 = vadd.f32 %v2679_v27, %v5867_v60  ;;  %v2704_v27 = vld [vmem:[%s6228_s2 + $0x16] ss:$0 sm:$0xff] }
 0xa04   : > { %v2684_v48 = vadd.f32 %v3765_v51, %v2601_v22  ;;  %v2711_v42 = vsel %vm917_vm5, %v2699_v30, 0.0 }
 0xa05   : > { %2712 = vadd.xlane.f32.xlu0 %v2711_v42 }
 0xa06   : > { %v2700_v31 = vadd.f32 %v2684_v48, %v5873_v0 }
 0xa08   : > { %v2714_v52 = vsel %vm917_vm5, %v2700_v31, 0.0 }
 0xa09   : > { %2715 = vadd.xlane.f32.xlu1 %v2714_v52 }
 0xa12   : > { %v3766_v21 = vpop.f32.mrb[48].mxu1 }
 0xa13   : > { %v3767_v28 = vpop.f32.mrb[49].mxu1 }
 0xa14   : > { %v3768_v40 = vadd.f32 %v3767_v28, %v3766_v21 }
 0xa16   : > { %v2689_v54 = vadd.f32 %v3768_v40, %v2601_v22  ;;  %v3769_v33 = vpop.f32.mrb[50].mxu1 }
 0xa17   : > { %v3770_v47 = vpop.f32.mrb[51].mxu1 }
 0xa18   : > { %v3771_v50 = vadd.f32 %v3770_v47, %v3769_v33  ;;  %v2701_v29 = vadd.f32 %v2689_v54, %v5879_v34 }
 0xa1a   : > { %v2694_v36 = vadd.f32 %v3771_v50, %v2601_v22  ;;  %v2717_v60 = vsel %vm917_vm5, %v2701_v29, 0.0 }
 0xa1b   : > { %2718 = vadd.xlane.f32.xlu0 %v2717_v60 }
 0xa1c   : > { %v2702_v9 = vadd.f32 %v2694_v36, %v5885_v16 }
 0xa1e   : > { %v2720_v0 = vsel %vm917_vm5, %v2702_v9, 0.0 }
 0xa1f   : > { %2721 = vadd.xlane.f32.xlu1 %v2720_v0 }
 0xa82   : > { %v2707_v49 = vpop.xlane.xlu0 %2706 }
 0xa83   : > { %v2723_v55 = vmul.f32 0.015625, %v2707_v49 }
 0xa85   : > { %v2729_v13 = vsub.f32 %v2697_v20, %v2723_v55 }
 0xa86   : > { %v2710_v37 = vpop.xlane.xlu1 %2709 }
 0xa87   : > { %v2724_v38 = vmul.f32 0.015625, %v2710_v37  ;;  %v2735_v11 = vmul.f32 %v2729_v13, %v2729_v13 }
 0xa89   : > { %v2730_v61 = vsub.f32 %v2698_v43, %v2724_v38  ;;  %v2741_v39 = vsel %vm917_vm5, %v2735_v11, 0.0 }
 0xa8a   : > { %2742 = vadd.xlane.f32.xlu0 %v2741_v39 }
 0xa8b   : > { %v2736_v34 = vmul.f32 %v2730_v61, %v2730_v61 }
 0xa8d   : > { %v2744_v63 = vsel %vm917_vm5, %v2736_v34, 0.0 }
 0xa8e   : > { %2745 = vadd.xlane.f32.xlu1 %v2744_v63 }
 0xa92   : > { %v2713_v44 = vpop.xlane.xlu0 %2712 }
 0xa93   : > { %v2725_v45 = vmul.f32 0.015625, %v2713_v44 }
 0xa95   : > { %v2731_v16 = vsub.f32 %v2699_v30, %v2725_v45 }
 0xa96   : > { %v2716_v62 = vpop.xlane.xlu1 %2715 }
 0xa97   : > { %v2726_v46 = vmul.f32 0.015625, %v2716_v62  ;;  %v2737_v56 = vmul.f32 %v2731_v16, %v2731_v16 }
 0xa99   : > { %v2732_v59 = vsub.f32 %v2700_v31, %v2726_v46  ;;  %v2747_v58 = vsel %vm917_vm5, %v2737_v56, 0.0 }
 0xa9a   : > { %2748 = vadd.xlane.f32.xlu0 %v2747_v58 }
 0xa9b   : > { %v2738_v4 = vmul.f32 %v2732_v59, %v2732_v59 }
 0xa9d   : > { %v2750_v7 = vsel %vm917_vm5, %v2738_v4, 0.0  ;;  %v4583_v4 = vmov 0  }
 0xa9e   : > { %2751 = vadd.xlane.f32.xlu1 %v2750_v7  ;;  %4452 = vset.pattern.permute.xlu0 %v4583_v4 }
 0xa9f   : > { %4453 = vset.pattern.permute.xlu1 %v4583_v4 }
 0xaa8   : > { %v2719_v18 = vpop.xlane.xlu0 %2718 }
 0xaa9   : > { %v2727_v10 = vmul.f32 0.015625, %v2719_v18 }
 0xaab   : > { %v2733_v15 = vsub.f32 %v2701_v29, %v2727_v10 }
 0xaac   : > { %v2722_v1 = vpop.xlane.xlu1 %2721 }
 0xaad   : > { %v2728_v17 = vmul.f32 0.015625, %v2722_v1  ;;  %v2739_v8 = vmul.f32 %v2733_v15, %v2733_v15 }
 0xaaf   : > { %v2734_v22 = vsub.f32 %v2702_v9, %v2728_v17  ;;  %v2753_v3 = vsel %vm917_vm5, %v2739_v8, 0.0 }
 0xab0   : > { %2754 = vadd.xlane.f32.xlu0 %v2753_v3 }
 0xab1   : > { %v2740_v6 = vmul.f32 %v2734_v22, %v2734_v22 }
 0xab3   : > { %v2756_v12 = vsel %vm917_vm5, %v2740_v6, 0.0 }
 0xab4   : > { %2757 = vadd.xlane.f32.xlu1 %v2756_v12 }
 0xb17   : > { %v2743_v19 = vpop.xlane.xlu0 %2742 }
 0xb18   : > { %v2759_v53 = vmul.f32 0.015625, %v2743_v19 }
 0xb1a   : > { %v2765_v35 = vadd.f32 1e-05, %v2759_v53 }
 0xb1b   : > { %v2746_v20 = vpop.xlane.xlu1 %2745 }
 0xb1c   : > { %4490 = vrsqrt.f32 %v2765_v35  ;;  %v2760_v23 = vmul.f32 0.015625, %v2746_v20 }
 0xb1e   : > { %v2766_v24 = vadd.f32 1e-05, %v2760_v23 }
 0xb20   : > { %4492 = vrsqrt.f32 %v2766_v24 }
 0xb26   : > { %v4491_v43 = vpop.eup %4490 }
 0xb27   : > { %v2749_v41 = vpop.xlane.xlu0 %2748  ;;  %v2777_v26 = vmul.f32 %v4491_v43, %v2729_v13 }
 0xb28   : > { %v2761_v14 = vmul.f32 0.015625, %v2749_v41 }
 0xb29   : > { %v2783_v57 = vmul.f32 %v2777_v26, %v2703_v25 }
 0xb2a   : > { %v4493_v32 = vpop.eup %4492  ;;  %v2767_v51 = vadd.f32 1e-05, %v2761_v14 }
 0xb2b   : > { %v2752_v30 = vpop.xlane.xlu1 %2751  ;;  %v2789_v48 = vadd.f32 %v2783_v57, %v2704_v27  ;;  %v2778_v42 = vmul.f32 %v4493_v32, %v2730_v61 }
 0xb2c   : > { %4494 = vrsqrt.f32 %v2767_v51  ;;  %v2762_v31 = vmul.f32 0.015625, %v2752_v30 }
 0xb2d   : > { %v2795_v52 = vsel %vm917_vm5, %v2789_v48, 0.0  ;;  %v2784_v21 = vmul.f32 %v2778_v42, %v2703_v25 }
 0xb2e   : > { %v2768_v28 = vadd.f32 1e-05, %v2762_v31  ;;  %2796 = vadd.xlane.f32.xlu0 %v2795_v52 }
 0xb2f   : > { %v2790_v40 = vadd.f32 %v2784_v21, %v2704_v27  ;;  %v3498_v21 = vld [vmem:[%s6233_s7 + $0x40] sm:$0xff] }
 0xb30   : > { %4496 = vrsqrt.f32 %v2768_v28  ;;  %v3499_v28 = vld [vmem:[%s6233_s7 + $0x48] sm:$0xff] }
 0xb31   : > { %v2798_v54 = vsel %vm917_vm5, %v2790_v40, 0.0 }
 0xb32   : > { %2799 = vadd.xlane.f32.xlu1 %v2798_v54  ;;  %v4326_v54 = vpack.c.bf16 %v3499_v28, %v3498_v21  ;;  %v3514_v28 = vld [vmem:[%s6233_s7 + $0xb0] sm:$0xff] }
 0xb34   : > { %4327 = vmatpush3.bf16.msra.mxu0 %v4326_v54  ;;  %v3523_v54 = vld [vmem:[%s6233_s7 + $0xf0] sm:$0xff] }
 0xb35   : > { %4328 = vmatprep.subr.bf16.mxu0 %v4568_v2 }
 0xb36   : > { %v4495_v33 = vpop.eup %4494 }
 0xb37   : > { %v2779_v47 = vmul.f32 %v4495_v33, %v2731_v16  ;;  %v2874_v33 = vld [vmem:[%s6233_s7 + $0x8] sm:$0xff] }
 0xb39   : > { %v2785_v50 = vmul.f32 %v2779_v47, %v2703_v25  ;;  %v3500_v47 = vld [vmem:[%s6233_s7 + $0x50] sm:$0xff] }
 0xb3a   : > { %v4497_v29 = vpop.eup %4496 }
 0xb3b   : > { %v2791_v36 = vadd.f32 %v2785_v50, %v2704_v27  ;;  %v2780_v60 = vmul.f32 %v4497_v29, %v2732_v59  ;;  %v3501_v50 = vld [vmem:[%s6233_s7 + $0x58] sm:$0xff] }
 0xb3d   : > { %v2755_v9 = vpop.xlane.xlu0 %2754  ;;  %v2801_v0 = vsel %vm917_vm5, %v2791_v36, 0.0  ;;  %v2786_v49 = vmul.f32 %v2780_v60, %v2703_v25  ;;  %v2876_v60 = vld [vmem:[%s6233_s7 + $0x18] sm:$0xff] }
 0xb3e   : > { %v2763_v55 = vmul.f32 0.015625, %v2755_v9  ;;  %2802 = vadd.xlane.f32.xlu0 %v2801_v0  ;;  %v4329_v9 = vpack.c.bf16 %v3501_v50, %v3500_v47 }
 0xb3f   : > { %v2792_v13 = vadd.f32 %v2786_v49, %v2704_v27  ;;  %v3502_v49 = vld [vmem:[%s6233_s7 + $0x60] sm:$0xff] }
 0xb40   : > { %v2769_v37 = vadd.f32 1e-05, %v2763_v55  ;;  %v3503_v55 = vld [vmem:[%s6233_s7 + $0x68] sm:$0xff]  ;;  %4330 = vmatpush3.bf16.msra.mxu0 %v4329_v9 }
 0xb41   : > { %v2758_v38 = vpop.xlane.xlu1 %2757  ;;  %v2804_v11 = vsel %vm917_vm5, %v2792_v13, 0.0  ;;  %4331 = vmatprep.subr.bf16.mxu0 %v4568_v2  ;;  %v3536_v9 = vld [vmem:[%s6233_s7 + $0x148] sm:$0xff] }
 0xb42   : > { %4498 = vrsqrt.f32 %v2769_v37  ;;  %v2764_v61 = vmul.f32 0.015625, %v2758_v38  ;;  %2805 = vadd.xlane.f32.xlu1 %v2804_v11  ;;  %v2878_v37 = vld [vmem:[%s6233_s7 + $0x28] sm:$0xff]  ;;  %v4332_v38 = vpack.c.bf16 %v3503_v55, %v3502_v49  ;;  %v3528_v55 = vld [vmem:[%s6233_s7 + $0x110] sm:$0xff] }
 0xb44   : > { %v2770_v39 = vadd.f32 1e-05, %v2764_v61  ;;  %v3504_v61 = vld [vmem:[%s6233_s7 + $0x70] sm:$0xff]  ;;  %4333 = vmatpush3.bf16.msra.mxu0 %v4332_v38  ;;  %v3529_v38 = vld [vmem:[%s6233_s7 + $0x118] sm:$0xff] }
 0xb45   : > { %4334 = vmatprep.subr.bf16.mxu0 %v4568_v2 }
 0xb46   : > { %4500 = vrsqrt.f32 %v2770_v39  ;;  %v3505_v39 = vld [vmem:[%s6233_s7 + $0x78] sm:$0xff] }
 0xb4c   : > { %v4499_v34 = vpop.eup %4498 }
 0xb4d   : > { %v2781_v63 = vmul.f32 %v4499_v34, %v2733_v15  ;;  %v2879_v34 = vld [vmem:[%s6233_s7 + $0x30] sm:$0xff] }
 0xb4f   : > { %v2787_v44 = vmul.f32 %v2781_v63, %v2703_v25  ;;  %v2880_v63 = vld [vmem:[%s6233_s7 + $0x38] sm:$0xff] }
 0xb50   : > { %v4501_v45 = vpop.eup %4500 }
 0xb51   : > { %v2793_v16 = vadd.f32 %v2787_v44, %v2704_v27  ;;  %v2782_v62 = vmul.f32 %v4501_v45, %v2734_v22  ;;  %v4335_v44 = vpack.c.bf16 %v3505_v39, %v3504_v61  ;;  %v4347_v45 = vpack.c.bf16 %v2880_v63, %v2879_v34  ;;  %v3538_v61 = vld [vmem:[%s6233_s7 + $0x158] sm:$0xff]  ;;  %v3530_v39 = vld [vmem:[%s6233_s7 + $0x120] sm:$0xff]  ;;  %v3531_v34 = vld [vmem:[%s6233_s7 + $0x128] sm:$0xff] }
 0xb52   : > { %v3539_v63 = vld [vmem:[%s6233_s7 + $0x160] sm:$0xff] }
 0xb53   : > { %v2807_v46 = vsel %vm917_vm5, %v2793_v16, 0.0  ;;  %v2788_v56 = vmul.f32 %v2782_v62, %v2703_v25  ;;  %4336 = vmatpush3.bf16.msra.mxu0 %v4335_v44  ;;  %v3540_v44 = vld [vmem:[%s6233_s7 + $0x168] sm:$0xff] }
 0xb54   : > { %2808 = vadd.xlane.f32.xlu0 %v2807_v46  ;;  %4349 = vmatprep.subr.bf16.mxu0 %v4568_v2 }
 0xb55   : > { %v2794_v59 = vadd.f32 %v2788_v56, %v2704_v27 }
 0xb57   : > { %v2810_v58 = vsel %vm917_vm5, %v2794_v59, 0.0 }
 0xb58   : > { %2811 = vadd.xlane.f32.xlu1 %v2810_v58 }
 0xbbb   : > { %v2797_v7 = vpop.xlane.xlu0 %2796 }
 0xbbf   : > { %v2800_v18 = vpop.xlane.xlu1 %2799 }
 0xbc0   : > { %v2813_v1 = vadd.f32 %v2800_v18, %v2797_v7 }
 0xbcb   : > { %v2803_v10 = vpop.xlane.xlu0 %2802 }
 0xbcc   : > { %v2814_v17 = vadd.f32 %v2813_v1, %v2803_v10 }
 0xbcf   : > { %v2806_v15 = vpop.xlane.xlu1 %2805 }
 0xbd0   : > { %v2815_v3 = vadd.f32 %v2814_v17, %v2806_v15 }
 0xbe1   : > { %v2809_v8 = vpop.xlane.xlu0 %2808 }
 0xbe2   : > { %v2816_v22 = vadd.f32 %v2815_v3, %v2809_v8  ;;  %v3508_v3 = vld [vmem:[%s6233_s7 + $0x80] sm:$0xff] }
 0xbe5   : > { %v2812_v6 = vpop.xlane.xlu1 %2811 }
 0xbe6   : > { %v2817_v12 = vadd.f32 %v2816_v22, %v2812_v6  ;;  %v3509_v22 = vld [vmem:[%s6233_s7 + $0x88] sm:$0xff]  ;;  %v3517_v6 = vld [vmem:[%s6233_s7 + $0xc0] sm:$0xff] }
 0xbe8   : > { %v2818_v19 = vmul.f32 0.0026041667, %v2817_v12  ;;  %v3518_v12 = vld [vmem:[%s6233_s7 + $0xc8] sm:$0xff] }
 0xbea   : > { %2821 = vperm.xlu0 %4452, %v2818_v19  }
 0xc69   : > { %v2822_v53 = vpop.permute.xlu0 %2821 }
 0xc6a   : > { %v5952_v35 = vsub.f32 %v2789_v48, %v2822_v53  ;;  %v5954_v20 = vsub.f32 %v2790_v40, %v2822_v53  ;;  %v5961_v25 = vsub.f32 %v2791_v36, %v2822_v53  ;;  %v5966_v14 = vsub.f32 %v2792_v13, %v2822_v53  ;;  %v2873_v40 = vld [vmem:[%s6233_s7] sm:$0xff]  ;;  %v2875_v36 = vld [vmem:[%s6233_s7 + $0x10] sm:$0xff] }
 0xc6b   : > { %v5971_v32 = vsub.f32 %v2793_v16, %v2822_v53  ;;  %v5976_v48 = vsub.f32 %v2794_v59, %v2822_v53  ;;  %v4338_v29 = vpack.c.bf16 %v2874_v33, %v2873_v40  ;;  %v4341_v0 = vpack.c.bf16 %v2876_v60, %v2875_v36  ;;  %v2877_v13 = vld [vmem:[%s6233_s7 + $0x20] sm:$0xff]  ;;  %v3515_v40 = vld [vmem:[%s6233_s7 + $0xb8] sm:$0xff]  ;;  %v3527_v36 = vld [vmem:[%s6233_s7 + $0x108] sm:$0xff] }
 0xc6c   : > { %v2830_v23 = vmul.f32 %v5952_v35, %v5952_v35  ;;  %v2831_v43 = vmul.f32 %v5954_v20, %v5954_v20  ;;  %v2832_v26 = vmul.f32 %v5961_v25, %v5961_v25  ;;  %v2833_v57 = vmul.f32 %v5966_v14, %v5966_v14  ;;  %v3524_v33 = vld [vmem:[%s6233_s7 + $0xf8] sm:$0xff]  ;;  %v3535_v60 = vld [vmem:[%s6233_s7 + $0x140] sm:$0xff] }
 0xc6d   : > { %v2834_v30 = vmul.f32 %v5971_v32, %v5971_v32  ;;  %v2835_v31 = vmul.f32 %v5976_v48, %v5976_v48  ;;  %4339 = vmatpush3.bf16.msra.mxu1 %v4338_v29  ;;  %v4344_v11 = vpack.c.bf16 %v2878_v37, %v2877_v13  ;;  %v4350_v53 = vpack.c.bf16 %v3509_v22, %v3508_v3  ;;  %v3526_v29 = vld [vmem:[%s6233_s7 + $0x100] sm:$0xff] }
 0xc6e   : > { %v2836_v24 = vsel %vm917_vm5, %v2830_v23, 0.0  ;;  %v2839_v41 = vsel %vm917_vm5, %v2831_v43, 0.0  ;;  %v2842_v27 = vsel %vm917_vm5, %v2832_v26, 0.0  ;;  %v2845_v51 = vsel %vm917_vm5, %v2833_v57, 0.0  ;;  %4340 = vmatprep.subr.bf16.mxu1 %v4568_v2  ;;  %v3511_v26 = vld [vmem:[%s6233_s7 + $0x98] sm:$0xff] }
 0xc6f   : > { %2837 = vadd.xlane.f32.xlu1 %v2836_v24  ;;  %v2848_v42 = vsel %vm917_vm5, %v2834_v30, 0.0  ;;  %v2851_v52 = vsel %vm917_vm5, %v2835_v31, 0.0  ;;  %v4362_v23 = vpack.c.bf16 %v3518_v12, %v3517_v6  ;;  %v3510_v24 = vld [vmem:[%s6233_s7 + $0x90] sm:$0xff]  ;;  %v3520_v57 = vld [vmem:[%s6233_s7 + $0xd8] sm:$0xff]  ;;  %v3513_v30 = vld [vmem:[%s6233_s7 + $0xa8] sm:$0xff]  ;;  %v4359_v47 = vpack.c.bf16 %v3515_v40, %v3514_v28 }
 0xc70   : > { %v3522_v31 = vld [vmem:[%s6233_s7 + $0xe8] sm:$0xff]  ;;  %v4371_v50 = vpack.c.bf16 %v3524_v33, %v3523_v54  ;;  %v4386_v49 = vpack.c.bf16 %v3536_v9, %v3535_v60 }
 0xc71   : > { %4342 = vmatpush3.bf16.msra.mxu1 %v4341_v0  ;;  %v4374_v0 = vpack.c.bf16 %v3527_v36, %v3526_v29 }
 0xc72   : > { %4343 = vmatprep.subr.bf16.mxu1 %v4568_v2 }
 0xc73   : > { %2840 = vadd.xlane.f32.xlu1 %v2839_v41 }
 0xc75   : > { %4345 = vmatpush3.bf16.msra.mxu1 %v4344_v11  ;;  %v3537_v11 = vld [vmem:[%s6233_s7 + $0x150] sm:$0xff] }
 0xc76   : > { %4346 = vmatprep.subr.bf16.mxu1 %v4568_v2 }
 0xc77   : > { %2843 = vadd.xlane.f32.xlu1 %v2842_v27  ;;  %v3519_v27 = vld [vmem:[%s6233_s7 + $0xd0] sm:$0xff] }
 0xc79   : > { %4348 = vmatpush3.bf16.msra.mxu1 %v4347_v45  ;;  %v4380_v45 = vpack.c.bf16 %v3531_v34, %v3530_v39 }
 0xc7a   : > { %4361 = vmatprep.subr.bf16.mxu1 %v4568_v2 }
 0xc7b   : > { %2846 = vadd.xlane.f32.xlu1 %v2845_v51  ;;  %v3512_v51 = vld [vmem:[%s6233_s7 + $0xa0] sm:$0xff] }
 0xc7f   : > { %2849 = vadd.xlane.f32.xlu1 %v2848_v42  ;;  %v3521_v42 = vld [vmem:[%s6233_s7 + $0xe0] sm:$0xff] }
 0xc80   : > { %v4368_v21 = vpack.c.bf16 %v3522_v31, %v3521_v42 }
 0xc83   : > { %2852 = vadd.xlane.f32.xlu1 %v2851_v52  ;;  %v4356_v52 = vpack.c.bf16 %v3513_v30, %v3512_v51 }
 0xcfc   : > { %v2838_v16 = vpop.xlane.xlu1 %2837 }
 0xd00   : > { %v2841_v62 = vpop.xlane.xlu1 %2840 }
 0xd01   : > { %v2854_v59 = vadd.f32 %v2841_v62, %v2838_v16  ;;  %v4392_v16 = vpack.c.bf16 %v3540_v44, %v3539_v63  ;;  %v3532_v62 = vld [vmem:[%s6233_s7 + $0x130] sm:$0xff] }
 0xd04   : > { %v2844_v46 = vpop.xlane.xlu1 %2843 }
 0xd05   : > { %v2855_v58 = vadd.f32 %v2854_v59, %v2844_v46  ;;  %v3533_v46 = vld [vmem:[%s6233_s7 + $0x138] sm:$0xff] }
 0xd06   : > { %v4383_v59 = vpack.c.bf16 %v3533_v46, %v3532_v62 }
 0xd08   : > { %v2847_v56 = vpop.xlane.xlu1 %2846 }
 0xd09   : > { %v2856_v7 = vadd.f32 %v2855_v58, %v2847_v56  ;;  %v3542_v56 = vld [vmem:[%s6233_s7 + $0x178] sm:$0xff] }
 0xd0c   : > { %v2850_v4 = vpop.xlane.xlu1 %2849 }
 0xd0d   : > { %v2857_v18 = vadd.f32 %v2856_v7, %v2850_v4 }
 0xd10   : > { %v2853_v10 = vpop.xlane.xlu1 %2852 }
 0xd11   : > { %v2858_v1 = vadd.f32 %v2857_v18, %v2853_v10 }
 0xd13   : > { %v2859_v15 = vmul.f32 0.0026041667, %v2858_v1 }
 0xd15   : > { %v2860_v17 = vadd.f32 1e-05, %v2859_v15 }
 0xd17   : > { %4502 = vrsqrt.f32 %v2860_v17 }
 0xd21   : > { %v4503_v8 = vpop.eup %4502 }
 0xd22   : > { %2864 = vperm.xlu1 %4453, %v4503_v8  }
 0xda1   : > { %v6050_v19 = vpop.permute.xlu1 %2864 }
 0xda2   : > { %v2867_v43 = vmul.f32 %v6050_v19, %v5952_v35  ;;  %v2868_v41 = vmul.f32 %v6050_v19, %v5954_v20  ;;  %v4353_v35 = vpack.c.bf16 %v3511_v26, %v3510_v24  ;;  %v4365_v20 = vpack.c.bf16 %v3520_v57, %v3519_v27  ;;  %v3368_v24 = vld [vmem:[%s6228_s2 + $0x6] ss:$0 sm:$0xff] }
 0xda3   : > { %v2869_v13 = vmul.f32 %v6050_v19, %v5961_v25  ;;  %v2870_v37 = vmul.f32 %v6050_v19, %v5966_v14  ;;  %v4377_v25 = vpack.c.bf16 %v3529_v38, %v3528_v55  ;;  %v4389_v14 = vpack.c.bf16 %v3538_v61, %v3537_v11 }
 0xda4   : > { %3988 = vmatmul.mubr.msk.f32.vlgmr.msra.gmra.mrb[50].mxu0 %vm917_vm5, %v2868_v41  ;;  %4007 = vmatmul.mubr.msk.f32.vlgmr.msra.gmra.mrb[52].mxu1 %vm917_vm5, %v2867_v43  ;;  %v2871_v4 = vmul.f32 %v6050_v19, %v5971_v32  ;;  %v2872_v7 = vmul.f32 %v6050_v19, %v5976_v48 }
 0xda5   : > { %4351 = vmatpush3.bf16.msra.mxu0 %v4350_v53  ;;  %4363 = vmatpush3.bf16.msra.mxu1 %v4362_v23 }
 0xda6   : > { %4352 = vmatprep.subr.bf16.mxu0 %v4568_v2  ;;  %4364 = vmatprep.subr.bf16.mxu1 %v4568_v2 }
 0xda7   : > { %4025 = vmatprep.mubr.msk.f32.mxu0 %vm4570_vm3, %v4571_v5  ;;  %4044 = vmatprep.mubr.msk.f32.mxu1 %vm4570_vm3, %v4571_v5 }
 0xda9   : > { %4354 = vmatpush3.bf16.msra.mxu0 %v4353_v35  ;;  %4366 = vmatpush3.bf16.msra.mxu1 %v4365_v20 }
 0xdaa   : > { %4355 = vmatprep.subr.bf16.mxu0 %v4568_v2  ;;  %4367 = vmatprep.subr.bf16.mxu1 %v4568_v2 }
 0xdad   : > { %4357 = vmatpush3.bf16.msra.mxu0 %v4356_v52  ;;  %4369 = vmatpush3.bf16.msra.mxu1 %v4368_v21 }
 0xdae   : > { %4358 = vmatprep.subr.bf16.mxu0 %v4568_v2  ;;  %4370 = vmatprep.subr.bf16.mxu1 %v4568_v2 }
 0xdb1   : > { %4360 = vmatpush3.bf16.msra.mxu0 %v4359_v47  ;;  %4372 = vmatpush3.bf16.msra.mxu1 %v4371_v50 }
 0xdb2   : > { %4373 = vmatprep.subr.bf16.mxu0 %v4568_v2  ;;  %4385 = vmatprep.subr.bf16.mxu1 %v4568_v2 }
 0xdb4   : > { %4026 = vmatmul.mubr.msk.f32.vlgmr.msra.gmra.mrb[52].mxu0 %vm917_vm5, %v2869_v13  ;;  %4045 = vmatmul.mubr.msk.f32.vlgmr.msra.gmra.mrb[54].mxu1 %vm917_vm5, %v2870_v37 }
 0xdb5   : > { %4375 = vmatpush3.bf16.msra.mxu0 %v4374_v0  ;;  %4387 = vmatpush3.bf16.msra.mxu1 %v4386_v49 }
 0xdb6   : > { %4376 = vmatprep.subr.bf16.mxu0 %v4568_v2  ;;  %4388 = vmatprep.subr.bf16.mxu1 %v4568_v2 }
 0xdb7   : > { %4063 = vmatprep.mubr.msk.f32.mxu0 %vm4570_vm3, %v4571_v5  ;;  %4082 = vmatprep.mubr.msk.f32.mxu1 %vm4570_vm3, %v4571_v5  ;;  %v3541_v5 = vld [vmem:[%s6233_s7 + $0x170] sm:$0xff] }
 0xdb8   : > { %v4395_v58 = vpack.c.bf16 %v3542_v56, %v3541_v5 }
 0xdb9   : > { %4378 = vmatpush3.bf16.msra.mxu0 %v4377_v25  ;;  %4390 = vmatpush3.bf16.msra.mxu1 %v4389_v14 }
 0xdba   : > { %4379 = vmatprep.subr.bf16.mxu0 %v4568_v2  ;;  %4391 = vmatprep.subr.bf16.mxu1 %v4568_v2 }
 0xdbd   : > { %4381 = vmatpush3.bf16.msra.mxu0 %v4380_v45  ;;  %4393 = vmatpush3.bf16.msra.mxu1 %v4392_v16 }
 0xdbe   : > { %4382 = vmatprep.subr.bf16.mxu0 %v4568_v2  ;;  %4394 = vmatprep.subr.bf16.mxu1 %v4568_v2 }
 0xdc1   : > { %4384 = vmatpush3.bf16.msra.mxu0 %v4383_v59  ;;  %4396 = vmatpush3.bf16.msra.mxu1 %v4395_v58 }
 0xdc4   : > { %4064 = vmatmul.mubr.msk.f32.vlgmr.msra.gmra.mrb[54].mxu0 %vm917_vm5, %v2871_v4  ;;  %4083 = vmatmul.mubr.msk.f32.vlgmr.msra.gmra.mrb[56].mxu1 %vm917_vm5, %v2872_v7 }
 0xe77   : > { %v2959_v18 = vpop.f32.mrb[50].mxu0  ;;  %v3032_v10 = vpop.f32.mrb[52].mxu1 }
 0xe78   : > { %v3033_v1 = vadd.f32 %v3032_v10, %v2959_v18  ;;  %v3989_v15 = vpop.f32.mrb[51].mxu0  ;;  %v4008_v17 = vpop.f32.mrb[53].mxu1 }
 0xe87   : > { %v3114_v2 = vpop.f32.mrb[52].mxu0  ;;  %v3197_v8 = vpop.f32.mrb[54].mxu1 }
 0xe88   : > { %v3118_v3 = vadd.f32 %v3114_v2, %v3033_v1  ;;  %v4027_v22 = vpop.f32.mrb[53].mxu0  ;;  %v4046_v6 = vpop.f32.mrb[55].mxu1 }
 0xe8a   : > { %v3201_v12 = vadd.f32 %v3197_v8, %v3118_v3 }
 0xe97   : > { %v3280_v32 = vpop.f32.mrb[54].mxu0  ;;  %v3363_v48 = vpop.f32.mrb[56].mxu1 }
 0xe98   : > { %v3284_v19 = vadd.f32 %v3280_v32, %v3201_v12  ;;  %v4065_v53 = vpop.f32.mrb[55].mxu0  ;;  %v4084_v23 = vpop.f32.mrb[57].mxu1 }
 0xe9a   : > { %v3367_v43 = vadd.f32 %v3363_v48, %v3284_v19 }
 0xe9c   : > { %v3369_v41 = vadd.f32 %v3368_v24, %v3367_v43 }
 0xe9e   : > { %3370 = vst [vmem:[%s350_s15] sm:$0xff] %v3369_v41 }
 0xe9f   : > { %4517 = shalt.err (!%p4514_p3)
}
 0xea0   : > { %s4518_s26 = scalar_lea.hbm %s6184_s21, 128  ;;  %s4522_s25 = scalar_lea.hbm %s6236_s10, 256 }
 0xea1   : > { %p4519_p4 = scmp.ne.s32.totalorder %s6184_s21, %s4518_s26  ;;  %p4523_p9 = scmp.lt.u32.totalorder %s6184_s21, %s6236_s10 }
 0xea2   : > { %p4524_p10 = scmp.lt.u32.totalorder %s4522_s25, %s4518_s26  ;;  %p4526_p12 = scmp.lt.u32.totalorder %s4518_s26, %s6184_s21 }
 0xea3   : > { %p4520_p7 = pnand %p4519_p4, %p4678_p5 }
 0xea4   : > { %p4525_p11 = por %p4524_p10, %p4523_p9 }
 0xea5   : > { %p4521_p8 = pneg %p4520_p7 }
 0xea6   : > { %p4527_p13 = por %p4526_p12, %p4525_p11 }
 0xea8   : > { %p4528_p0 = pnand %p4527_p13, %p4521_p8 }
 0xeaa   : > { %4531 = shalt.err (!%p4528_p0)
}
 0xeab   : > { %4397 = dma.vmem_to_hbm [thread:$0]  (%p4678_p5), %s6186_s22, 128, %s6184_s21, %s3372_s27  }
 0xeac PF: > { %p4403_p1 = scmp.ge.s32.totalorder %s4566_s16, 2  ;;  %s3397_s20 = sand.u32 1, %s4554_s13  }
 0xead   : > { %s3398_s28 = scalar_lea.sflag [#allocation3], %s3397_s20 }
 0xeae   : > { %p4400_p2 = pnand %p4403_p1, %p4682_p6 }
 0xeb0   : > { %4549 = dma.done.wait (!%p4400_p2), %s3398_s28, 128  }
 0xeb1   : > { %4551 = vsyncadd (!%p4400_p2), %s3398_s28, 4294967168  ;;  %s6253_s17 = sld [smem:[#allocation5_spill]]  ;;  %s6254_s15 = sld [smem:[#allocation6_spill]] }
 0xeb2   : > { %p20_p3 = scmp.ge.s32.totalorder %s4665_s19, 4   ;;  %s6255_s13 = smov %s4558_s14 }
 0xeb3   : > { %s6257_s16 = smov %s4665_s19 }
 0xeb4   :  { %22 = sbr.rel (!%p20_p3) target bundleno = 3 (0x3), region = 107 }
 0xeb7   : > { %s6256_s14 = smov %s6253_s17 }
 0xebb   :  { %3403 = vsyncpa [#allocation3], 1 }
 0xebc   :  { %3405 = vsyncpa [#allocation3 + $0x1], 1 }

</bundles_post_ra>
